<compile_context>
chip_gen: v7x
topology: tpu7x:2x2x1
jax: 0.10.0
libtpu: 0.0.40
codegen_flags: <defaults>
</compile_context>

<pallas_src>
import jax
import jax.numpy as jnp
import numpy as np
from jax.experimental import pallas as pl
from jax.experimental.pallas import tpu as pltpu


def _tap_masks(KH, KW, pad, H, W, B):
    """(KH*KW, B*H*W) float32 0/1 halo masks.

    Row t = (kh*KW + kw) marks, for every flattened output position p = h*W + w,
    whether input position (h + kh - pad, w + kw - pad) is inside the image.
    Identical for each of the B images packed into one grid step.
    """
    pos = np.arange(H * W)
    hh, ww = pos // W, pos % W
    rows = []
    for kh in range(KH):
        for kw in range(KW):
            dh, dw = kh - pad, kw - pad
            rows.append((hh + dh >= 0) & (hh + dh < H) &
                        (ww + dw >= 0) & (ww + dw < W))
    m = np.stack(rows).astype(np.float32)          # (KH*KW, H*W)
    return jnp.asarray(np.tile(m, (1, B)))         # (KH*KW, B*H*W)


def _build_fused_kernel(H, W, B, cfgs):
    """cfgs: per-layer (KH, KW, Cin, Cout, pad).

    Kernel refs: x, (w_bf16, shift, mask) * L, out, slab_scratch.
    """
    L = len(cfgs)
    HW = H * W
    HWB = B * HW

    def kernel(*refs):
        x_ref = refs[0]
        layer_refs = refs[1:1 + 3 * L]
        o_ref = refs[1 + 3 * L]
        slab_ref = refs[2 + 3 * L]

        # Layer-0 activation, channel-major (Cin0, B*HW).  Input is flattened NCHW so
        # no transpose is needed; for B > 1 the per-image (Cin0, HW) pieces concatenate
        # along the position axis at 256-aligned (lane-dense) offsets.
        if B == 1:
            cur = x_ref[0]
        else:
            cur = jnp.concatenate([x_ref[b] for b in range(B)], axis=1)

        c_off = 0
        for l, (KH, KW, Cin, Cout, pad) in enumerate(cfgs):
            w_ref, shift_ref, mask_ref = layer_refs[3 * l:3 * l + 3]
            K = KH * KW * Cin
            mask = mask_ref[...]                     # (KH*KW, B*HW) 0/1 float32

            # im2col, channel-major: tap t = static lane-roll of the flat activation by
            # its spatial offset, halo zeroed by the mask, stored lane-dense at sublane
            # offset t*Cin of the shared (K_max, B*HW) bf16 slab.
            for kh in range(KH):
                for kw in range(KW):
                    t = kh * KW + kw
                    off = (kh - pad) * W + (kw - pad)
                    if off == 0:                     # centre tap: no shift, fully valid
                        tap = cur
                    else:
                        # Static-shift roll along the lane axis (cross-lane path, not
                        # the store/VALU slots); pltpu.roll is a drop-in alternative.
                        tap = jnp.roll(cur, (-off) % HWB, axis=1) * mask[t:t + 1, :]
                    slab_ref[t * Cin:(t + 1) * Cin, :] = tap.astype(jnp.bfloat16)

            # ONE big-K MXU matmul per layer: (Cout, K) @ (K, B*HW), bf16 operands,
            # f32 accumulation.
            y = jnp.dot(w_ref[...], slab_ref[0:K, :],
                        preferred_element_type=jnp.float32)

            # Eval-mode BatchNorm: scale is pre-folded into the weights, per-channel
            # shift added here (broadcast along lanes).
            y = y + shift_ref[...]
            # ELU(alpha=1).  exp(y)-1 matches expm1(y) to <~1e-7 abs (well inside the
            # test tolerance); exp is the portable Mosaic EUP op.
            y = jnp.where(y > 0.0, y, jnp.exp(y) - 1.0)
            # TODO(synk): training-mode Dropout, batch-statistics BatchNorm and skip>1
            #             input routing are not reproduced (module defaults, eval mode).

            # Channel-major, lane-dense output: full 256-lane rows, sublane stripe at
            # c_off (0/32/64), i.e. the concatenated NCHW output written in place.
            if B == 1:
                o_ref[0, c_off:c_off + Cout, :] = y
            else:
                for b in range(B):
                    o_ref[b, c_off:c_off + Cout, :] = y[:, b * HW:(b + 1) * HW]
            c_off += Cout

            cur = y                                  # carry to next layer in registers

    return kernel


def stacked2d_core_dropout_forward(x_nchw, params, images_per_step=1):
    """Forward pass of Stacked2dCoreDropOut (eval mode, skip=0).

    x_nchw:          (N, C, H, W) float32 (PyTorch layout).
    params:          list of (w_hwio, bn_scale, bn_shift, pad) per layer.
    images_per_step: images B processed per grid step; grid = N // B.
    Returns (N, layers*hidden_channels, H, W) float32 (NCHW, no wrapper transpose).
    """
    N, Cin0, H, W = x_nchw.shape
    B = images_per_step
    assert N % B == 0, (N, B)
    HW, HWB = H * W, B * H * W

    x = x_nchw.reshape(N, Cin0, HW)                  # free reshape, already channel-major

    cfgs = []
    flat_inputs = [x]
    in_specs = [pl.BlockSpec((B, Cin0, HW), lambda n: (n, 0, 0))]
    cin, c_total = Cin0, 0
    for (w, scale, shift, pad) in params:
        KH, KW, _, Cout = w.shape
        # Only the module's default config (odd kernels, 'same' padding, dilation=1).
        assert KH == KW and KH % 2 == 1 and pad == KH // 2, (KH, KW, pad)
        K = KH * KW * cin
        cfgs.append((KH, KW, cin, Cout, pad))
        # Fold eval-mode BN scale into the conv weights and pre-cast to bf16 (Cout, K):
        # weight HBM bytes halved, no per-step cast / scale multiply inside the kernel.
        w_folded = jnp.transpose((w * scale).reshape(K, Cout)).astype(jnp.bfloat16)
        flat_inputs += [w_folded,
                        shift.reshape(Cout, 1).astype(jnp.float32),
                        _tap_masks(KH, KW, pad, H, W, B)]
        # Constant block index (0, 0): Pallas re-DMAs a block only when its block index
        # changes between steps, so these are fetched once, not once per grid step.
        in_specs += [pl.BlockSpec((Cout, K), lambda n: (0, 0)),
                     pl.BlockSpec((Cout, 1), lambda n: (0, 0)),
                     pl.BlockSpec((KH * KW, HWB), lambda n: (0, 0))]
        c_total += Cout
        cin = Cout

    # ONE shared im2col slab sized for the largest layer (layers run sequentially).
    k_max = max(kh * kw * ci for (kh, kw, ci, _, _) in cfgs)

    out = pl.pallas_call(
        _build_fused_kernel(H, W, B, cfgs),
        out_shape=jax.ShapeDtypeStruct((N, c_total, HW), jnp.float32),
        grid_spec=pltpu.PrefetchScalarGridSpec(
            num_scalar_prefetch=0,
            grid=(N // B,),
            in_specs=in_specs,
            out_specs=pl.BlockSpec((B, c_total, HW), lambda n: (n, 0, 0)),
            scratch_shapes=[pltpu.VMEM((k_max, HWB), jnp.bfloat16)]),
        compiler_params=pltpu.CompilerParams(
            dimension_semantics=("parallel",)),      # steps shard across v7x TensorCores
    )(*flat_inputs)

    # Output is already flattened NCHW -> final reshape is free (no HBM transpose pass).
    return out.reshape(N, c_total, H, W)


def init_params(key, input_channels, hidden_channels, input_kern,
                hidden_kern, layers, eps=1e-5):
    """Deterministic synthetic parameters matching the module's shapes (eval mode)."""
    params = []
    cin = input_channels
    for l in range(layers):
        k = input_kern if l == 0 else hidden_kern
        key, kw_, kg, kb, km, kv = jax.random.split(key, 6)
        fan_in = cin * k * k
        w = jax.random.normal(kw_, (k, k, cin, hidden_channels),
                              jnp.float32) / jnp.sqrt(float(fan_in))
        # BatchNorm2d params + running stats (eval mode), folded to scale/shift.
        gamma = 1.0 + 0.1 * jax.random.normal(kg, (hidden_channels,), jnp.float32)
        beta = 0.1 * jax.random.normal(kb, (hidden_channels,), jnp.float32)
        rmean = 0.1 * jax.random.normal(km, (hidden_channels,), jnp.float32)
        rvar = 1.0 + 0.1 * jax.random.uniform(kv, (hidden_channels,), jnp.float32)
        scale = gamma / jnp.sqrt(rvar + eps)
        shift = beta - rmean * scale
        pad = k // 2
        params.append((w, scale, shift, pad))
        cin = hidden_channels
    return params


def _ref_forward(x_nchw, params, dot_dtype):
    """Pure-JAX reference (lax conv).

    dot_dtype=bfloat16 mirrors the kernel's quantization points exactly (BN scale folded
    into the weights BEFORE the bf16 cast, activations cast to bf16 at each conv input,
    f32 accumulation); dot_dtype=float32 is the exact reference.
    """
    x = jnp.transpose(x_nchw, (0, 2, 3, 1))          # NHWC for lax conv
    ret, inp = [], x
    for (w, scale, shift, pad) in params:
        wf = (w * scale).astype(dot_dtype)           # same fold + quantization as kernel
        y = jax.lax.conv_general_dilated(
            inp.astype(dot_dtype), wf, (1, 1),
            ((pad, pad), (pad, pad)),
            dimension_numbers=("NHWC", "HWIO", "NHWC"),
            preferred_element_type=jnp.float32,
            precision=jax.lax.Precision.HIGHEST)
        y = y + shift
        inp = jnp.where(y > 0, y, jnp.expm1(y))      # torch.nn.ELU numerics
        ret.append(inp)
    out = jnp.concatenate(ret, axis=-1)
    return jnp.transpose(out, (0, 3, 1, 2))


if __name__ == "__main__":
    # Small shapes consistent with the module's forward.
    N, C_in, H, W = 2, 4, 16, 16
    hidden_channels = 32
    input_kern, hidden_kern, layers = 5, 3, 3

    key = jax.random.PRNGKey(0)
    key, kx = jax.random.split(key)
    x = jax.random.normal(kx, (N, C_in, H, W), jnp.float32)

    params = init_params(key, C_in, hidden_channels, input_kern,
                         hidden_kern, layers)

    # B=1 keeps grid = N = 2 (one step per v7x TensorCore at this tiny batch); for
    # larger N, images_per_step>1 amortizes per-step overhead and grows the matmul.
    out = jax.block_until_ready(
        stacked2d_core_dropout_forward(x, params, images_per_step=1))

    # outchannels property: layers * hidden_channels
    assert out.shape == (N, layers * hidden_channels, H, W), out.shape

    # Tight structural/indexing check: reference with identical bf16 quantization
    # points (folded weights + activations cast to bf16, f32 accumulation).
    ref_bf16 = jax.block_until_ready(_ref_forward(x, params, jnp.bfloat16))
    err_bf16 = float(jnp.max(jnp.abs(out - ref_bf16)))
    assert err_bf16 < 5e-3, f"mismatch vs bf16-operand reference: {err_bf16}"

    # Loose sanity bound vs the exact f32 reference (documents the bf16-MXU tradeoff).
    ref_f32 = jax.block_until_ready(_ref_forward(x, params, jnp.float32))
    err_f32 = float(jnp.max(jnp.abs(out - ref_f32)))
    assert err_f32 < 1e-1, f"too far from f32 reference: {err_f32}"

    print("KERNEL_OK")
</pallas_src>

<mosaic_0001>
module attributes {stable_mosaic.version = 11 : i64} {
  func.func @kernel(%arg0: i32, %arg1: memref<1x4x256xf32, #tpu.memory_space<vmem>>, %arg2: memref<32x100xbf16, #tpu.memory_space<vmem>>, %arg3: memref<32x1xf32, #tpu.memory_space<vmem>>, %arg4: memref<25x256xf32, #tpu.memory_space<vmem>>, %arg5: memref<32x288xbf16, #tpu.memory_space<vmem>>, %arg6: memref<32x1xf32, #tpu.memory_space<vmem>>, %arg7: memref<9x256xf32, #tpu.memory_space<vmem>>, %arg8: memref<32x288xbf16, #tpu.memory_space<vmem>>, %arg9: memref<32x1xf32, #tpu.memory_space<vmem>>, %arg10: memref<9x256xf32, #tpu.memory_space<vmem>>, %arg11: memref<1x96x256xf32, #tpu.memory_space<vmem>>, %arg12: memref<288x256xbf16, #tpu.memory_space<vmem>>) attributes {dimension_semantics = [#tpu.dimension_semantics<parallel>], iteration_bounds = array<i64: 2>, scalar_prefetch = 0 : i64, scratch_operands = 1 : i64, tpu.core_type = #tpu.core_type<tc>, window_params = [{transform_indices = @transform_0, window_bounds = array<i64: 1, 4, 256>}, {pipeline_mode = #tpu.pipeline_mode<synchronous>, transform_indices = @transform_1, window_bounds = array<i64: 32, 100>}, {pipeline_mode = #tpu.pipeline_mode<synchronous>, transform_indices = @transform_2, window_bounds = array<i64: 32, 1>}, {pipeline_mode = #tpu.pipeline_mode<synchronous>, transform_indices = @transform_3, window_bounds = array<i64: 25, 256>}, {pipeline_mode = #tpu.pipeline_mode<synchronous>, transform_indices = @transform_4, window_bounds = array<i64: 32, 288>}, {pipeline_mode = #tpu.pipeline_mode<synchronous>, transform_indices = @transform_5, window_bounds = array<i64: 32, 1>}, {pipeline_mode = #tpu.pipeline_mode<synchronous>, transform_indices = @transform_6, window_bounds = array<i64: 9, 256>}, {pipeline_mode = #tpu.pipeline_mode<synchronous>, transform_indices = @transform_7, window_bounds = array<i64: 32, 288>}, {pipeline_mode = #tpu.pipeline_mode<synchronous>, transform_indices = @transform_8, window_bounds = array<i64: 32, 1>}, {pipeline_mode = #tpu.pipeline_mode<synchronous>, transform_indices = @transform_9, window_bounds = array<i64: 9, 256>}, {transform_indices = @transform_10, window_bounds = array<i64: 1, 96, 256>}]} {
    %c0 = arith.constant 0 : index
    %c0_0 = arith.constant 0 : index
    %c0_1 = arith.constant 0 : index
    %0 = vector.load %arg1[%c0, %c0_0, %c0_1] : memref<1x4x256xf32, #tpu.memory_space<vmem>>, vector<1x4x256xf32>
    %1 = vector.shape_cast %0 : vector<1x4x256xf32> to vector<4x256xf32>
    %c0_2 = arith.constant 0 : index
    %c0_3 = arith.constant 0 : index
    %2 = vector.load %arg4[%c0_2, %c0_3] : memref<25x256xf32, #tpu.memory_space<vmem>>, vector<25x256xf32>
    %3 = vector.extract_strided_slice %1 {offsets = [0, 222], sizes = [4, 34], strides = [1, 1]} : vector<4x256xf32> to vector<4x34xf32>
    %4 = vector.extract_strided_slice %1 {offsets = [0, 0], sizes = [4, 222], strides = [1, 1]} : vector<4x256xf32> to vector<4x222xf32>
    %5 = tpu.concatenate %3, %4 in 1 : vector<4x34xf32>, vector<4x222xf32> -> vector<4x256xf32>
    %6 = vector.extract_strided_slice %2 {offsets = [0, 0], sizes = [1, 256], strides = [1, 1]} : vector<25x256xf32> to vector<1x256xf32>
    %7 = vector.broadcast %6 : vector<1x256xf32> to vector<4x256xf32>
    %8 = arith.mulf %5, %7 : vector<4x256xf32>
    %9 = arith.truncf %8 : vector<4x256xf32> to vector<4x256xbf16>
    %c0_4 = arith.constant 0 : index
    %c0_5 = arith.constant 0 : index
    %10 = vector.load %arg12[%c0_4, %c0_5] : memref<288x256xbf16, #tpu.memory_space<vmem>>, vector<4x256xbf16>
    tpu.vector_store %arg12[%c0_4, %c0_5], %9 {strides = array<i32>} : memref<288x256xbf16, #tpu.memory_space<vmem>>, vector<4x256xbf16>,
    %11 = vector.extract_strided_slice %1 {offsets = [0, 223], sizes = [4, 33], strides = [1, 1]} : vector<4x256xf32> to vector<4x33xf32>
    %12 = vector.extract_strided_slice %1 {offsets = [0, 0], sizes = [4, 223], strides = [1, 1]} : vector<4x256xf32> to vector<4x223xf32>
    %13 = tpu.concatenate %11, %12 in 1 : vector<4x33xf32>, vector<4x223xf32> -> vector<4x256xf32>
    %14 = vector.extract_strided_slice %2 {offsets = [1, 0], sizes = [1, 256], strides = [1, 1]} : vector<25x256xf32> to vector<1x256xf32>
    %15 = vector.broadcast %14 : vector<1x256xf32> to vector<4x256xf32>
    %16 = arith.mulf %13, %15 : vector<4x256xf32>
    %17 = arith.truncf %16 : vector<4x256xf32> to vector<4x256xbf16>
    %c4 = arith.constant 4 : index
    %c0_6 = arith.constant 0 : index
    %18 = vector.load %arg12[%c4, %c0_6] : memref<288x256xbf16, #tpu.memory_space<vmem>>, vector<4x256xbf16>
    tpu.vector_store %arg12[%c4, %c0_6], %17 {strides = array<i32>} : memref<288x256xbf16, #tpu.memory_space<vmem>>, vector<4x256xbf16>,
    %19 = vector.extract_strided_slice %1 {offsets = [0, 224], sizes = [4, 32], strides = [1, 1]} : vector<4x256xf32> to vector<4x32xf32>
    %20 = vector.extract_strided_slice %1 {offsets = [0, 0], sizes = [4, 224], strides = [1, 1]} : vector<4x256xf32> to vector<4x224xf32>
    %21 = tpu.concatenate %19, %20 in 1 : vector<4x32xf32>, vector<4x224xf32> -> vector<4x256xf32>
    %22 = vector.extract_strided_slice %2 {offsets = [2, 0], sizes = [1, 256], strides = [1, 1]} : vector<25x256xf32> to vector<1x256xf32>
    %23 = vector.broadcast %22 : vector<1x256xf32> to vector<4x256xf32>
    %24 = arith.mulf %21, %23 : vector<4x256xf32>
    %25 = arith.truncf %24 : vector<4x256xf32> to vector<4x256xbf16>
    %c8 = arith.constant 8 : index
    %c0_7 = arith.constant 0 : index
    %26 = vector.load %arg12[%c8, %c0_7] : memref<288x256xbf16, #tpu.memory_space<vmem>>, vector<4x256xbf16>
    tpu.vector_store %arg12[%c8, %c0_7], %25 {strides = array<i32>} : memref<288x256xbf16, #tpu.memory_space<vmem>>, vector<4x256xbf16>,
    %27 = vector.extract_strided_slice %1 {offsets = [0, 225], sizes = [4, 31], strides = [1, 1]} : vector<4x256xf32> to vector<4x31xf32>
    %28 = vector.extract_strided_slice %1 {offsets = [0, 0], sizes = [4, 225], strides = [1, 1]} : vector<4x256xf32> to vector<4x225xf32>
    %29 = tpu.concatenate %27, %28 in 1 : vector<4x31xf32>, vector<4x225xf32> -> vector<4x256xf32>
    %30 = vector.extract_strided_slice %2 {offsets = [3, 0], sizes = [1, 256], strides = [1, 1]} : vector<25x256xf32> to vector<1x256xf32>
    %31 = vector.broadcast %30 : vector<1x256xf32> to vector<4x256xf32>
    %32 = arith.mulf %29, %31 : vector<4x256xf32>
    %33 = arith.truncf %32 : vector<4x256xf32> to vector<4x256xbf16>
    %c12 = arith.constant 12 : index
    %c0_8 = arith.constant 0 : index
    %34 = vector.load %arg12[%c12, %c0_8] : memref<288x256xbf16, #tpu.memory_space<vmem>>, vector<4x256xbf16>
    tpu.vector_store %arg12[%c12, %c0_8], %33 {strides = array<i32>} : memref<288x256xbf16, #tpu.memory_space<vmem>>, vector<4x256xbf16>,
    %35 = vector.extract_strided_slice %1 {offsets = [0, 226], sizes = [4, 30], strides = [1, 1]} : vector<4x256xf32> to vector<4x30xf32>
    %36 = vector.extract_strided_slice %1 {offsets = [0, 0], sizes = [4, 226], strides = [1, 1]} : vector<4x256xf32> to vector<4x226xf32>
    %37 = tpu.concatenate %35, %36 in 1 : vector<4x30xf32>, vector<4x226xf32> -> vector<4x256xf32>
    %38 = vector.extract_strided_slice %2 {offsets = [4, 0], sizes = [1, 256], strides = [1, 1]} : vector<25x256xf32> to vector<1x256xf32>
    %39 = vector.broadcast %38 : vector<1x256xf32> to vector<4x256xf32>
    %40 = arith.mulf %37, %39 : vector<4x256xf32>
    %41 = arith.truncf %40 : vector<4x256xf32> to vector<4x256xbf16>
    %c16 = arith.constant 16 : index
    %c0_9 = arith.constant 0 : index
    %42 = vector.load %arg12[%c16, %c0_9] : memref<288x256xbf16, #tpu.memory_space<vmem>>, vector<4x256xbf16>
    tpu.vector_store %arg12[%c16, %c0_9], %41 {strides = array<i32>} : memref<288x256xbf16, #tpu.memory_space<vmem>>, vector<4x256xbf16>,
    %43 = vector.extract_strided_slice %1 {offsets = [0, 238], sizes = [4, 18], strides = [1, 1]} : vector<4x256xf32> to vector<4x18xf32>
    %44 = vector.extract_strided_slice %1 {offsets = [0, 0], sizes = [4, 238], strides = [1, 1]} : vector<4x256xf32> to vector<4x238xf32>
    %45 = tpu.concatenate %43, %44 in 1 : vector<4x18xf32>, vector<4x238xf32> -> vector<4x256xf32>
    %46 = vector.extract_strided_slice %2 {offsets = [5, 0], sizes = [1, 256], strides = [1, 1]} : vector<25x256xf32> to vector<1x256xf32>
    %47 = vector.broadcast %46 : vector<1x256xf32> to vector<4x256xf32>
    %48 = arith.mulf %45, %47 : vector<4x256xf32>
    %49 = arith.truncf %48 : vector<4x256xf32> to vector<4x256xbf16>
    %c20 = arith.constant 20 : index
    %c0_10 = arith.constant 0 : index
    %50 = vector.load %arg12[%c20, %c0_10] : memref<288x256xbf16, #tpu.memory_space<vmem>>, vector<4x256xbf16>
    tpu.vector_store %arg12[%c20, %c0_10], %49 {strides = array<i32>} : memref<288x256xbf16, #tpu.memory_space<vmem>>, vector<4x256xbf16>,
    %51 = vector.extract_strided_slice %1 {offsets = [0, 239], sizes = [4, 17], strides = [1, 1]} : vector<4x256xf32> to vector<4x17xf32>
    %52 = vector.extract_strided_slice %1 {offsets = [0, 0], sizes = [4, 239], strides = [1, 1]} : vector<4x256xf32> to vector<4x239xf32>
    %53 = tpu.concatenate %51, %52 in 1 : vector<4x17xf32>, vector<4x239xf32> -> vector<4x256xf32>
    %54 = vector.extract_strided_slice %2 {offsets = [6, 0], sizes = [1, 256], strides = [1, 1]} : vector<25x256xf32> to vector<1x256xf32>
    %55 = vector.broadcast %54 : vector<1x256xf32> to vector<4x256xf32>
    %56 = arith.mulf %53, %55 : vector<4x256xf32>
    %57 = arith.truncf %56 : vector<4x256xf32> to vector<4x256xbf16>
    %c24 = arith.constant 24 : index
    %c0_11 = arith.constant 0 : index
    %58 = vector.load %arg12[%c24, %c0_11] : memref<288x256xbf16, #tpu.memory_space<vmem>>, vector<4x256xbf16>
    tpu.vector_store %arg12[%c24, %c0_11], %57 {strides = array<i32>} : memref<288x256xbf16, #tpu.memory_space<vmem>>, vector<4x256xbf16>,
    %59 = vector.extract_strided_slice %1 {offsets = [0, 240], sizes = [4, 16], strides = [1, 1]} : vector<4x256xf32> to vector<4x16xf32>
    %60 = vector.extract_strided_slice %1 {offsets = [0, 0], sizes = [4, 240], strides = [1, 1]} : vector<4x256xf32> to vector<4x240xf32>
    %61 = tpu.concatenate %59, %60 in 1 : vector<4x16xf32>, vector<4x240xf32> -> vector<4x256xf32>
    %62 = vector.extract_strided_slice %2 {offsets = [7, 0], sizes = [1, 256], strides = [1, 1]} : vector<25x256xf32> to vector<1x256xf32>
    %63 = vector.broadcast %62 : vector<1x256xf32> to vector<4x256xf32>
    %64 = arith.mulf %61, %63 : vector<4x256xf32>
    %65 = arith.truncf %64 : vector<4x256xf32> to vector<4x256xbf16>
    %c28 = arith.constant 28 : index
    %c0_12 = arith.constant 0 : index
    %66 = vector.load %arg12[%c28, %c0_12] : memref<288x256xbf16, #tpu.memory_space<vmem>>, vector<4x256xbf16>
    tpu.vector_store %arg12[%c28, %c0_12], %65 {strides = array<i32>} : memref<288x256xbf16, #tpu.memory_space<vmem>>, vector<4x256xbf16>,
    %67 = vector.extract_strided_slice %1 {offsets = [0, 241], sizes = [4, 15], strides = [1, 1]} : vector<4x256xf32> to vector<4x15xf32>
    %68 = vector.extract_strided_slice %1 {offsets = [0, 0], sizes = [4, 241], strides = [1, 1]} : vector<4x256xf32> to vector<4x241xf32>
    %69 = tpu.concatenate %67, %68 in 1 : vector<4x15xf32>, vector<4x241xf32> -> vector<4x256xf32>
    %70 = vector.extract_strided_slice %2 {offsets = [8, 0], sizes = [1, 256], strides = [1, 1]} : vector<25x256xf32> to vector<1x256xf32>
    %71 = vector.broadcast %70 : vector<1x256xf32> to vector<4x256xf32>
    %72 = arith.mulf %69, %71 : vector<4x256xf32>
    %73 = arith.truncf %72 : vector<4x256xf32> to vector<4x256xbf16>
    %c32 = arith.constant 32 : index
    %c0_13 = arith.constant 0 : index
    %74 = vector.load %arg12[%c32, %c0_13] : memref<288x256xbf16, #tpu.memory_space<vmem>>, vector<4x256xbf16>
    tpu.vector_store %arg12[%c32, %c0_13], %73 {strides = array<i32>} : memref<288x256xbf16, #tpu.memory_space<vmem>>, vector<4x256xbf16>,
    %75 = vector.extract_strided_slice %1 {offsets = [0, 242], sizes = [4, 14], strides = [1, 1]} : vector<4x256xf32> to vector<4x14xf32>
    %76 = vector.extract_strided_slice %1 {offsets = [0, 0], sizes = [4, 242], strides = [1, 1]} : vector<4x256xf32> to vector<4x242xf32>
    %77 = tpu.concatenate %75, %76 in 1 : vector<4x14xf32>, vector<4x242xf32> -> vector<4x256xf32>
    %78 = vector.extract_strided_slice %2 {offsets = [9, 0], sizes = [1, 256], strides = [1, 1]} : vector<25x256xf32> to vector<1x256xf32>
    %79 = vector.broadcast %78 : vector<1x256xf32> to vector<4x256xf32>
    %80 = arith.mulf %77, %79 : vector<4x256xf32>
    %81 = arith.truncf %80 : vector<4x256xf32> to vector<4x256xbf16>
    %c36 = arith.constant 36 : index
    %c0_14 = arith.constant 0 : index
    %82 = vector.load %arg12[%c36, %c0_14] : memref<288x256xbf16, #tpu.memory_space<vmem>>, vector<4x256xbf16>
    tpu.vector_store %arg12[%c36, %c0_14], %81 {strides = array<i32>} : memref<288x256xbf16, #tpu.memory_space<vmem>>, vector<4x256xbf16>,
    %83 = vector.extract_strided_slice %1 {offsets = [0, 254], sizes = [4, 2], strides = [1, 1]} : vector<4x256xf32> to vector<4x2xf32>
    %84 = vector.extract_strided_slice %1 {offsets = [0, 0], sizes = [4, 254], strides = [1, 1]} : vector<4x256xf32> to vector<4x254xf32>
    %85 = tpu.concatenate %83, %84 in 1 : vector<4x2xf32>, vector<4x254xf32> -> vector<4x256xf32>
    %86 = vector.extract_strided_slice %2 {offsets = [10, 0], sizes = [1, 256], strides = [1, 1]} : vector<25x256xf32> to vector<1x256xf32>
    %87 = vector.broadcast %86 : vector<1x256xf32> to vector<4x256xf32>
    %88 = arith.mulf %85, %87 : vector<4x256xf32>
    %89 = arith.truncf %88 : vector<4x256xf32> to vector<4x256xbf16>
    %c40 = arith.constant 40 : index
    %c0_15 = arith.constant 0 : index
    %90 = vector.load %arg12[%c40, %c0_15] : memref<288x256xbf16, #tpu.memory_space<vmem>>, vector<4x256xbf16>
    tpu.vector_store %arg12[%c40, %c0_15], %89 {strides = array<i32>} : memref<288x256xbf16, #tpu.memory_space<vmem>>, vector<4x256xbf16>,
    %91 = vector.extract_strided_slice %1 {offsets = [0, 255], sizes = [4, 1], strides = [1, 1]} : vector<4x256xf32> to vector<4x1xf32>
    %92 = vector.extract_strided_slice %1 {offsets = [0, 0], sizes = [4, 255], strides = [1, 1]} : vector<4x256xf32> to vector<4x255xf32>
    %93 = tpu.concatenate %91, %92 in 1 : vector<4x1xf32>, vector<4x255xf32> -> vector<4x256xf32>
    %94 = vector.extract_strided_slice %2 {offsets = [11, 0], sizes = [1, 256], strides = [1, 1]} : vector<25x256xf32> to vector<1x256xf32>
    %95 = vector.broadcast %94 : vector<1x256xf32> to vector<4x256xf32>
    %96 = arith.mulf %93, %95 : vector<4x256xf32>
    %97 = arith.truncf %96 : vector<4x256xf32> to vector<4x256xbf16>
    %c44 = arith.constant 44 : index
    %c0_16 = arith.constant 0 : index
    %98 = vector.load %arg12[%c44, %c0_16] : memref<288x256xbf16, #tpu.memory_space<vmem>>, vector<4x256xbf16>
    tpu.vector_store %arg12[%c44, %c0_16], %97 {strides = array<i32>} : memref<288x256xbf16, #tpu.memory_space<vmem>>, vector<4x256xbf16>,
    %99 = arith.truncf %1 : vector<4x256xf32> to vector<4x256xbf16>
    %c48 = arith.constant 48 : index
    %c0_17 = arith.constant 0 : index
    %100 = vector.load %arg12[%c48, %c0_17] : memref<288x256xbf16, #tpu.memory_space<vmem>>, vector<4x256xbf16>
    tpu.vector_store %arg12[%c48, %c0_17], %99 {strides = array<i32>} : memref<288x256xbf16, #tpu.memory_space<vmem>>, vector<4x256xbf16>,
    %101 = vector.extract_strided_slice %1 {offsets = [0, 1], sizes = [4, 255], strides = [1, 1]} : vector<4x256xf32> to vector<4x255xf32>
    %102 = vector.extract_strided_slice %1 {offsets = [0, 0], sizes = [4, 1], strides = [1, 1]} : vector<4x256xf32> to vector<4x1xf32>
    %103 = tpu.concatenate %101, %102 in 1 : vector<4x255xf32>, vector<4x1xf32> -> vector<4x256xf32>
    %104 = vector.extract_strided_slice %2 {offsets = [13, 0], sizes = [1, 256], strides = [1, 1]} : vector<25x256xf32> to vector<1x256xf32>
    %105 = vector.broadcast %104 : vector<1x256xf32> to vector<4x256xf32>
    %106 = arith.mulf %103, %105 : vector<4x256xf32>
    %107 = arith.truncf %106 : vector<4x256xf32> to vector<4x256xbf16>
    %c52 = arith.constant 52 : index
    %c0_18 = arith.constant 0 : index
    %108 = vector.load %arg12[%c52, %c0_18] : memref<288x256xbf16, #tpu.memory_space<vmem>>, vector<4x256xbf16>
    tpu.vector_store %arg12[%c52, %c0_18], %107 {strides = array<i32>} : memref<288x256xbf16, #tpu.memory_space<vmem>>, vector<4x256xbf16>,
    %109 = vector.extract_strided_slice %1 {offsets = [0, 2], sizes = [4, 254], strides = [1, 1]} : vector<4x256xf32> to vector<4x254xf32>
    %110 = vector.extract_strided_slice %1 {offsets = [0, 0], sizes = [4, 2], strides = [1, 1]} : vector<4x256xf32> to vector<4x2xf32>
    %111 = tpu.concatenate %109, %110 in 1 : vector<4x254xf32>, vector<4x2xf32> -> vector<4x256xf32>
    %112 = vector.extract_strided_slice %2 {offsets = [14, 0], sizes = [1, 256], strides = [1, 1]} : vector<25x256xf32> to vector<1x256xf32>
    %113 = vector.broadcast %112 : vector<1x256xf32> to vector<4x256xf32>
    %114 = arith.mulf %111, %113 : vector<4x256xf32>
    %115 = arith.truncf %114 : vector<4x256xf32> to vector<4x256xbf16>
    %c56 = arith.constant 56 : index
    %c0_19 = arith.constant 0 : index
    %116 = vector.load %arg12[%c56, %c0_19] : memref<288x256xbf16, #tpu.memory_space<vmem>>, vector<4x256xbf16>
    tpu.vector_store %arg12[%c56, %c0_19], %115 {strides = array<i32>} : memref<288x256xbf16, #tpu.memory_space<vmem>>, vector<4x256xbf16>,
    %117 = vector.extract_strided_slice %1 {offsets = [0, 14], sizes = [4, 242], strides = [1, 1]} : vector<4x256xf32> to vector<4x242xf32>
    %118 = vector.extract_strided_slice %1 {offsets = [0, 0], sizes = [4, 14], strides = [1, 1]} : vector<4x256xf32> to vector<4x14xf32>
    %119 = tpu.concatenate %117, %118 in 1 : vector<4x242xf32>, vector<4x14xf32> -> vector<4x256xf32>
    %120 = vector.extract_strided_slice %2 {offsets = [15, 0], sizes = [1, 256], strides = [1, 1]} : vector<25x256xf32> to vector<1x256xf32>
    %121 = vector.broadcast %120 : vector<1x256xf32> to vector<4x256xf32>
    %122 = arith.mulf %119, %121 : vector<4x256xf32>
    %123 = arith.truncf %122 : vector<4x256xf32> to vector<4x256xbf16>
    %c60 = arith.constant 60 : index
    %c0_20 = arith.constant 0 : index
    %124 = vector.load %arg12[%c60, %c0_20] : memref<288x256xbf16, #tpu.memory_space<vmem>>, vector<4x256xbf16>
    tpu.vector_store %arg12[%c60, %c0_20], %123 {strides = array<i32>} : memref<288x256xbf16, #tpu.memory_space<vmem>>, vector<4x256xbf16>,
    %125 = vector.extract_strided_slice %1 {offsets = [0, 15], sizes = [4, 241], strides = [1, 1]} : vector<4x256xf32> to vector<4x241xf32>
    %126 = vector.extract_strided_slice %1 {offsets = [0, 0], sizes = [4, 15], strides = [1, 1]} : vector<4x256xf32> to vector<4x15xf32>
    %127 = tpu.concatenate %125, %126 in 1 : vector<4x241xf32>, vector<4x15xf32> -> vector<4x256xf32>
    %128 = vector.extract_strided_slice %2 {offsets = [16, 0], sizes = [1, 256], strides = [1, 1]} : vector<25x256xf32> to vector<1x256xf32>
    %129 = vector.broadcast %128 : vector<1x256xf32> to vector<4x256xf32>
    %130 = arith.mulf %127, %129 : vector<4x256xf32>
    %131 = arith.truncf %130 : vector<4x256xf32> to vector<4x256xbf16>
    %c64 = arith.constant 64 : index
    %c0_21 = arith.constant 0 : index
    %132 = vector.load %arg12[%c64, %c0_21] : memref<288x256xbf16, #tpu.memory_space<vmem>>, vector<4x256xbf16>
    tpu.vector_store %arg12[%c64, %c0_21], %131 {strides = array<i32>} : memref<288x256xbf16, #tpu.memory_space<vmem>>, vector<4x256xbf16>,
    %133 = vector.extract_strided_slice %1 {offsets = [0, 16], sizes = [4, 240], strides = [1, 1]} : vector<4x256xf32> to vector<4x240xf32>
    %134 = vector.extract_strided_slice %1 {offsets = [0, 0], sizes = [4, 16], strides = [1, 1]} : vector<4x256xf32> to vector<4x16xf32>
    %135 = tpu.concatenate %133, %134 in 1 : vector<4x240xf32>, vector<4x16xf32> -> vector<4x256xf32>
    %136 = vector.extract_strided_slice %2 {offsets = [17, 0], sizes = [1, 256], strides = [1, 1]} : vector<25x256xf32> to vector<1x256xf32>
    %137 = vector.broadcast %136 : vector<1x256xf32> to vector<4x256xf32>
    %138 = arith.mulf %135, %137 : vector<4x256xf32>
    %139 = arith.truncf %138 : vector<4x256xf32> to vector<4x256xbf16>
    %c68 = arith.constant 68 : index
    %c0_22 = arith.constant 0 : index
    %140 = vector.load %arg12[%c68, %c0_22] : memref<288x256xbf16, #tpu.memory_space<vmem>>, vector<4x256xbf16>
    tpu.vector_store %arg12[%c68, %c0_22], %139 {strides = array<i32>} : memref<288x256xbf16, #tpu.memory_space<vmem>>, vector<4x256xbf16>,
    %141 = vector.extract_strided_slice %1 {offsets = [0, 17], sizes = [4, 239], strides = [1, 1]} : vector<4x256xf32> to vector<4x239xf32>
    %142 = vector.extract_strided_slice %1 {offsets = [0, 0], sizes = [4, 17], strides = [1, 1]} : vector<4x256xf32> to vector<4x17xf32>
    %143 = tpu.concatenate %141, %142 in 1 : vector<4x239xf32>, vector<4x17xf32> -> vector<4x256xf32>
    %144 = vector.extract_strided_slice %2 {offsets = [18, 0], sizes = [1, 256], strides = [1, 1]} : vector<25x256xf32> to vector<1x256xf32>
    %145 = vector.broadcast %144 : vector<1x256xf32> to vector<4x256xf32>
    %146 = arith.mulf %143, %145 : vector<4x256xf32>
    %147 = arith.truncf %146 : vector<4x256xf32> to vector<4x256xbf16>
    %c72 = arith.constant 72 : index
    %c0_23 = arith.constant 0 : index
    %148 = vector.load %arg12[%c72, %c0_23] : memref<288x256xbf16, #tpu.memory_space<vmem>>, vector<4x256xbf16>
    tpu.vector_store %arg12[%c72, %c0_23], %147 {strides = array<i32>} : memref<288x256xbf16, #tpu.memory_space<vmem>>, vector<4x256xbf16>,
    %149 = vector.extract_strided_slice %1 {offsets = [0, 18], sizes = [4, 238], strides = [1, 1]} : vector<4x256xf32> to vector<4x238xf32>
    %150 = vector.extract_strided_slice %1 {offsets = [0, 0], sizes = [4, 18], strides = [1, 1]} : vector<4x256xf32> to vector<4x18xf32>
    %151 = tpu.concatenate %149, %150 in 1 : vector<4x238xf32>, vector<4x18xf32> -> vector<4x256xf32>
    %152 = vector.extract_strided_slice %2 {offsets = [19, 0], sizes = [1, 256], strides = [1, 1]} : vector<25x256xf32> to vector<1x256xf32>
    %153 = vector.broadcast %152 : vector<1x256xf32> to vector<4x256xf32>
    %154 = arith.mulf %151, %153 : vector<4x256xf32>
    %155 = arith.truncf %154 : vector<4x256xf32> to vector<4x256xbf16>
    %c76 = arith.constant 76 : index
    %c0_24 = arith.constant 0 : index
    %156 = vector.load %arg12[%c76, %c0_24] : memref<288x256xbf16, #tpu.memory_space<vmem>>, vector<4x256xbf16>
    tpu.vector_store %arg12[%c76, %c0_24], %155 {strides = array<i32>} : memref<288x256xbf16, #tpu.memory_space<vmem>>, vector<4x256xbf16>,
    %157 = vector.extract_strided_slice %1 {offsets = [0, 30], sizes = [4, 226], strides = [1, 1]} : vector<4x256xf32> to vector<4x226xf32>
    %158 = vector.extract_strided_slice %1 {offsets = [0, 0], sizes = [4, 30], strides = [1, 1]} : vector<4x256xf32> to vector<4x30xf32>
    %159 = tpu.concatenate %157, %158 in 1 : vector<4x226xf32>, vector<4x30xf32> -> vector<4x256xf32>
    %160 = vector.extract_strided_slice %2 {offsets = [20, 0], sizes = [1, 256], strides = [1, 1]} : vector<25x256xf32> to vector<1x256xf32>
    %161 = vector.broadcast %160 : vector<1x256xf32> to vector<4x256xf32>
    %162 = arith.mulf %159, %161 : vector<4x256xf32>
    %163 = arith.truncf %162 : vector<4x256xf32> to vector<4x256xbf16>
    %c80 = arith.constant 80 : index
    %c0_25 = arith.constant 0 : index
    %164 = vector.load %arg12[%c80, %c0_25] : memref<288x256xbf16, #tpu.memory_space<vmem>>, vector<4x256xbf16>
    tpu.vector_store %arg12[%c80, %c0_25], %163 {strides = array<i32>} : memref<288x256xbf16, #tpu.memory_space<vmem>>, vector<4x256xbf16>,
    %165 = vector.extract_strided_slice %1 {offsets = [0, 31], sizes = [4, 225], strides = [1, 1]} : vector<4x256xf32> to vector<4x225xf32>
    %166 = vector.extract_strided_slice %1 {offsets = [0, 0], sizes = [4, 31], strides = [1, 1]} : vector<4x256xf32> to vector<4x31xf32>
    %167 = tpu.concatenate %165, %166 in 1 : vector<4x225xf32>, vector<4x31xf32> -> vector<4x256xf32>
    %168 = vector.extract_strided_slice %2 {offsets = [21, 0], sizes = [1, 256], strides = [1, 1]} : vector<25x256xf32> to vector<1x256xf32>
    %169 = vector.broadcast %168 : vector<1x256xf32> to vector<4x256xf32>
    %170 = arith.mulf %167, %169 : vector<4x256xf32>
    %171 = arith.truncf %170 : vector<4x256xf32> to vector<4x256xbf16>
    %c84 = arith.constant 84 : index
    %c0_26 = arith.constant 0 : index
    %172 = vector.load %arg12[%c84, %c0_26] : memref<288x256xbf16, #tpu.memory_space<vmem>>, vector<4x256xbf16>
    tpu.vector_store %arg12[%c84, %c0_26], %171 {strides = array<i32>} : memref<288x256xbf16, #tpu.memory_space<vmem>>, vector<4x256xbf16>,
    %173 = vector.extract_strided_slice %1 {offsets = [0, 32], sizes = [4, 224], strides = [1, 1]} : vector<4x256xf32> to vector<4x224xf32>
    %174 = vector.extract_strided_slice %1 {offsets = [0, 0], sizes = [4, 32], strides = [1, 1]} : vector<4x256xf32> to vector<4x32xf32>
    %175 = tpu.concatenate %173, %174 in 1 : vector<4x224xf32>, vector<4x32xf32> -> vector<4x256xf32>
    %176 = vector.extract_strided_slice %2 {offsets = [22, 0], sizes = [1, 256], strides = [1, 1]} : vector<25x256xf32> to vector<1x256xf32>
    %177 = vector.broadcast %176 : vector<1x256xf32> to vector<4x256xf32>
    %178 = arith.mulf %175, %177 : vector<4x256xf32>
    %179 = arith.truncf %178 : vector<4x256xf32> to vector<4x256xbf16>
    %c88 = arith.constant 88 : index
    %c0_27 = arith.constant 0 : index
    %180 = vector.load %arg12[%c88, %c0_27] : memref<288x256xbf16, #tpu.memory_space<vmem>>, vector<4x256xbf16>
    tpu.vector_store %arg12[%c88, %c0_27], %179 {strides = array<i32>} : memref<288x256xbf16, #tpu.memory_space<vmem>>, vector<4x256xbf16>,
    %181 = vector.extract_strided_slice %1 {offsets = [0, 33], sizes = [4, 223], strides = [1, 1]} : vector<4x256xf32> to vector<4x223xf32>
    %182 = vector.extract_strided_slice %1 {offsets = [0, 0], sizes = [4, 33], strides = [1, 1]} : vector<4x256xf32> to vector<4x33xf32>
    %183 = tpu.concatenate %181, %182 in 1 : vector<4x223xf32>, vector<4x33xf32> -> vector<4x256xf32>
    %184 = vector.extract_strided_slice %2 {offsets = [23, 0], sizes = [1, 256], strides = [1, 1]} : vector<25x256xf32> to vector<1x256xf32>
    %185 = vector.broadcast %184 : vector<1x256xf32> to vector<4x256xf32>
    %186 = arith.mulf %183, %185 : vector<4x256xf32>
    %187 = arith.truncf %186 : vector<4x256xf32> to vector<4x256xbf16>
    %c92 = arith.constant 92 : index
    %c0_28 = arith.constant 0 : index
    %188 = vector.load %arg12[%c92, %c0_28] : memref<288x256xbf16, #tpu.memory_space<vmem>>, vector<4x256xbf16>
    tpu.vector_store %arg12[%c92, %c0_28], %187 {strides = array<i32>} : memref<288x256xbf16, #tpu.memory_space<vmem>>, vector<4x256xbf16>,
    %189 = vector.extract_strided_slice %1 {offsets = [0, 34], sizes = [4, 222], strides = [1, 1]} : vector<4x256xf32> to vector<4x222xf32>
    %190 = vector.extract_strided_slice %1 {offsets = [0, 0], sizes = [4, 34], strides = [1, 1]} : vector<4x256xf32> to vector<4x34xf32>
    %191 = tpu.concatenate %189, %190 in 1 : vector<4x222xf32>, vector<4x34xf32> -> vector<4x256xf32>
    %192 = vector.extract_strided_slice %2 {offsets = [24, 0], sizes = [1, 256], strides = [1, 1]} : vector<25x256xf32> to vector<1x256xf32>
    %193 = vector.broadcast %192 : vector<1x256xf32> to vector<4x256xf32>
    %194 = arith.mulf %191, %193 : vector<4x256xf32>
    %195 = arith.truncf %194 : vector<4x256xf32> to vector<4x256xbf16>
    %c96 = arith.constant 96 : index
    %c0_29 = arith.constant 0 : index
    %196 = vector.load %arg12[%c96, %c0_29] : memref<288x256xbf16, #tpu.memory_space<vmem>>, vector<4x256xbf16>
    tpu.vector_store %arg12[%c96, %c0_29], %195 {strides = array<i32>} : memref<288x256xbf16, #tpu.memory_space<vmem>>, vector<4x256xbf16>,
    %c0_30 = arith.constant 0 : index
    %c0_31 = arith.constant 0 : index
    %197 = vector.load %arg2[%c0_30, %c0_31] : memref<32x100xbf16, #tpu.memory_space<vmem>>, vector<32x100xbf16>
    %c0_32 = arith.constant 0 : index
    %c0_33 = arith.constant 0 : index
    %198 = vector.load %arg12[%c0_32, %c0_33] : memref<288x256xbf16, #tpu.memory_space<vmem>>, vector<100x256xbf16>
    %cst = arith.constant dense<0.000000e+00> : vector<32x256xf32>
    %199 = tpu.matmul %197, %198, %cst {dimension_numbers = #tpu.dot_dimension_numbers<[1], [0], [0], [1], [0, 0, 1, 1], [], []>} : vector<32x100xbf16>, vector<100x256xbf16>, vector<32x256xf32> -> vector<32x256xf32>
    %c0_34 = arith.constant 0 : index
    %c0_35 = arith.constant 0 : index
    %200 = vector.load %arg3[%c0_34, %c0_35] : memref<32x1xf32, #tpu.memory_space<vmem>>, vector<32x1xf32>
    %201 = vector.broadcast %200 : vector<32x1xf32> to vector<32x256xf32>
    %202 = arith.addf %199, %201 : vector<32x256xf32>
    %cst_36 = arith.constant 0.000000e+00 : f32
    %203 = vector.broadcast %cst_36 : f32 to vector<32x256xf32>
    %204 = arith.cmpf ogt, %202, %203 : vector<32x256xf32>
    %205 = math.exp %202 : vector<32x256xf32>
    %cst_37 = arith.constant 1.000000e+00 : f32
    %206 = vector.broadcast %cst_37 : f32 to vector<32x256xf32>
    %207 = arith.subf %205, %206 : vector<32x256xf32>
    %208 = arith.select %204, %202, %207 : vector<32x256xi1>, vector<32x256xf32>
    %c0_38 = arith.constant 0 : index
    %c0_39 = arith.constant 0 : index
    %c0_40 = arith.constant 0 : index
    %209 = vector.load %arg11[%c0_38, %c0_39, %c0_40] : memref<1x96x256xf32, #tpu.memory_space<vmem>>, vector<1x32x256xf32>
    %210 = vector.shape_cast %209 : vector<1x32x256xf32> to vector<32x256xf32>
    %211 = vector.shape_cast %208 : vector<32x256xf32> to vector<1x32x256xf32>
    tpu.vector_store %arg11[%c0_38, %c0_39, %c0_40], %211 {strides = array<i32>} : memref<1x96x256xf32, #tpu.memory_space<vmem>>, vector<1x32x256xf32>,
    %c0_41 = arith.constant 0 : index
    %c0_42 = arith.constant 0 : index
    %212 = vector.load %arg7[%c0_41, %c0_42] : memref<9x256xf32, #tpu.memory_space<vmem>>, vector<9x256xf32>
    %213 = vector.extract_strided_slice %208 {offsets = [0, 239], sizes = [32, 17], strides = [1, 1]} : vector<32x256xf32> to vector<32x17xf32>
    %214 = vector.extract_strided_slice %208 {offsets = [0, 0], sizes = [32, 239], strides = [1, 1]} : vector<32x256xf32> to vector<32x239xf32>
    %215 = tpu.concatenate %213, %214 in 1 : vector<32x17xf32>, vector<32x239xf32> -> vector<32x256xf32>
    %216 = vector.extract_strided_slice %212 {offsets = [0, 0], sizes = [1, 256], strides = [1, 1]} : vector<9x256xf32> to vector<1x256xf32>
    %217 = vector.broadcast %216 : vector<1x256xf32> to vector<32x256xf32>
    %218 = arith.mulf %215, %217 : vector<32x256xf32>
    %219 = arith.truncf %218 : vector<32x256xf32> to vector<32x256xbf16>
    %c0_43 = arith.constant 0 : index
    %c0_44 = arith.constant 0 : index
    %220 = vector.load %arg12[%c0_43, %c0_44] : memref<288x256xbf16, #tpu.memory_space<vmem>>, vector<32x256xbf16>
    tpu.vector_store %arg12[%c0_43, %c0_44], %219 {strides = array<i32>} : memref<288x256xbf16, #tpu.memory_space<vmem>>, vector<32x256xbf16>,
    %221 = vector.extract_strided_slice %208 {offsets = [0, 240], sizes = [32, 16], strides = [1, 1]} : vector<32x256xf32> to vector<32x16xf32>
    %222 = vector.extract_strided_slice %208 {offsets = [0, 0], sizes = [32, 240], strides = [1, 1]} : vector<32x256xf32> to vector<32x240xf32>
    %223 = tpu.concatenate %221, %222 in 1 : vector<32x16xf32>, vector<32x240xf32> -> vector<32x256xf32>
    %224 = vector.extract_strided_slice %212 {offsets = [1, 0], sizes = [1, 256], strides = [1, 1]} : vector<9x256xf32> to vector<1x256xf32>
    %225 = vector.broadcast %224 : vector<1x256xf32> to vector<32x256xf32>
    %226 = arith.mulf %223, %225 : vector<32x256xf32>
    %227 = arith.truncf %226 : vector<32x256xf32> to vector<32x256xbf16>
    %c32_45 = arith.constant 32 : index
    %c0_46 = arith.constant 0 : index
    %228 = vector.load %arg12[%c32_45, %c0_46] : memref<288x256xbf16, #tpu.memory_space<vmem>>, vector<32x256xbf16>
    tpu.vector_store %arg12[%c32_45, %c0_46], %227 {strides = array<i32>} : memref<288x256xbf16, #tpu.memory_space<vmem>>, vector<32x256xbf16>,
    %229 = vector.extract_strided_slice %208 {offsets = [0, 241], sizes = [32, 15], strides = [1, 1]} : vector<32x256xf32> to vector<32x15xf32>
    %230 = vector.extract_strided_slice %208 {offsets = [0, 0], sizes = [32, 241], strides = [1, 1]} : vector<32x256xf32> to vector<32x241xf32>
    %231 = tpu.concatenate %229, %230 in 1 : vector<32x15xf32>, vector<32x241xf32> -> vector<32x256xf32>
    %232 = vector.extract_strided_slice %212 {offsets = [2, 0], sizes = [1, 256], strides = [1, 1]} : vector<9x256xf32> to vector<1x256xf32>
    %233 = vector.broadcast %232 : vector<1x256xf32> to vector<32x256xf32>
    %234 = arith.mulf %231, %233 : vector<32x256xf32>
    %235 = arith.truncf %234 : vector<32x256xf32> to vector<32x256xbf16>
    %c64_47 = arith.constant 64 : index
    %c0_48 = arith.constant 0 : index
    %236 = vector.load %arg12[%c64_47, %c0_48] : memref<288x256xbf16, #tpu.memory_space<vmem>>, vector<32x256xbf16>
    tpu.vector_store %arg12[%c64_47, %c0_48], %235 {strides = array<i32>} : memref<288x256xbf16, #tpu.memory_space<vmem>>, vector<32x256xbf16>,
    %237 = vector.extract_strided_slice %208 {offsets = [0, 255], sizes = [32, 1], strides = [1, 1]} : vector<32x256xf32> to vector<32x1xf32>
    %238 = vector.extract_strided_slice %208 {offsets = [0, 0], sizes = [32, 255], strides = [1, 1]} : vector<32x256xf32> to vector<32x255xf32>
    %239 = tpu.concatenate %237, %238 in 1 : vector<32x1xf32>, vector<32x255xf32> -> vector<32x256xf32>
    %240 = vector.extract_strided_slice %212 {offsets = [3, 0], sizes = [1, 256], strides = [1, 1]} : vector<9x256xf32> to vector<1x256xf32>
    %241 = vector.broadcast %240 : vector<1x256xf32> to vector<32x256xf32>
    %242 = arith.mulf %239, %241 : vector<32x256xf32>
    %243 = arith.truncf %242 : vector<32x256xf32> to vector<32x256xbf16>
    %c96_49 = arith.constant 96 : index
    %c0_50 = arith.constant 0 : index
    %244 = vector.load %arg12[%c96_49, %c0_50] : memref<288x256xbf16, #tpu.memory_space<vmem>>, vector<32x256xbf16>
    tpu.vector_store %arg12[%c96_49, %c0_50], %243 {strides = array<i32>} : memref<288x256xbf16, #tpu.memory_space<vmem>>, vector<32x256xbf16>,
    %245 = arith.truncf %208 : vector<32x256xf32> to vector<32x256xbf16>
    %c128 = arith.constant 128 : index
    %c0_51 = arith.constant 0 : index
    %246 = vector.load %arg12[%c128, %c0_51] : memref<288x256xbf16, #tpu.memory_space<vmem>>, vector<32x256xbf16>
    tpu.vector_store %arg12[%c128, %c0_51], %245 {strides = array<i32>} : memref<288x256xbf16, #tpu.memory_space<vmem>>, vector<32x256xbf16>,
    %247 = vector.extract_strided_slice %208 {offsets = [0, 1], sizes = [32, 255], strides = [1, 1]} : vector<32x256xf32> to vector<32x255xf32>
    %248 = vector.extract_strided_slice %208 {offsets = [0, 0], sizes = [32, 1], strides = [1, 1]} : vector<32x256xf32> to vector<32x1xf32>
    %249 = tpu.concatenate %247, %248 in 1 : vector<32x255xf32>, vector<32x1xf32> -> vector<32x256xf32>
    %250 = vector.extract_strided_slice %212 {offsets = [5, 0], sizes = [1, 256], strides = [1, 1]} : vector<9x256xf32> to vector<1x256xf32>
    %251 = vector.broadcast %250 : vector<1x256xf32> to vector<32x256xf32>
    %252 = arith.mulf %249, %251 : vector<32x256xf32>
    %253 = arith.truncf %252 : vector<32x256xf32> to vector<32x256xbf16>
    %c160 = arith.constant 160 : index
    %c0_52 = arith.constant 0 : index
    %254 = vector.load %arg12[%c160, %c0_52] : memref<288x256xbf16, #tpu.memory_space<vmem>>, vector<32x256xbf16>
    tpu.vector_store %arg12[%c160, %c0_52], %253 {strides = array<i32>} : memref<288x256xbf16, #tpu.memory_space<vmem>>, vector<32x256xbf16>,
    %255 = vector.extract_strided_slice %208 {offsets = [0, 15], sizes = [32, 241], strides = [1, 1]} : vector<32x256xf32> to vector<32x241xf32>
    %256 = vector.extract_strided_slice %208 {offsets = [0, 0], sizes = [32, 15], strides = [1, 1]} : vector<32x256xf32> to vector<32x15xf32>
    %257 = tpu.concatenate %255, %256 in 1 : vector<32x241xf32>, vector<32x15xf32> -> vector<32x256xf32>
    %258 = vector.extract_strided_slice %212 {offsets = [6, 0], sizes = [1, 256], strides = [1, 1]} : vector<9x256xf32> to vector<1x256xf32>
    %259 = vector.broadcast %258 : vector<1x256xf32> to vector<32x256xf32>
    %260 = arith.mulf %257, %259 : vector<32x256xf32>
    %261 = arith.truncf %260 : vector<32x256xf32> to vector<32x256xbf16>
    %c192 = arith.constant 192 : index
    %c0_53 = arith.constant 0 : index
    %262 = vector.load %arg12[%c192, %c0_53] : memref<288x256xbf16, #tpu.memory_space<vmem>>, vector<32x256xbf16>
    tpu.vector_store %arg12[%c192, %c0_53], %261 {strides = array<i32>} : memref<288x256xbf16, #tpu.memory_space<vmem>>, vector<32x256xbf16>,
    %263 = vector.extract_strided_slice %208 {offsets = [0, 16], sizes = [32, 240], strides = [1, 1]} : vector<32x256xf32> to vector<32x240xf32>
    %264 = vector.extract_strided_slice %208 {offsets = [0, 0], sizes = [32, 16], strides = [1, 1]} : vector<32x256xf32> to vector<32x16xf32>
    %265 = tpu.concatenate %263, %264 in 1 : vector<32x240xf32>, vector<32x16xf32> -> vector<32x256xf32>
    %266 = vector.extract_strided_slice %212 {offsets = [7, 0], sizes = [1, 256], strides = [1, 1]} : vector<9x256xf32> to vector<1x256xf32>
    %267 = vector.broadcast %266 : vector<1x256xf32> to vector<32x256xf32>
    %268 = arith.mulf %265, %267 : vector<32x256xf32>
    %269 = arith.truncf %268 : vector<32x256xf32> to vector<32x256xbf16>
    %c224 = arith.constant 224 : index
    %c0_54 = arith.constant 0 : index
    %270 = vector.load %arg12[%c224, %c0_54] : memref<288x256xbf16, #tpu.memory_space<vmem>>, vector<32x256xbf16>
    tpu.vector_store %arg12[%c224, %c0_54], %269 {strides = array<i32>} : memref<288x256xbf16, #tpu.memory_space<vmem>>, vector<32x256xbf16>,
    %271 = vector.extract_strided_slice %208 {offsets = [0, 17], sizes = [32, 239], strides = [1, 1]} : vector<32x256xf32> to vector<32x239xf32>
    %272 = vector.extract_strided_slice %208 {offsets = [0, 0], sizes = [32, 17], strides = [1, 1]} : vector<32x256xf32> to vector<32x17xf32>
    %273 = tpu.concatenate %271, %272 in 1 : vector<32x239xf32>, vector<32x17xf32> -> vector<32x256xf32>
    %274 = vector.extract_strided_slice %212 {offsets = [8, 0], sizes = [1, 256], strides = [1, 1]} : vector<9x256xf32> to vector<1x256xf32>
    %275 = vector.broadcast %274 : vector<1x256xf32> to vector<32x256xf32>
    %276 = arith.mulf %273, %275 : vector<32x256xf32>
    %277 = arith.truncf %276 : vector<32x256xf32> to vector<32x256xbf16>
    %c256 = arith.constant 256 : index
    %c0_55 = arith.constant 0 : index
    %278 = vector.load %arg12[%c256, %c0_55] : memref<288x256xbf16, #tpu.memory_space<vmem>>, vector<32x256xbf16>
    tpu.vector_store %arg12[%c256, %c0_55], %277 {strides = array<i32>} : memref<288x256xbf16, #tpu.memory_space<vmem>>, vector<32x256xbf16>,
    %c0_56 = arith.constant 0 : index
    %c0_57 = arith.constant 0 : index
    %279 = vector.load %arg5[%c0_56, %c0_57] : memref<32x288xbf16, #tpu.memory_space<vmem>>, vector<32x288xbf16>
    %c0_58 = arith.constant 0 : index
    %c0_59 = arith.constant 0 : index
    %280 = vector.load %arg12[%c0_58, %c0_59] : memref<288x256xbf16, #tpu.memory_space<vmem>>, vector<288x256xbf16>
    %cst_60 = arith.constant dense<0.000000e+00> : vector<32x256xf32>
    %281 = tpu.matmul %279, %280, %cst_60 {dimension_numbers = #tpu.dot_dimension_numbers<[1], [0], [0], [1], [0, 0, 1, 1], [], []>} : vector<32x288xbf16>, vector<288x256xbf16>, vector<32x256xf32> -> vector<32x256xf32>
    %c0_61 = arith.constant 0 : index
    %c0_62 = arith.constant 0 : index
    %282 = vector.load %arg6[%c0_61, %c0_62] : memref<32x1xf32, #tpu.memory_space<vmem>>, vector<32x1xf32>
    %283 = vector.broadcast %282 : vector<32x1xf32> to vector<32x256xf32>
    %284 = arith.addf %281, %283 : vector<32x256xf32>
    %cst_63 = arith.constant 0.000000e+00 : f32
    %285 = vector.broadcast %cst_63 : f32 to vector<32x256xf32>
    %286 = arith.cmpf ogt, %284, %285 : vector<32x256xf32>
    %287 = math.exp %284 : vector<32x256xf32>
    %cst_64 = arith.constant 1.000000e+00 : f32
    %288 = vector.broadcast %cst_64 : f32 to vector<32x256xf32>
    %289 = arith.subf %287, %288 : vector<32x256xf32>
    %290 = arith.select %286, %284, %289 : vector<32x256xi1>, vector<32x256xf32>
    %c0_65 = arith.constant 0 : index
    %c32_66 = arith.constant 32 : index
    %c0_67 = arith.constant 0 : index
    %291 = vector.load %arg11[%c0_65, %c32_66, %c0_67] : memref<1x96x256xf32, #tpu.memory_space<vmem>>, vector<1x32x256xf32>
    %292 = vector.shape_cast %291 : vector<1x32x256xf32> to vector<32x256xf32>
    %293 = vector.shape_cast %290 : vector<32x256xf32> to vector<1x32x256xf32>
    tpu.vector_store %arg11[%c0_65, %c32_66, %c0_67], %293 {strides = array<i32>} : memref<1x96x256xf32, #tpu.memory_space<vmem>>, vector<1x32x256xf32>,
    %c0_68 = arith.constant 0 : index
    %c0_69 = arith.constant 0 : index
    %294 = vector.load %arg10[%c0_68, %c0_69] : memref<9x256xf32, #tpu.memory_space<vmem>>, vector<9x256xf32>
    %295 = vector.extract_strided_slice %290 {offsets = [0, 239], sizes = [32, 17], strides = [1, 1]} : vector<32x256xf32> to vector<32x17xf32>
    %296 = vector.extract_strided_slice %290 {offsets = [0, 0], sizes = [32, 239], strides = [1, 1]} : vector<32x256xf32> to vector<32x239xf32>
    %297 = tpu.concatenate %295, %296 in 1 : vector<32x17xf32>, vector<32x239xf32> -> vector<32x256xf32>
    %298 = vector.extract_strided_slice %294 {offsets = [0, 0], sizes = [1, 256], strides = [1, 1]} : vector<9x256xf32> to vector<1x256xf32>
    %299 = vector.broadcast %298 : vector<1x256xf32> to vector<32x256xf32>
    %300 = arith.mulf %297, %299 : vector<32x256xf32>
    %301 = arith.truncf %300 : vector<32x256xf32> to vector<32x256xbf16>
    %c0_70 = arith.constant 0 : index
    %c0_71 = arith.constant 0 : index
    %302 = vector.load %arg12[%c0_70, %c0_71] : memref<288x256xbf16, #tpu.memory_space<vmem>>, vector<32x256xbf16>
    tpu.vector_store %arg12[%c0_70, %c0_71], %301 {strides = array<i32>} : memref<288x256xbf16, #tpu.memory_space<vmem>>, vector<32x256xbf16>,
    %303 = vector.extract_strided_slice %290 {offsets = [0, 240], sizes = [32, 16], strides = [1, 1]} : vector<32x256xf32> to vector<32x16xf32>
    %304 = vector.extract_strided_slice %290 {offsets = [0, 0], sizes = [32, 240], strides = [1, 1]} : vector<32x256xf32> to vector<32x240xf32>
    %305 = tpu.concatenate %303, %304 in 1 : vector<32x16xf32>, vector<32x240xf32> -> vector<32x256xf32>
    %306 = vector.extract_strided_slice %294 {offsets = [1, 0], sizes = [1, 256], strides = [1, 1]} : vector<9x256xf32> to vector<1x256xf32>
    %307 = vector.broadcast %306 : vector<1x256xf32> to vector<32x256xf32>
    %308 = arith.mulf %305, %307 : vector<32x256xf32>
    %309 = arith.truncf %308 : vector<32x256xf32> to vector<32x256xbf16>
    %c32_72 = arith.constant 32 : index
    %c0_73 = arith.constant 0 : index
    %310 = vector.load %arg12[%c32_72, %c0_73] : memref<288x256xbf16, #tpu.memory_space<vmem>>, vector<32x256xbf16>
    tpu.vector_store %arg12[%c32_72, %c0_73], %309 {strides = array<i32>} : memref<288x256xbf16, #tpu.memory_space<vmem>>, vector<32x256xbf16>,
    %311 = vector.extract_strided_slice %290 {offsets = [0, 241], sizes = [32, 15], strides = [1, 1]} : vector<32x256xf32> to vector<32x15xf32>
    %312 = vector.extract_strided_slice %290 {offsets = [0, 0], sizes = [32, 241], strides = [1, 1]} : vector<32x256xf32> to vector<32x241xf32>
    %313 = tpu.concatenate %311, %312 in 1 : vector<32x15xf32>, vector<32x241xf32> -> vector<32x256xf32>
    %314 = vector.extract_strided_slice %294 {offsets = [2, 0], sizes = [1, 256], strides = [1, 1]} : vector<9x256xf32> to vector<1x256xf32>
    %315 = vector.broadcast %314 : vector<1x256xf32> to vector<32x256xf32>
    %316 = arith.mulf %313, %315 : vector<32x256xf32>
    %317 = arith.truncf %316 : vector<32x256xf32> to vector<32x256xbf16>
    %c64_74 = arith.constant 64 : index
    %c0_75 = arith.constant 0 : index
    %318 = vector.load %arg12[%c64_74, %c0_75] : memref<288x256xbf16, #tpu.memory_space<vmem>>, vector<32x256xbf16>
    tpu.vector_store %arg12[%c64_74, %c0_75], %317 {strides = array<i32>} : memref<288x256xbf16, #tpu.memory_space<vmem>>, vector<32x256xbf16>,
    %319 = vector.extract_strided_slice %290 {offsets = [0, 255], sizes = [32, 1], strides = [1, 1]} : vector<32x256xf32> to vector<32x1xf32>
    %320 = vector.extract_strided_slice %290 {offsets = [0, 0], sizes = [32, 255], strides = [1, 1]} : vector<32x256xf32> to vector<32x255xf32>
    %321 = tpu.concatenate %319, %320 in 1 : vector<32x1xf32>, vector<32x255xf32> -> vector<32x256xf32>
    %322 = vector.extract_strided_slice %294 {offsets = [3, 0], sizes = [1, 256], strides = [1, 1]} : vector<9x256xf32> to vector<1x256xf32>
    %323 = vector.broadcast %322 : vector<1x256xf32> to vector<32x256xf32>
    %324 = arith.mulf %321, %323 : vector<32x256xf32>
    %325 = arith.truncf %324 : vector<32x256xf32> to vector<32x256xbf16>
    %c96_76 = arith.constant 96 : index
    %c0_77 = arith.constant 0 : index
    %326 = vector.load %arg12[%c96_76, %c0_77] : memref<288x256xbf16, #tpu.memory_space<vmem>>, vector<32x256xbf16>
    tpu.vector_store %arg12[%c96_76, %c0_77], %325 {strides = array<i32>} : memref<288x256xbf16, #tpu.memory_space<vmem>>, vector<32x256xbf16>,
    %327 = arith.truncf %290 : vector<32x256xf32> to vector<32x256xbf16>
    %c128_78 = arith.constant 128 : index
    %c0_79 = arith.constant 0 : index
    %328 = vector.load %arg12[%c128_78, %c0_79] : memref<288x256xbf16, #tpu.memory_space<vmem>>, vector<32x256xbf16>
    tpu.vector_store %arg12[%c128_78, %c0_79], %327 {strides = array<i32>} : memref<288x256xbf16, #tpu.memory_space<vmem>>, vector<32x256xbf16>,
    %329 = vector.extract_strided_slice %290 {offsets = [0, 1], sizes = [32, 255], strides = [1, 1]} : vector<32x256xf32> to vector<32x255xf32>
    %330 = vector.extract_strided_slice %290 {offsets = [0, 0], sizes = [32, 1], strides = [1, 1]} : vector<32x256xf32> to vector<32x1xf32>
    %331 = tpu.concatenate %329, %330 in 1 : vector<32x255xf32>, vector<32x1xf32> -> vector<32x256xf32>
    %332 = vector.extract_strided_slice %294 {offsets = [5, 0], sizes = [1, 256], strides = [1, 1]} : vector<9x256xf32> to vector<1x256xf32>
    %333 = vector.broadcast %332 : vector<1x256xf32> to vector<32x256xf32>
    %334 = arith.mulf %331, %333 : vector<32x256xf32>
    %335 = arith.truncf %334 : vector<32x256xf32> to vector<32x256xbf16>
    %c160_80 = arith.constant 160 : index
    %c0_81 = arith.constant 0 : index
    %336 = vector.load %arg12[%c160_80, %c0_81] : memref<288x256xbf16, #tpu.memory_space<vmem>>, vector<32x256xbf16>
    tpu.vector_store %arg12[%c160_80, %c0_81], %335 {strides = array<i32>} : memref<288x256xbf16, #tpu.memory_space<vmem>>, vector<32x256xbf16>,
    %337 = vector.extract_strided_slice %290 {offsets = [0, 15], sizes = [32, 241], strides = [1, 1]} : vector<32x256xf32> to vector<32x241xf32>
    %338 = vector.extract_strided_slice %290 {offsets = [0, 0], sizes = [32, 15], strides = [1, 1]} : vector<32x256xf32> to vector<32x15xf32>
    %339 = tpu.concatenate %337, %338 in 1 : vector<32x241xf32>, vector<32x15xf32> -> vector<32x256xf32>
    %340 = vector.extract_strided_slice %294 {offsets = [6, 0], sizes = [1, 256], strides = [1, 1]} : vector<9x256xf32> to vector<1x256xf32>
    %341 = vector.broadcast %340 : vector<1x256xf32> to vector<32x256xf32>
    %342 = arith.mulf %339, %341 : vector<32x256xf32>
    %343 = arith.truncf %342 : vector<32x256xf32> to vector<32x256xbf16>
    %c192_82 = arith.constant 192 : index
    %c0_83 = arith.constant 0 : index
    %344 = vector.load %arg12[%c192_82, %c0_83] : memref<288x256xbf16, #tpu.memory_space<vmem>>, vector<32x256xbf16>
    tpu.vector_store %arg12[%c192_82, %c0_83], %343 {strides = array<i32>} : memref<288x256xbf16, #tpu.memory_space<vmem>>, vector<32x256xbf16>,
    %345 = vector.extract_strided_slice %290 {offsets = [0, 16], sizes = [32, 240], strides = [1, 1]} : vector<32x256xf32> to vector<32x240xf32>
    %346 = vector.extract_strided_slice %290 {offsets = [0, 0], sizes = [32, 16], strides = [1, 1]} : vector<32x256xf32> to vector<32x16xf32>
    %347 = tpu.concatenate %345, %346 in 1 : vector<32x240xf32>, vector<32x16xf32> -> vector<32x256xf32>
    %348 = vector.extract_strided_slice %294 {offsets = [7, 0], sizes = [1, 256], strides = [1, 1]} : vector<9x256xf32> to vector<1x256xf32>
    %349 = vector.broadcast %348 : vector<1x256xf32> to vector<32x256xf32>
    %350 = arith.mulf %347, %349 : vector<32x256xf32>
    %351 = arith.truncf %350 : vector<32x256xf32> to vector<32x256xbf16>
    %c224_84 = arith.constant 224 : index
    %c0_85 = arith.constant 0 : index
    %352 = vector.load %arg12[%c224_84, %c0_85] : memref<288x256xbf16, #tpu.memory_space<vmem>>, vector<32x256xbf16>
    tpu.vector_store %arg12[%c224_84, %c0_85], %351 {strides = array<i32>} : memref<288x256xbf16, #tpu.memory_space<vmem>>, vector<32x256xbf16>,
    %353 = vector.extract_strided_slice %290 {offsets = [0, 17], sizes = [32, 239], strides = [1, 1]} : vector<32x256xf32> to vector<32x239xf32>
    %354 = vector.extract_strided_slice %290 {offsets = [0, 0], sizes = [32, 17], strides = [1, 1]} : vector<32x256xf32> to vector<32x17xf32>
    %355 = tpu.concatenate %353, %354 in 1 : vector<32x239xf32>, vector<32x17xf32> -> vector<32x256xf32>
    %356 = vector.extract_strided_slice %294 {offsets = [8, 0], sizes = [1, 256], strides = [1, 1]} : vector<9x256xf32> to vector<1x256xf32>
    %357 = vector.broadcast %356 : vector<1x256xf32> to vector<32x256xf32>
    %358 = arith.mulf %355, %357 : vector<32x256xf32>
    %359 = arith.truncf %358 : vector<32x256xf32> to vector<32x256xbf16>
    %c256_86 = arith.constant 256 : index
    %c0_87 = arith.constant 0 : index
    %360 = vector.load %arg12[%c256_86, %c0_87] : memref<288x256xbf16, #tpu.memory_space<vmem>>, vector<32x256xbf16>
    tpu.vector_store %arg12[%c256_86, %c0_87], %359 {strides = array<i32>} : memref<288x256xbf16, #tpu.memory_space<vmem>>, vector<32x256xbf16>,
    %c0_88 = arith.constant 0 : index
    %c0_89 = arith.constant 0 : index
    %361 = vector.load %arg8[%c0_88, %c0_89] : memref<32x288xbf16, #tpu.memory_space<vmem>>, vector<32x288xbf16>
    %c0_90 = arith.constant 0 : index
    %c0_91 = arith.constant 0 : index
    %362 = vector.load %arg12[%c0_90, %c0_91] : memref<288x256xbf16, #tpu.memory_space<vmem>>, vector<288x256xbf16>
    %cst_92 = arith.constant dense<0.000000e+00> : vector<32x256xf32>
    %363 = tpu.matmul %361, %362, %cst_92 {dimension_numbers = #tpu.dot_dimension_numbers<[1], [0], [0], [1], [0, 0, 1, 1], [], []>} : vector<32x288xbf16>, vector<288x256xbf16>, vector<32x256xf32> -> vector<32x256xf32>
    %c0_93 = arith.constant 0 : index
    %c0_94 = arith.constant 0 : index
    %364 = vector.load %arg9[%c0_93, %c0_94] : memref<32x1xf32, #tpu.memory_space<vmem>>, vector<32x1xf32>
    %365 = vector.broadcast %364 : vector<32x1xf32> to vector<32x256xf32>
    %366 = arith.addf %363, %365 : vector<32x256xf32>
    %cst_95 = arith.constant 0.000000e+00 : f32
    %367 = vector.broadcast %cst_95 : f32 to vector<32x256xf32>
    %368 = arith.cmpf ogt, %366, %367 : vector<32x256xf32>
    %369 = math.exp %366 : vector<32x256xf32>
    %cst_96 = arith.constant 1.000000e+00 : f32
    %370 = vector.broadcast %cst_96 : f32 to vector<32x256xf32>
    %371 = arith.subf %369, %370 : vector<32x256xf32>
    %372 = arith.select %368, %366, %371 : vector<32x256xi1>, vector<32x256xf32>
    %c0_97 = arith.constant 0 : index
    %c64_98 = arith.constant 64 : index
    %c0_99 = arith.constant 0 : index
    %373 = vector.load %arg11[%c0_97, %c64_98, %c0_99] : memref<1x96x256xf32, #tpu.memory_space<vmem>>, vector<1x32x256xf32>
    %374 = vector.shape_cast %373 : vector<1x32x256xf32> to vector<32x256xf32>
    %375 = vector.shape_cast %372 : vector<32x256xf32> to vector<1x32x256xf32>
    tpu.vector_store %arg11[%c0_97, %c64_98, %c0_99], %375 {strides = array<i32>} : memref<1x96x256xf32, #tpu.memory_space<vmem>>, vector<1x32x256xf32>,
    return
  }
  func.func @transform_0(%arg0: i32) -> (i32, i32, i32) {
    %c0_i32 = arith.constant 0 : i32
    %c0_i32_0 = arith.constant 0 : i32
    %c0_i32_1 = arith.constant 0 : i32
    return %arg0, %c0_i32, %c0_i32_0 : i32, i32, i32
  }
  func.func @transform_1(%arg0: i32) -> (i32, i32) {
    %c0_i32 = arith.constant 0 : i32
    %c0_i32_0 = arith.constant 0 : i32
    %c0_i32_1 = arith.constant 0 : i32
    return %c0_i32, %c0_i32_0 : i32, i32
  }
  func.func @transform_2(%arg0: i32) -> (i32, i32) {
    %c0_i32 = arith.constant 0 : i32
    %c0_i32_0 = arith.constant 0 : i32
    %c0_i32_1 = arith.constant 0 : i32
    return %c0_i32, %c0_i32_0 : i32, i32
  }
  func.func @transform_3(%arg0: i32) -> (i32, i32) {
    %c0_i32 = arith.constant 0 : i32
    %c0_i32_0 = arith.constant 0 : i32
    %c0_i32_1 = arith.constant 0 : i32
    return %c0_i32, %c0_i32_0 : i32, i32
  }
  func.func @transform_4(%arg0: i32) -> (i32, i32) {
    %c0_i32 = arith.constant 0 : i32
    %c0_i32_0 = arith.constant 0 : i32
    %c0_i32_1 = arith.constant 0 : i32
    return %c0_i32, %c0_i32_0 : i32, i32
  }
  func.func @transform_5(%arg0: i32) -> (i32, i32) {
    %c0_i32 = arith.constant 0 : i32
    %c0_i32_0 = arith.constant 0 : i32
    %c0_i32_1 = arith.constant 0 : i32
    return %c0_i32, %c0_i32_0 : i32, i32
  }
  func.func @transform_6(%arg0: i32) -> (i32, i32) {
    %c0_i32 = arith.constant 0 : i32
    %c0_i32_0 = arith.constant 0 : i32
    %c0_i32_1 = arith.constant 0 : i32
    return %c0_i32, %c0_i32_0 : i32, i32
  }
  func.func @transform_7(%arg0: i32) -> (i32, i32) {
    %c0_i32 = arith.constant 0 : i32
    %c0_i32_0 = arith.constant 0 : i32
    %c0_i32_1 = arith.constant 0 : i32
    return %c0_i32, %c0_i32_0 : i32, i32
  }
  func.func @transform_8(%arg0: i32) -> (i32, i32) {
    %c0_i32 = arith.constant 0 : i32
    %c0_i32_0 = arith.constant 0 : i32
    %c0_i32_1 = arith.constant 0 : i32
    return %c0_i32, %c0_i32_0 : i32, i32
  }
  func.func @transform_9(%arg0: i32) -> (i32, i32) {
    %c0_i32 = arith.constant 0 : i32
    %c0_i32_0 = arith.constant 0 : i32
    %c0_i32_1 = arith.constant 0 : i32
    return %c0_i32, %c0_i32_0 : i32, i32
  }
  func.func @transform_10(%arg0: i32) -> (i32, i32, i32) {
    %c0_i32 = arith.constant 0 : i32
    %c0_i32_0 = arith.constant 0 : i32
    %c0_i32_1 = arith.constant 0 : i32
    return %arg0, %c0_i32, %c0_i32_0 : i32, i32, i32
  }
}

</mosaic_0001>

<bundles_post_ra>
// kernel: tpu_custom_call.1
= control target key start
LH: loop header
LB: loop body
LE: loop exit
PB: predicated region body
PF: predicated region fallthrough
CT: control target
= control target key end

     0   :  { %s4987_s0 = inlined_call_operand.hbm [shape: f32[2,4,256], index: 0, kind: input, shape index: {}]   ;;  %s4988_s1 = inlined_call_operand.hbm [shape: bf16[32,100], index: 1, kind: input, shape index: {}]   ;;  %s4989_s2 = inlined_call_operand.vmem [shape: f32[32,1], index: 2, kind: input, shape index: {}]   ;;  %s4990_s3 = inlined_call_operand.vmem [shape: f32[25,256], index: 3, kind: input, shape index: {}]   ;;  %s4991_s4 = inlined_call_operand.vmem [shape: bf16[32,288], index: 4, kind: input, shape index: {}]   ;;  %s4992_s5 = inlined_call_operand.vmem [shape: f32[32,1], index: 5, kind: input, shape index: {}]   ;;  %s4993_s6 = inlined_call_operand.hbm [shape: f32[9,256], index: 6, kind: input, shape index: {}]   ;;  %s4994_s7 = inlined_call_operand.hbm [shape: bf16[32,288], index: 7, kind: input, shape index: {}]   ;;  %s4995_s8 = inlined_call_operand.vmem [shape: f32[32,1], index: 8, kind: input, shape index: {}]   ;;  %s4996_s9 = inlined_call_operand.hbm [shape: f32[9,256], index: 9, kind: input, shape index: {}]   ;;  %s4997_s10 = inlined_call_operand.hbm [shape: f32[2,96,256], index: 10, kind: output, shape index: {}]  }
   0x1   :  { %5017 = sst [smem:[#allocation17_spill]] %s4988_s1 }
   0x2   :  { %5018 = sst [smem:[#allocation18_spill]] %s4995_s8 }
   0x3   :  { %5019 = sst [smem:[#allocation19_spill]] %s4997_s10 }
   0x4   :  { %15 = vsyncpa [#allocation4], 0 }
   0x5   :  { %17 = vsyncpa [#allocation4 + $0x1], 0 }
   0x6   :  { %18 = vsyncpa [#allocation7], 0 }
   0x7   :  { %19 = vsyncpa [#allocation10], 0 }
   0x8   :  { %20 = vsyncpa [#allocation5], 0 }
   0x9   :  { %22 = vsyncpa [#allocation5 + $0x1], 0  ;;  %s3547_s13 = smov 0   ;;  %s3549_s14 = smov 0  }
   0xa   :  { %s3551_s15 = smov 0   ;;  %s3553_s16 = smov 0  }
   0xb LB: > { %s3454_s17 = smov [#allocation6]   ;;  %s3568_s19 = sadd.s32 4294967295, %s3452_s16   ;;  %s3452_s16 = sphi %s3553_s16, %s5050_s16   ;;  %s3448_s15 = sphi %s3551_s15, %s5049_s15   ;;  %s3444_s14 = sphi %s3549_s14, %s5048_s14   ;;  %s3440_s13 = sphi %s3547_s13, %s5047_s13  }
   0xc   : > { %s286_s18 = sshll.u32 %s3454_s17, 4  ;;  %p2944_p0 = scmp.ge.s32.totalorder %s3452_s16, 1  ;;  %s3573_s18 = int_to_ptr.vmem [resolvable:$true] %s286_s18 }
   0xd   : > { %p5000_p1 = scmp.eq.s32.totalorder %s3568_s19, 0  ;;  %p274_p2 = scmp.lt.s32.totalorder %s3452_s16, 3 }
   0xe   : > { %s3455_s21 = smov [#allocation9]   ;;  %s3456_s24 = smov [#allocation8]  }
   0xf   : > { %p3575_p3 = pnand %p2944_p0, %p274_p2  ;;  %s324_s22 = sshll.u32 %s3455_s21, 4  ;;  %s3588_s22 = int_to_ptr.vmem [resolvable:$true] %s324_s22 }
  0x10   : > { %s3590_s25 = sshll.u32 %s3456_s24, 4  ;;  %s5022_s1 = sld [smem:[#allocation17_spill]]  ;;  %s312_s25 = int_to_ptr.vmem [resolvable:$true] %s3590_s25 }
  0x11   : > { %s5020_s20 = scalar_select %p3575_p3, 1, 0 }
  0x12   : > { %p3068_p5 = pneg %p3575_p3 }
  0x14   : > { %p3584_p6 = pnand %p3068_p5, %p5000_p1 }
  0x16   : > { %s3236_s28 = scalar_lea.hbm %s5022_s1, 256  ;;  %p3600_p8 = pneg %p3584_p6 }
  0x17   : > { %p3237_p7 = scmp.ne.s32.totalorder %s5022_s1, %s3236_s28  ;;  %p3243_p11 = scmp.lt.u32.totalorder %s3236_s28, %s5022_s1 }
  0x19   : > { %p3239_p9 = pnand %p3600_p8, %p3237_p7 }
  0x1b   : > { %p3240_p10 = pneg %p3239_p9 }
  0x1d   : > { %p3245_p12 = pnand %p3243_p11, %p3240_p10 }
  0x1f   : > { %3248 = shalt.err (!%p3245_p12)
}
  0x20   : > { %s3249_s21 = scalar_lea.vmem %s3573_s18, 256  ;;  %p3257_p5 = scmp.lt.s32.totalorder %s3573_s18, %s3573_s18 }
  0x21   : > { %p3250_p13 = scmp.ne.s32.totalorder %s3573_s18, %s3249_s21  ;;  %p3258_p4 = scmp.lt.s32.totalorder %s3249_s21, %s3249_s21 }
  0x23   : > { %p3252_p0 = pnand %p3250_p13, %p3600_p8  ;;  %p3259_p7 = por %p3258_p4, %p3257_p5 }
  0x25   : > { %p3253_p2 = pneg %p3252_p0 }
  0x27   : > { %p3260_p9 = pnand %p3259_p7, %p3253_p2 }
  0x29   : > { %3263 = shalt.err (!%p3260_p9)
}
  0x2a   : > { %s3457_s24 = smov 64   ;;  %s3458_s26 = smov 4  }
  0x2b   : > { %3071 = dma.hbm_to_vmem [thread:$0]  (!%p3584_p6), %s5022_s1, 256, %s3573_s18, [#allocation7], %s3457_s24, %s3457_s24, %s3458_s26  }
  0x2c   : > { %s3264_s12 = scalar_lea.hbm %s4994_s7, 768 }
  0x2d   : > { %p3265_p4 = scmp.ne.s32.totalorder %s4994_s7, %s3264_s12  ;;  %p3271_p12 = scmp.lt.u32.totalorder %s3264_s12, %s4994_s7 }
  0x2f   : > { %p3267_p10 = pnand %p3265_p4, %p3600_p8 }
  0x31   : > { %p3268_p11 = pneg %p3267_p10 }
  0x33   : > { %p3273_p13 = pnand %p3271_p12, %p3268_p11 }
  0x35   : > { %3276 = shalt.err (!%p3273_p13)
}
  0x36   : > { %s3277_s18 = scalar_lea.vmem %s3588_s22, 768  ;;  %p3285_p7 = scmp.lt.s32.totalorder %s3588_s22, %s3588_s22 }
  0x37   : > { %p3278_p0 = scmp.ne.s32.totalorder %s3588_s22, %s3277_s18  ;;  %p3286_p9 = scmp.lt.s32.totalorder %s3277_s18, %s3277_s18 }
  0x39   : > { %p3280_p2 = pnand %p3278_p0, %p3600_p8  ;;  %p3287_p4 = por %p3286_p9, %p3285_p7 }
  0x3b   : > { %p3281_p5 = pneg %p3280_p2 }
  0x3d   : > { %p3288_p10 = pnand %p3287_p4, %p3281_p5 }
  0x3f   : > { %3291 = shalt.err (!%p3288_p10)
}
  0x40   : > { %s3459_s10 = smov 192   ;;  %s3460_s8 = smov 12  }
  0x41   : > { %3077 = dma.hbm_to_vmem [thread:$0]  (!%p3584_p6), %s4994_s7, 768, %s3588_s22, [#allocation10], %s3459_s10, %s3459_s10, %s3460_s8  }
  0x42   : > { %s3292_s29 = scalar_lea.hbm %s4993_s6, 512 }
  0x43   : > { %p3293_p11 = scmp.ne.s32.totalorder %s4993_s6, %s3292_s29  ;;  %p3299_p0 = scmp.lt.u32.totalorder %s3292_s29, %s4993_s6 }
  0x45   : > { %p3295_p12 = pnand %p3293_p11, %p3600_p8 }
  0x47   : > { %p3296_p13 = pneg %p3295_p12 }
  0x49   : > { %p3301_p2 = pnand %p3299_p0, %p3296_p13 }
  0x4b   : > { %3304 = shalt.err (!%p3301_p2)
}
  0x4c   : > { %s3305_s18 = scalar_lea.vmem %s312_s25, 512  ;;  %p3313_p4 = scmp.lt.s32.totalorder %s312_s25, %s312_s25 }
  0x4d   : > { %p3306_p5 = scmp.ne.s32.totalorder %s312_s25, %s3305_s18  ;;  %p3314_p10 = scmp.lt.s32.totalorder %s3305_s18, %s3305_s18 }
  0x4f   : > { %p3308_p7 = pnand %p3306_p5, %p3600_p8  ;;  %p3315_p1 = por %p3314_p10, %p3313_p4 }
  0x51   : > { %p3309_p9 = pneg %p3308_p7 }
  0x53   : > { %p3316_p3 = pnand %p3315_p1, %p3309_p9 }
  0x55   : > { %3319 = shalt.err (!%p3316_p3)
}
  0x56   : > { %s3461_s22 = smov 256   ;;  %s3462_s10 = smov 16  }
  0x57   : > { %3074 = dma.hbm_to_vmem [thread:$0]  (!%p3584_p6), %s4993_s6, 512, %s312_s25, [#allocation7], %s3461_s22, %s3461_s22, %s3462_s10  }
  0x58   : > { %s3463_s26 = smov [#allocation11]   ;;  %s3320_s30 = scalar_lea.hbm %s4996_s9, 512 }
  0x59   : > { %s340_s27 = sshll.u32 %s3463_s26, 4  ;;  %p3321_p1 = scmp.ne.s32.totalorder %s4996_s9, %s3320_s30  ;;  %s341_s27 = int_to_ptr.vmem [resolvable:$true] %s340_s27 }
  0x5a   : > { %p3327_p12 = scmp.lt.u32.totalorder %s3320_s30, %s4996_s9 }
  0x5b   : > { %p3323_p3 = pnand %p3321_p1, %p3600_p8 }
  0x5d   : > { %p3324_p11 = pneg %p3323_p3 }
  0x5f   : > { %p3329_p13 = pnand %p3327_p12, %p3324_p11 }
  0x61   : > { %3332 = shalt.err (!%p3329_p13)
}
  0x62   : > { %s3333_s25 = scalar_lea.vmem %s341_s27, 512  ;;  %p3341_p7 = scmp.lt.s32.totalorder %s341_s27, %s341_s27 }
  0x63   : > { %p3334_p0 = scmp.ne.s32.totalorder %s341_s27, %s3333_s25  ;;  %p3342_p9 = scmp.lt.s32.totalorder %s3333_s25, %s3333_s25 }
  0x65   : > { %p3336_p2 = pnand %p3334_p0, %p3600_p8  ;;  %p3343_p4 = por %p3342_p9, %p3341_p7 }
  0x67   : > { %p3337_p5 = pneg %p3336_p2 }
  0x69   : > { %p3344_p10 = pnand %p3343_p4, %p3337_p5 }
  0x6b   : > { %3347 = shalt.err (!%p3344_p10)
}
  0x6c   : > { %3080 = dma.hbm_to_vmem [thread:$0]  (!%p3584_p6), %s4996_s9, 512, %s341_s27, [#allocation10], %s3461_s22, %s3461_s22, %s3462_s10  }
  0x6d   : > { %s2943_s11 = sadd.s32 4294967294, %s3452_s16   ;;  %s3683_s23 = sadd.s32 1, %s3452_s16  }
  0x6e   : > { %s32_s26 = ssub.s32 %s3452_s16, %s3683_s23  ;;  %s35_s28 = sadd.s32 1, %s3448_s15 }
  0x6f   : > { %p33_p8 = scmp.eq.s32.totalorder %s32_s26, 0  ;;  %p42_p1 = scmp.ne.s32.totalorder %s3448_s15, %s3444_s14 }
  0x70   : > { %p43_p3 = scmp.eq.s32.totalorder %s3452_s16, 0  ;;  %p48_p11 = scmp.ne.s32.totalorder %s3444_s14, %s3440_s13 }
  0x71   : > { %s3694_s29 = scalar_select %p33_p8, %s3448_s15, %s35_s28  }
  0x72   : > { %p3696_p12 = por %p43_p3, %p42_p1  ;;  %p5025_p13 = scmp.eq.s32.totalorder %s3568_s19, 0 }
  0x73   : > { %p261_p0 = scmp.eq.s32.totalorder %s3568_s19, 1  ;;  %p267_p2 = scmp.eq.s32.totalorder %s2943_s11, 1 }
  0x74   : > { %p3702_p6 = por %p5025_p13, %p48_p11  ;;  %p3093_p5 = scmp.lt.s32.totalorder %s3452_s16, 2 }
  0x75   : > { %s354_s10 = sand.u32 1, %s3448_s15   ;;  %p3709_p7 = por %p261_p0, %p42_p1 }
  0x76   : > { %p3713_p9 = por %p267_p2, %p48_p11  ;;  %s2950_s17 = sshll.u32 %s354_s10, 3 }
  0x77   : > { %s5027_s27 = scalar_select %p3709_p7, 1, 0 }
  0x78   : > { %s5028_s12 = scalar_select %p3713_p9, 1, 0 }
  0x79   : > { %s3013_s21 = sshll.u32 %s3452_s16, 7  ;;  %s358_s24 = scalar_lea.vmem [#allocation3], %s2950_s17 }
  0x7a   : > { %s3721_s8 = scalar_lea.hbm %s4987_s0, %s3013_s21  ;;  %s366_s11 = sshll.u32 %s358_s24, 4  ;;  %s3723_s11 = int_to_ptr.vmem [resolvable:$true] %s366_s11 }
  0x7b   : > { %p3727_p4 = pnand %p3093_p5, %p3696_p12  ;;  %s355_s28 = scalar_lea.sflag [#allocation4], %s354_s10 }
  0x7c   : > { %s3348_s1 = scalar_lea.hbm %s3721_s8, 128  ;;  %s3353_s18 = scalar_lea.hbm %s4987_s0, 256 }
  0x7d   : > { %p3349_p10 = scmp.ne.s32.totalorder %s3721_s8, %s3348_s1  ;;  %p3350_p8 = pneg %p3727_p4 }
  0x7e   : > { %p3354_p11 = scmp.lt.u32.totalorder %s3721_s8, %s4987_s0  ;;  %p3355_p12 = scmp.lt.u32.totalorder %s3353_s18, %s3348_s1 }
  0x7f   : > { %p3351_p1 = pnand %p3350_p8, %p3349_p10  ;;  %p3357_p0 = scmp.lt.u32.totalorder %s3348_s1, %s3721_s8 }
  0x80   : > { %p3356_p13 = por %p3355_p12, %p3354_p11 }
  0x81   : > { %p3352_p3 = pneg %p3351_p1 }
  0x82   : > { %p3358_p2 = por %p3357_p0, %p3356_p13 }
  0x84   : > { %p3359_p5 = pnand %p3358_p2, %p3352_p3 }
  0x86   : > { %3362 = shalt.err (!%p3359_p5)
}
  0x87   : > { %s3363_s10 = scalar_lea.vmem %s3723_s11, 128  ;;  %s3464_s24 = smov [#allocation3]  }
  0x88   : > { %p3364_p10 = scmp.ne.s32.totalorder %s3723_s11, %s3363_s10  ;;  %s3368_s17 = sshll.u32 %s3464_s24, 4  ;;  %s3369_s17 = int_to_ptr.vmem [resolvable:$false] %s3368_s17 }
  0x89   : > { %s3370_s21 = scalar_lea.vmem %s3369_s17, 256  ;;  %p3371_p7 = scmp.lt.s32.totalorder %s3723_s11, %s3369_s17 }
  0x8a   : > { %p3366_p1 = pnand %p3364_p10, %p3350_p8  ;;  %p3372_p11 = scmp.lt.s32.totalorder %s3370_s21, %s3363_s10 }
  0x8c   : > { %p3367_p9 = pneg %p3366_p1  ;;  %p3373_p12 = por %p3372_p11, %p3371_p7 }
  0x8e   : > { %p3374_p13 = pnand %p3373_p12, %p3367_p9 }
  0x90   : > { %3377 = shalt.err (!%p3374_p13)
}
  0x91   : > { %3084 = dma.hbm_to_vmem [thread:$0]  (!%p3727_p4), %s3721_s8, 128, %s3723_s11, %s355_s28  }
  0x92   : > { %p5030_p3 = scmp.ne.s32.totalorder %s5020_s20, 0 }
  0x93   : > { %s3759_s1 = sand.u32 (!%p5030_p3), 1, %s3444_s14  }
  0x94   : > { %375 = sbr.rel (%p5030_p3) target bundleno = 1601 (0x641), region = 60  ;;  %s2954_s18 = sshll.u32 (!%p5030_p3), %s3759_s1, 3 }
  0x95   : > { %s378_s30 = scalar_lea.sflag (!%p5030_p3), [#allocation4], %s3759_s1  ;;  %s381_s25 = scalar_lea.vmem (!%p5030_p3), [#allocation3], %s2954_s18 }
  0x9b   : > { %3423 = dma.done.wait (%p3702_p6), %s378_s30, 128  }
  0x9c   : > { %3425 = vsyncadd (%p3702_p6), %s378_s30, 4294967168  ;;  %p5031_p7 = scmp.eq.s32.totalorder %s3568_s19, 0 }
  0x9e   : > { %3427 = dma.done.wait (%p5031_p7), [#allocation7], 768   ;;  %p5032_p9 = pmov %p5031_p7 }
  0x9f   : > { %p5033_p4 = pmov %p5031_p7 }
  0xa0   : > { %3429 = vsyncadd (%p5032_p9), [#allocation7], 4294966528 }
  0xa1   : > { %3431 = dma.done.wait (%p5033_p4), [#allocation10], 1280   ;;  %p5034_p8 = pmov %p5033_p4 }
  0xa2   : > { %v3775_v0 = vld [vmem:[%s381_s25] sm:$0xff]  ;;  %s3465_s20 = smov 32   ;;  %s3466_s8 = smov 33   ;;  %v3489_v4 = vmov 0   ;;  %v456_v5 = vlaneseq  ;;  %v1156_v8 = vld [vmem:[%s4989_s2 + $0x18] sm:$0xff]  ;;  %v1155_v9 = vld [vmem:[%s4989_s2 + $0x10] sm:$0xff] }
  0xa3   : > { %3433 = vsyncadd (%p5034_p8), [#allocation10], 4294966016  ;;  %503 = vrot.lane.b32.xlu1 %v3775_v0, %s3465_s20  ;;  %473 = vrot.lane.b32.xlu0 %v3775_v0, %s3466_s8  ;;  %v3781_v1 = vcombine.high %v3775_v0, %v3775_v0  ;;  %s3467_s22 = smov 31   ;;  %s3468_s11 = smov 34   ;;  %v789_v3 = vpack.c.bf16 %v3775_v0, %v3775_v0  ;;  %v1153_v6 = vld [vmem:[%s4989_s2] sm:$0xff]  ;;  %v1154_v7 = vld [vmem:[%s4989_s2 + $0x8] sm:$0xff] }
  0xa4   : > { %s3469_s26 = smov 18   ;;  %s3470_s28 = smov 17   ;;  %1233 = vmatprep.mubr.bf16.mxu0 %v3489_v4  ;;  %3167 = vset.pattern.permute.xlu0 %v3489_v4  ;;  %v3864_v10 = vshrl.u32 %v456_v5, 7  ;;  %v3872_v12 = vld [vmem:[%s4990_s3] sm:$0xff]  ;;  %v3877_v13 = vld [vmem:[%s4990_s3 + $0x8] sm:$0xff]  ;;  %vm475_vm0 = vcmask 269312  }
  0xa5   : > { %s5013_s10 = smov 16   ;;  %s3472_s24 = smov 30   ;;  %v790_v2 = vpack.c.bf16 %v3781_v1, %v3781_v1  ;;  %791 = vst [vmem:[#allocation2 + $0x30] sm:$0x3] %v789_v3  ;;  %3168 = vset.pattern.permute.xlu1 %v3489_v4  ;;  %vm505_vm1 = vcmask 261120   ;;  %vm535_vm2 = vcmask 252928  }
  0xa6   : > { %s3473_s17 = smov 14   ;;  %s3474_s21 = smov 2   ;;  %v3867_v11 = vsub.s32 1, %v3864_v10  ;;  %v3884_v18 = vsub.s32 2, %v3864_v10  ;;  %v3887_v19 = vsub.s32 3, %v3864_v10  ;;  %v3890_v22 = vsub.s32 0, %v3864_v10 }
  0xa7   : > { %533 = vrot.lane.b32.xlu1 %v3775_v0, %s3467_s22  ;;  %470 = vrot.lane.b32.xlu0 %v3781_v1, %s3466_s8  ;;  %s5009_s18 = smov 1   ;;  %s5011_s30 = smov 15   ;;  %792 = vst [vmem:[#allocation2 + $0x38] sm:$0x3] %v790_v2  ;;  %vm451_vm3 = vcmask 277504   ;;  %v3901_v31 = vsub.s32 5, %v3864_v10 }
  0xa8   : > { %s5015_s25 = smov 127   ;;  %s3479_s8 = smov 114   ;;  %v483_v16 = vrot.slane %v3872_v12, %v3867_v11  ;;  %v487_v17 = vrot.slane %v3877_v13, %v3867_v11  ;;  %v513_v27 = vrot.slane %v3872_v12, %v3884_v18  ;;  %v517_v28 = vrot.slane %v3877_v13, %v3884_v18 }
  0xa9   : > { %v543_v29 = vrot.slane %v3872_v12, %v3887_v19  ;;  %v547_v30 = vrot.slane %v3877_v13, %v3887_v19  ;;  %v459_v36 = vrot.slane %v3872_v12, %v3890_v22  ;;  %v463_v37 = vrot.slane %v3877_v13, %v3890_v22  ;;  %p5044_p0 = scmp.ne.s32.totalorder %s5027_s27, 0 }
  0xaa   : > { %vm589_vm4 = vcmask 146432   ;;  %v597_v48 = vrot.slane %v3872_v12, %v3901_v31  ;;  %v601_v53 = vrot.slane %v3877_v13, %v3901_v31  ;;  %v3916_v54 = vsub.s32 6, %v3864_v10 }
  0xab   : > { %500 = vrot.lane.b32.xlu1 %v3781_v1, %s3465_s20  ;;  %530 = vrot.lane.b32.xlu0 %v3781_v1, %s3467_s22  ;;  %s3478_s20 = smov 126   ;;  %s5005_s22 = smov 112   ;;  %vm619_vm5 = vcmask 138240   ;;  %vm649_vm6 = vcmask 130048   ;;  %vm565_vm7 = vcmask 244736   ;;  %vm703_vm8 = vcmask 113664  }
  0xac   : > { %vm733_vm9 = vcmask 15360   ;;  %vm763_vm10 = vcmask 7168   ;;  %vm679_vm11 = vcmask 121856   ;;  %vm797_vm12 = vcmask 1039360  }
  0xad   : > { %vm827_vm13 = vcmask 1031168   ;;  %vm857_vm14 = vcmask 932864   ;;  %vm911_vm15 = vcmask 916480  }
  0xaf   : > { %449 = vrot.lane.b32.xlu1 %v3775_v0, %s3468_s11  ;;  %446 = vrot.lane.b32.xlu0 %v3781_v1, %s3468_s11  ;;  %s5003_s11 = smov 111  }
  0xb3   : > { %587 = vrot.lane.b32.xlu1 %v3775_v0, %s3469_s26  ;;  %584 = vrot.lane.b32.xlu0 %v3781_v1, %s3469_s26  ;;  %s3482_s26 = smov 110  }
  0xb7   : > { %617 = vrot.lane.b32.xlu1 %v3775_v0, %s3470_s28  ;;  %614 = vrot.lane.b32.xlu0 %v3781_v1, %s3470_s28 }
  0xbb   : > { %647 = vrot.lane.b32.xlu1 %v3775_v0, %s5013_s10  ;;  %644 = vrot.lane.b32.xlu0 %v3781_v1, %s5013_s10 }
  0xbf   : > { %563 = vrot.lane.b32.xlu1 %v3775_v0, %s3472_s24  ;;  %560 = vrot.lane.b32.xlu0 %v3781_v1, %s3472_s24  ;;  %s5007_s24 = smov 113  }
  0xc3   : > { %701 = vrot.lane.b32.xlu1 %v3775_v0, %s3473_s17  ;;  %698 = vrot.lane.b32.xlu0 %v3781_v1, %s3473_s17  ;;  %s3484_s17 = smov 97  }
  0xc7   : > { %731 = vrot.lane.b32.xlu1 %v3775_v0, %s3474_s21  ;;  %728 = vrot.lane.b32.xlu0 %v3781_v1, %s3474_s21  ;;  %s3485_s21 = smov 96  }
  0xcb   : > { %761 = vrot.lane.b32.xlu1 %v3775_v0, %s5009_s18  ;;  %758 = vrot.lane.b32.xlu0 %v3781_v1, %s5009_s18 }
  0xcf   : > { %677 = vrot.lane.b32.xlu1 %v3775_v0, %s5011_s30  ;;  %674 = vrot.lane.b32.xlu0 %v3781_v1, %s5011_s30 }
  0xd3   : > { %795 = vrot.lane.b32.xlu1 %v3781_v1, %s5015_s25  ;;  %793 = vrot.lane.b32.xlu0 %v3775_v0, %s5015_s25 }
  0xd7   : > { %825 = vrot.lane.b32.xlu1 %v3781_v1, %s3478_s20  ;;  %823 = vrot.lane.b32.xlu0 %v3775_v0, %s3478_s20  ;;  %s3486_s20 = smov 95  }
  0xdb   : > { %855 = vrot.lane.b32.xlu1 %v3781_v1, %s3479_s8  ;;  %853 = vrot.lane.b32.xlu0 %v3775_v0, %s3479_s8  ;;  %s3487_s8 = smov 98  }
  0xdf   : > { %909 = vrot.lane.b32.xlu1 %v3781_v1, %s5005_s22  ;;  %907 = vrot.lane.b32.xlu0 %v3775_v0, %s5005_s22  ;;  %s5042_s22 = sld [smem:[#allocation18_spill]] }
  0xe3   : > { %939 = vrot.lane.b32.xlu1 %v3781_v1, %s5003_s11  ;;  %937 = vrot.lane.b32.xlu0 %v3775_v0, %s5003_s11 }
  0xe7   : > { %969 = vrot.lane.b32.xlu1 %v3781_v1, %s3482_s26  ;;  %967 = vrot.lane.b32.xlu0 %v3775_v0, %s3482_s26  ;;  %s3488_s26 = smov 94  }
  0xeb   : > { %885 = vrot.lane.b32.xlu1 %v3781_v1, %s5007_s24  ;;  %883 = vrot.lane.b32.xlu0 %v3775_v0, %s5007_s24 }
  0xef   : > { %1023 = vrot.lane.b32.xlu1 %v3781_v1, %s3484_s17  ;;  %1021 = vrot.lane.b32.xlu0 %v3775_v0, %s3484_s17  ;;  %s3046_s17 = smul.u32 192, %s3759_s1 }
  0xf1   : > { %s4060_s11 = scalar_lea.vmem [#allocation12], %s3046_s17  ;;  %s5041_s17 = smov 1  }
  0xf3   : > { %1053 = vrot.lane.b32.xlu1 %v3781_v1, %s3485_s21  ;;  %1051 = vrot.lane.b32.xlu0 %v3775_v0, %s3485_s21  ;;  %s5035_s21 = smov 113  }
  0xf7   : > { %1083 = vrot.lane.b32.xlu1 %v3781_v1, %s3486_s20  ;;  %1081 = vrot.lane.b32.xlu0 %v3775_v0, %s3486_s20  ;;  %s5036_s20 = smov 112  }
  0xfb   : > { %999 = vrot.lane.b32.xlu1 %v3781_v1, %s3487_s8  ;;  %997 = vrot.lane.b32.xlu0 %v3775_v0, %s3487_s8  ;;  %s5037_s8 = smov 111  }
  0xff   : > { %1113 = vrot.lane.b32.xlu1 %v3781_v1, %s3488_s26  ;;  %1111 = vrot.lane.b32.xlu0 %v3775_v0, %s3488_s26  ;;  %s5040_s26 = smov 15  }
 0x103   : > { %1159 = vperm.xlu0 %3167, %v1153_v6   ;;  %1164 = vperm.xlu1 %3168, %v1154_v7   ;;  %v3921_v6 = vsub.s32 7, %v3864_v10 }
 0x107   : > { %1174 = vperm.xlu0 %3167, %v1156_v8   ;;  %1169 = vperm.xlu1 %3168, %v1155_v9  }
 0x115   : > { %v504_v14 = vpop.permute.xlu1 %503  ;;  %v474_v15 = vpop.permute.xlu0 %473 }
 0x119   : > { %v534_v20 = vpop.permute.xlu1 %533  ;;  %v471_v21 = vpop.permute.xlu0 %470 }
 0x11a   : > { %v476_v23 = vsel %vm475_vm0, %v474_v15, %v471_v21  ;;  %v479_v24 = vsel %vm475_vm0, %v471_v21, %v474_v15  ;;  %v627_v15 = vrot.slane %v3872_v12, %v3916_v54  ;;  %vm941_vm0 = vcmask 908288  }
 0x11b   : > { %v488_v25 = vmul.f32 %v483_v16, %v479_v24  ;;  %v489_v26 = vmul.f32 %v487_v17, %v476_v23  ;;  %v631_v16 = vrot.slane %v3877_v13, %v3916_v54  ;;  %v657_v24 = vrot.slane %v3872_v12, %v3921_v6 }
 0x11d   : > { %v490_v32 = vpack.c.bf16 %v488_v25, %v488_v25  ;;  %v491_v33 = vpack.c.bf16 %v489_v26, %v489_v26  ;;  %v501_v34 = vpop.permute.xlu1 %500  ;;  %v531_v35 = vpop.permute.xlu0 %530 }
 0x11e   : > { %v506_v38 = vsel %vm505_vm1, %v504_v14, %v501_v34  ;;  %v509_v39 = vsel %vm505_vm1, %v501_v34, %v504_v14  ;;  %v536_v40 = vsel %vm535_vm2, %v534_v20, %v531_v35  ;;  %v539_v41 = vsel %vm535_vm2, %v531_v35, %v534_v20 }
 0x11f   : > { %v494_v42 = vrot.slane %v490_v32, 6  ;;  %v495_v43 = vrot.slane %v491_v33, 6  ;;  %v518_v44 = vmul.f32 %v513_v27, %v509_v39  ;;  %v519_v45 = vmul.f32 %v517_v28, %v506_v38 }
 0x120   : > { %v548_v46 = vmul.f32 %v543_v29, %v539_v41  ;;  %v549_v47 = vmul.f32 %v547_v30, %v536_v40  ;;  %v661_v27 = vrot.slane %v3877_v13, %v3921_v6  ;;  %v3936_v28 = vsub.s32 4, %v3864_v10 }
 0x121   : > { %498 = vst [vmem:[#allocation2] sm:$0xc] %v494_v42  ;;  %499 = vst [vmem:[#allocation2 + $0x8] sm:$0xc] %v495_v43  ;;  %v520_v49 = vpack.c.bf16 %v518_v44, %v518_v44  ;;  %v521_v50 = vpack.c.bf16 %v519_v45, %v519_v45  ;;  %v450_v51 = vpop.permute.xlu1 %449  ;;  %v447_v52 = vpop.permute.xlu0 %446  ;;  %vm971_vm2 = vcmask 900096  }
 0x122   : > { %v550_v55 = vpack.c.bf16 %v548_v46, %v548_v46  ;;  %v551_v56 = vpack.c.bf16 %v549_v47, %v549_v47  ;;  %v452_v57 = vsel %vm451_vm3, %v450_v51, %v447_v52  ;;  %v455_v58 = vsel %vm451_vm3, %v447_v52, %v450_v51  ;;  %v3947_v47 = vld [vmem:[%s4990_s3 + $0x10] sm:$0xff] }
 0x123   : > { %v524_v59 = vrot.slane %v520_v49, 4  ;;  %v525_v60 = vrot.slane %v521_v50, 4  ;;  %v464_v61 = vmul.f32 %v459_v36, %v455_v58  ;;  %v465_v62 = vmul.f32 %v463_v37, %v452_v57 }
 0x124   : > { %v554_v63 = vrot.slane %v550_v55, 2  ;;  %v555_v0 = vrot.slane %v551_v56, 2  ;;  %v573_v10 = vrot.slane %v3872_v12, %v3936_v28  ;;  %v577_v42 = vrot.slane %v3877_v13, %v3936_v28 }
 0x125   : > { %528 = vst [vmem:[#allocation2] sm:$0x30] %v524_v59  ;;  %529 = vst [vmem:[#allocation2 + $0x8] sm:$0x30] %v525_v60  ;;  %v466_v1 = vpack.c.bf16 %v464_v61, %v464_v61  ;;  %v467_v2 = vpack.c.bf16 %v465_v62, %v465_v62  ;;  %v588_v3 = vpop.permute.xlu1 %587  ;;  %v585_v5 = vpop.permute.xlu0 %584  ;;  %vm887_vm3 = vcmask 924672  }
 0x126   : > { %558 = vst [vmem:[#allocation2] sm:$0xc0] %v554_v63  ;;  %559 = vst [vmem:[#allocation2 + $0x8] sm:$0xc0] %v555_v0  ;;  %v590_v7 = vsel %vm589_vm4, %v588_v3, %v585_v5  ;;  %v593_v8 = vsel %vm589_vm4, %v585_v5, %v588_v3  ;;  %v741_v5 = vrot.slane %v3947_v47, %v3884_v18  ;;  %vm1025_vm4 = vcmask 793600  }
 0x127   : > { %468 = vst [vmem:[#allocation2] sm:$0x3] %v466_v1  ;;  %469 = vst [vmem:[#allocation2 + $0x8] sm:$0x3] %v467_v2  ;;  %v602_v9 = vmul.f32 %v597_v48, %v593_v8  ;;  %v603_v14 = vmul.f32 %v601_v53, %v590_v7  ;;  %v3952_v48 = vld [vmem:[%s4990_s3 + $0x18] sm:$0xff]  ;;  %v711_v53 = vrot.slane %v3947_v47, %v3867_v11 }
 0x128   : > { %v715_v55 = vrot.slane %v3952_v48, %v3867_v11  ;;  %v745_v7 = vrot.slane %v3952_v48, %v3884_v18 }
 0x129   : > { %v604_v17 = vpack.c.bf16 %v602_v9, %v602_v9  ;;  %v605_v20 = vpack.c.bf16 %v603_v14, %v603_v14  ;;  %v618_v21 = vpop.permute.xlu1 %617  ;;  %v615_v23 = vpop.permute.xlu0 %614 }
 0x12a   : > { %v620_v25 = vsel %vm619_vm5, %v618_v21, %v615_v23  ;;  %v623_v26 = vsel %vm619_vm5, %v615_v23, %v618_v21  ;;  %v775_v21 = vrot.slane %v3952_v48, %v3887_v19 }
 0x12b   : > { %v608_v29 = vrot.slane %v604_v17, 6  ;;  %v609_v30 = vrot.slane %v605_v20, 6  ;;  %v632_v32 = vmul.f32 %v627_v15, %v623_v26  ;;  %v633_v33 = vmul.f32 %v631_v16, %v620_v25 }
 0x12c   : > { %v771_v20 = vrot.slane %v3947_v47, %v3887_v19 }
 0x12d   : > { %612 = vst [vmem:[#allocation2 + $0x10] sm:$0xc] %v608_v29  ;;  %613 = vst [vmem:[#allocation2 + $0x18] sm:$0xc] %v609_v30  ;;  %v634_v34 = vpack.c.bf16 %v632_v32, %v632_v32  ;;  %v635_v35 = vpack.c.bf16 %v633_v33, %v633_v33  ;;  %v648_v36 = vpop.permute.xlu1 %647  ;;  %v645_v37 = vpop.permute.xlu0 %644 }
 0x12e   : > { %v650_v38 = vsel %vm649_vm6, %v648_v36, %v645_v37  ;;  %v653_v39 = vsel %vm649_vm6, %v645_v37, %v648_v36  ;;  %v1140_v40 = vld [vmem:[#allocation2 + $0x8] sm:$0xff]  ;;  %v1139_v41 = vld [vmem:[#allocation2] sm:$0xff]  ;;  %v687_v37 = vrot.slane %v3947_v47, %v3890_v22 }
 0x12f   : > { %v638_v43 = vrot.slane %v634_v34, 4  ;;  %v639_v44 = vrot.slane %v635_v35, 4  ;;  %v662_v45 = vmul.f32 %v657_v24, %v653_v39  ;;  %v663_v46 = vmul.f32 %v661_v27, %v650_v38  ;;  %1201 = vmatprep.subr.bf16.mxu0 %v1140_v40 }
 0x130   : > { %1202 = vmatpush1.bf16.msra.mxu0 %v1139_v41  ;;  %v691_v38 = vrot.slane %v3952_v48, %v3890_v22 }
 0x131   : > { %642 = vst [vmem:[#allocation2 + $0x10] sm:$0x30] %v638_v43  ;;  %643 = vst [vmem:[#allocation2 + $0x18] sm:$0x30] %v639_v44  ;;  %v664_v12 = vpack.c.bf16 %v662_v45, %v662_v45  ;;  %v665_v13 = vpack.c.bf16 %v663_v46, %v663_v46  ;;  %v564_v49 = vpop.permute.xlu1 %563  ;;  %v561_v50 = vpop.permute.xlu0 %560 }
 0x132   : > { %v566_v51 = vsel %vm565_vm7, %v564_v49, %v561_v50  ;;  %v569_v52 = vsel %vm565_vm7, %v561_v50, %v564_v49  ;;  %v810_v49 = vrot.slane %v3952_v48, %v3901_v31  ;;  %vm1055_vm7 = vcmask 785408  }
 0x133   : > { %v668_v56 = vrot.slane %v664_v12, 2  ;;  %v669_v57 = vrot.slane %v665_v13, 2  ;;  %v578_v58 = vmul.f32 %v573_v10, %v569_v52  ;;  %v579_v59 = vmul.f32 %v577_v42, %v566_v51 }
 0x134   : > { %v806_v13 = vrot.slane %v3947_v47, %v3901_v31 }
 0x135   : > { %672 = vst [vmem:[#allocation2 + $0x10] sm:$0xc0] %v668_v56  ;;  %673 = vst [vmem:[#allocation2 + $0x18] sm:$0xc0] %v669_v57  ;;  %v580_v60 = vpack.c.bf16 %v578_v58, %v578_v58  ;;  %v581_v61 = vpack.c.bf16 %v579_v59, %v579_v59  ;;  %v702_v62 = vpop.permute.xlu1 %701  ;;  %v699_v63 = vpop.permute.xlu0 %698 }
 0x136   : > { %v704_v0 = vsel %vm703_vm8, %v702_v62, %v699_v63  ;;  %v707_v1 = vsel %vm703_vm8, %v699_v63, %v702_v62  ;;  %v836_v63 = vrot.slane %v3947_v47, %v3916_v54  ;;  %vm1085_vm8 = vcmask 777216  }
 0x137   : > { %582 = vst [vmem:[#allocation2 + $0x10] sm:$0x3] %v580_v60  ;;  %583 = vst [vmem:[#allocation2 + $0x18] sm:$0x3] %v581_v61  ;;  %v716_v2 = vmul.f32 %v711_v53, %v707_v1  ;;  %v717_v3 = vmul.f32 %v715_v55, %v704_v0  ;;  %v840_v0 = vrot.slane %v3952_v48, %v3916_v54 }
 0x139   : > { %v718_v8 = vpack.c.bf16 %v716_v2, %v716_v2  ;;  %v719_v9 = vpack.c.bf16 %v717_v3, %v717_v3  ;;  %v732_v14 = vpop.permute.xlu1 %731  ;;  %v729_v15 = vpop.permute.xlu0 %728 }
 0x13a   : > { %v734_v16 = vsel %vm733_vm9, %v732_v14, %v729_v15  ;;  %v737_v17 = vsel %vm733_vm9, %v729_v15, %v732_v14  ;;  %v870_v14 = vrot.slane %v3952_v48, %v3921_v6  ;;  %vm1001_vm9 = vcmask 801792  }
 0x13b   : > { %v722_v23 = vrot.slane %v718_v8, 6  ;;  %v723_v24 = vrot.slane %v719_v9, 6  ;;  %v746_v25 = vmul.f32 %v741_v5, %v737_v17  ;;  %v747_v26 = vmul.f32 %v745_v7, %v734_v16 }
 0x13c   : > { %v866_v9 = vrot.slane %v3947_v47, %v3921_v6 }
 0x13d   : > { %726 = vst [vmem:[#allocation2 + $0x20] sm:$0xc] %v722_v23  ;;  %727 = vst [vmem:[#allocation2 + $0x28] sm:$0xc] %v723_v24  ;;  %v748_v27 = vpack.c.bf16 %v746_v25, %v746_v25  ;;  %v749_v29 = vpack.c.bf16 %v747_v26, %v747_v26  ;;  %v762_v30 = vpop.permute.xlu1 %761  ;;  %v759_v32 = vpop.permute.xlu0 %758  ;;  %v4000_v23 = vld [vmem:[%s4990_s3 + $0x28] sm:$0xff] }
 0x13e   : > { %v764_v33 = vsel %vm763_vm10, %v762_v30, %v759_v32  ;;  %v767_v34 = vsel %vm763_vm10, %v759_v32, %v762_v30  ;;  %v1142_v35 = vld [vmem:[#allocation2 + $0x18] sm:$0xff]  ;;  %v1141_v36 = vld [vmem:[#allocation2 + $0x10] sm:$0xff] }
 0x13f   : > { %v752_v39 = vrot.slane %v748_v27, 4  ;;  %v753_v40 = vrot.slane %v749_v29, 4  ;;  %v776_v41 = vmul.f32 %v771_v20, %v767_v34  ;;  %v777_v10 = vmul.f32 %v775_v21, %v764_v33  ;;  %1203 = vmatprep.subr.bf16.mxu0 %v1142_v35  ;;  %v3995_v21 = vld [vmem:[%s4990_s3 + $0x20] sm:$0xff] }
 0x140   : > { %1204 = vmatpush1.bf16.msra.mxu0 %v1141_v36  ;;  %v920_v32 = vrot.slane %v3995_v21, %v3867_v11  ;;  %v924_v33 = vrot.slane %v4000_v23, %v3867_v11 }
 0x141   : > { %756 = vst [vmem:[#allocation2 + $0x20] sm:$0x30] %v752_v39  ;;  %757 = vst [vmem:[#allocation2 + $0x28] sm:$0x30] %v753_v40  ;;  %v778_v42 = vpack.c.bf16 %v776_v41, %v776_v41  ;;  %v779_v43 = vpack.c.bf16 %v777_v10, %v777_v10  ;;  %v678_v44 = vpop.permute.xlu1 %677  ;;  %v675_v45 = vpop.permute.xlu0 %674 }
 0x142   : > { %v680_v46 = vsel %vm679_vm11, %v678_v44, %v675_v45  ;;  %v683_v12 = vsel %vm679_vm11, %v675_v45, %v678_v44  ;;  %v954_v44 = vrot.slane %v4000_v23, %v3884_v18 }
 0x143   : > { %v782_v50 = vrot.slane %v778_v42, 2  ;;  %v783_v51 = vrot.slane %v779_v43, 2  ;;  %v692_v52 = vmul.f32 %v687_v37, %v683_v12  ;;  %v693_v53 = vmul.f32 %v691_v38, %v680_v46 }
 0x144   : > { %v950_v43 = vrot.slane %v3995_v21, %v3884_v18 }
 0x145   : > { %786 = vst [vmem:[#allocation2 + $0x20] sm:$0xc0] %v782_v50  ;;  %787 = vst [vmem:[#allocation2 + $0x28] sm:$0xc0] %v783_v51  ;;  %v694_v55 = vpack.c.bf16 %v692_v52, %v692_v52  ;;  %v695_v56 = vpack.c.bf16 %v693_v53, %v693_v53  ;;  %v796_v57 = vpop.permute.xlu1 %795  ;;  %v794_v58 = vpop.permute.xlu0 %793 }
 0x146   : > { %v798_v59 = vsel %vm797_vm12, %v794_v58, %v796_v57  ;;  %v802_v60 = vsel %vm797_vm12, %v796_v57, %v794_v58  ;;  %v984_v57 = vrot.slane %v4000_v23, %v3887_v19 }
 0x147   : > { %696 = vst [vmem:[#allocation2 + $0x20] sm:$0x3] %v694_v55  ;;  %697 = vst [vmem:[#allocation2 + $0x28] sm:$0x3] %v695_v56  ;;  %v811_v61 = vmul.f32 %v806_v13, %v798_v59  ;;  %v812_v62 = vmul.f32 %v810_v49, %v802_v60  ;;  %v980_v56 = vrot.slane %v3995_v21, %v3887_v19 }
 0x149   : > { %v813_v1 = vpack.c.bf16 %v811_v61, %v811_v61  ;;  %v814_v2 = vpack.c.bf16 %v812_v62, %v812_v62  ;;  %v826_v3 = vpop.permute.xlu1 %825  ;;  %v824_v5 = vpop.permute.xlu0 %823 }
 0x14a   : > { %v828_v7 = vsel %vm827_vm13, %v824_v5, %v826_v3  ;;  %v832_v8 = vsel %vm827_vm13, %v826_v3, %v824_v5  ;;  %v896_v5 = vrot.slane %v3995_v21, %v3890_v22  ;;  %vm1115_vm13 = vcmask 769024  }
 0x14b   : > { %v817_v15 = vrot.slane %v813_v1, 6  ;;  %v818_v16 = vrot.slane %v814_v2, 6  ;;  %v841_v17 = vmul.f32 %v836_v63, %v828_v7  ;;  %v842_v20 = vmul.f32 %v840_v0, %v832_v8 }
 0x14c   : > { %v900_v7 = vrot.slane %v4000_v23, %v3890_v22 }
 0x14d   : > { %821 = vst [vmem:[#allocation2 + $0x30] sm:$0xc] %v817_v15  ;;  %822 = vst [vmem:[#allocation2 + $0x38] sm:$0xc] %v818_v16  ;;  %v843_v47 = vpack.c.bf16 %v841_v17, %v841_v17  ;;  %v844_v24 = vpack.c.bf16 %v842_v20, %v842_v20  ;;  %v856_v25 = vpop.permute.xlu1 %855  ;;  %v854_v48 = vpop.permute.xlu0 %853 }
 0x14e   : > { %v858_v26 = vsel %vm857_vm14, %v854_v48, %v856_v25  ;;  %v862_v27 = vsel %vm857_vm14, %v856_v25, %v854_v48  ;;  %v1144_v29 = vld [vmem:[#allocation2 + $0x28] sm:$0xff]  ;;  %v1143_v30 = vld [vmem:[#allocation2 + $0x20] sm:$0xff]  ;;  %vm1194_vm14 = vcmask 1041408  }
 0x14f   : > { %v847_v34 = vrot.slane %v843_v47, 4  ;;  %v848_v35 = vrot.slane %v844_v24, 4  ;;  %v871_v36 = vmul.f32 %v866_v9, %v858_v26  ;;  %v872_v37 = vmul.f32 %v870_v14, %v862_v27  ;;  %1205 = vmatprep.subr.bf16.mxu0 %v1144_v29 }
 0x150   : > { %1206 = vmatpush1.bf16.msra.mxu0 %v1143_v30  ;;  %v1034_v27 = vrot.slane %v3995_v21, %v3901_v31  ;;  %v1038_v29 = vrot.slane %v4000_v23, %v3901_v31 }
 0x151   : > { %851 = vst [vmem:[#allocation2 + $0x30] sm:$0x30] %v847_v34  ;;  %852 = vst [vmem:[#allocation2 + $0x38] sm:$0x30] %v848_v35  ;;  %v873_v38 = vpack.c.bf16 %v871_v36, %v871_v36  ;;  %v874_v39 = vpack.c.bf16 %v872_v37, %v872_v37  ;;  %v910_v40 = vpop.permute.xlu1 %909  ;;  %v908_v41 = vpop.permute.xlu0 %907 }
 0x152   : > { %v912_v10 = vsel %vm911_vm15, %v908_v41, %v910_v40  ;;  %v916_v42 = vsel %vm911_vm15, %v910_v40, %v908_v41 }
 0x153   : > { %v877_v45 = vrot.slane %v873_v38, 2  ;;  %v878_v46 = vrot.slane %v874_v39, 2  ;;  %v925_v12 = vmul.f32 %v920_v32, %v912_v10  ;;  %v926_v13 = vmul.f32 %v924_v33, %v916_v42 }
 0x154   : > { %v1064_v42 = vrot.slane %v3995_v21, %v3916_v54 }
 0x155   : > { %881 = vst [vmem:[#allocation2 + $0x30] sm:$0xc0] %v877_v45  ;;  %882 = vst [vmem:[#allocation2 + $0x38] sm:$0xc0] %v878_v46  ;;  %v927_v49 = vpack.c.bf16 %v925_v12, %v925_v12  ;;  %v928_v50 = vpack.c.bf16 %v926_v13, %v926_v13  ;;  %v940_v51 = vpop.permute.xlu1 %939  ;;  %v938_v52 = vpop.permute.xlu0 %937 }
 0x156   : > { %v942_v53 = vsel %vm941_vm0, %v938_v52, %v940_v51  ;;  %v946_v55 = vsel %vm941_vm0, %v940_v51, %v938_v52  ;;  %v1098_v51 = vrot.slane %v4000_v23, %v3921_v6 }
 0x157   : > { %v931_v58 = vrot.slane %v927_v49, 6  ;;  %v932_v59 = vrot.slane %v928_v50, 6  ;;  %v955_v60 = vmul.f32 %v950_v43, %v942_v53  ;;  %v956_v61 = vmul.f32 %v954_v44, %v946_v55 }
 0x158   : > { %v1068_v43 = vrot.slane %v4000_v23, %v3916_v54  ;;  %v1094_v50 = vrot.slane %v3995_v21, %v3921_v6 }
 0x159   : > { %935 = vst [vmem:[#allocation2 + $0x40] sm:$0xc] %v931_v58  ;;  %936 = vst [vmem:[#allocation2 + $0x48] sm:$0xc] %v932_v59  ;;  %v957_v62 = vpack.c.bf16 %v955_v60, %v955_v60  ;;  %v958_v63 = vpack.c.bf16 %v956_v61, %v956_v61  ;;  %v970_v0 = vpop.permute.xlu1 %969  ;;  %v968_v1 = vpop.permute.xlu0 %967 }
 0x15a   : > { %v972_v2 = vsel %vm971_vm2, %v968_v1, %v970_v0  ;;  %v976_v3 = vsel %vm971_vm2, %v970_v0, %v968_v1  ;;  %v1010_v1 = vrot.slane %v3995_v21, %v3936_v28  ;;  %vm1187_vm2 = vcmask 818176  }
 0x15b   : > { %v961_v8 = vrot.slane %v957_v62, 4  ;;  %v962_v9 = vrot.slane %v958_v63, 4  ;;  %v985_v14 = vmul.f32 %v980_v56, %v972_v2  ;;  %v986_v15 = vmul.f32 %v984_v57, %v976_v3 }
 0x15c   : > { %v1146_v16 = vld [vmem:[#allocation2 + $0x38] sm:$0xff]  ;;  %v1145_v17 = vld [vmem:[#allocation2 + $0x30] sm:$0xff]  ;;  %v1014_v2 = vrot.slane %v4000_v23, %v3936_v28 }
 0x15d   : > { %965 = vst [vmem:[#allocation2 + $0x40] sm:$0x30] %v961_v8  ;;  %966 = vst [vmem:[#allocation2 + $0x48] sm:$0x30] %v962_v9  ;;  %v987_v20 = vpack.c.bf16 %v985_v14, %v985_v14  ;;  %v988_v47 = vpack.c.bf16 %v986_v15, %v986_v15  ;;  %v886_v24 = vpop.permute.xlu1 %885  ;;  %v884_v25 = vpop.permute.xlu0 %883  ;;  %1207 = vmatprep.subr.bf16.mxu0 %v1146_v16 }
 0x15e   : > { %v888_v48 = vsel %vm887_vm3, %v884_v25, %v886_v24  ;;  %v892_v26 = vsel %vm887_vm3, %v886_v24, %v884_v25  ;;  %1208 = vmatpush1.bf16.msra.mxu0 %v1145_v17  ;;  %v2959_v24 = vld [vmem:[%s4990_s3 + $0x30] ss:$0 sm:$0xff]  ;;  %v2960_v25 = vld [vmem:[%s4990_s3 + $0x38] ss:$0 sm:$0xff] }
 0x15f   : > { %v991_v30 = vrot.slane %v987_v20, 2  ;;  %v992_v32 = vrot.slane %v988_v47, 2  ;;  %v901_v33 = vmul.f32 %v896_v5, %v888_v48  ;;  %v902_v34 = vmul.f32 %v900_v7, %v892_v26 }
 0x161   : > { %995 = vst [vmem:[#allocation2 + $0x40] sm:$0xc0] %v991_v30  ;;  %996 = vst [vmem:[#allocation2 + $0x48] sm:$0xc0] %v992_v32  ;;  %v903_v35 = vpack.c.bf16 %v901_v33, %v901_v33  ;;  %v904_v36 = vpack.c.bf16 %v902_v34, %v902_v34  ;;  %v1024_v37 = vpop.permute.xlu1 %1023  ;;  %v1022_v38 = vpop.permute.xlu0 %1021 }
 0x162   : > { %v1026_v39 = vsel %vm1025_vm4, %v1022_v38, %v1024_v37  ;;  %v1030_v40 = vsel %vm1025_vm4, %v1024_v37, %v1022_v38 }
 0x163   : > { %905 = vst [vmem:[#allocation2 + $0x40] sm:$0x3] %v903_v35  ;;  %906 = vst [vmem:[#allocation2 + $0x48] sm:$0x3] %v904_v36  ;;  %v1039_v41 = vmul.f32 %v1034_v27, %v1026_v39  ;;  %v1040_v10 = vmul.f32 %v1038_v29, %v1030_v40 }
 0x165   : > { %v1041_v44 = vpack.c.bf16 %v1039_v41, %v1039_v41  ;;  %v1042_v45 = vpack.c.bf16 %v1040_v10, %v1040_v10  ;;  %v1054_v46 = vpop.permute.xlu1 %1053  ;;  %v1052_v12 = vpop.permute.xlu0 %1051  ;;  %v3170_v10 = vld [vmem:[#allocation6] sm:$0xff]  }
 0x166   : > { %v1056_v13 = vsel %vm1055_vm7, %v1052_v12, %v1054_v46  ;;  %v1060_v49 = vsel %vm1055_vm7, %v1054_v46, %v1052_v12 }
 0x167   : > { %v1045_v52 = vrot.slane %v1041_v44, 6  ;;  %v1046_v53 = vrot.slane %v1042_v45, 6  ;;  %v1069_v55 = vmul.f32 %v1064_v42, %v1056_v13  ;;  %v1070_v56 = vmul.f32 %v1068_v43, %v1060_v49  ;;  %v3171_v42 = vld [vmem:[#allocation6 + $0x8] sm:$0xff]  }
 0x169   : > { %1049 = vst [vmem:[#allocation2 + $0x50] sm:$0xc] %v1045_v52  ;;  %1050 = vst [vmem:[#allocation2 + $0x58] sm:$0xc] %v1046_v53  ;;  %v1071_v57 = vpack.c.bf16 %v1069_v55, %v1069_v55  ;;  %v1072_v58 = vpack.c.bf16 %v1070_v56, %v1070_v56  ;;  %v1084_v59 = vpop.permute.xlu1 %1083  ;;  %v1082_v60 = vpop.permute.xlu0 %1081 }
 0x16a   : > { %v1086_v61 = vsel %vm1085_vm8, %v1082_v60, %v1084_v59  ;;  %v1090_v62 = vsel %vm1085_vm8, %v1084_v59, %v1082_v60  ;;  %v1148_v63 = vld [vmem:[#allocation2 + $0x48] sm:$0xff]  ;;  %v1147_v0 = vld [vmem:[#allocation2 + $0x40] sm:$0xff] }
 0x16b   : > { %v1075_v3 = vrot.slane %v1071_v57, 4  ;;  %v1076_v5 = vrot.slane %v1072_v58, 4  ;;  %v1099_v7 = vmul.f32 %v1094_v50, %v1086_v61  ;;  %v1100_v8 = vmul.f32 %v1098_v51, %v1090_v62  ;;  %1209 = vmatprep.subr.bf16.mxu0 %v1148_v63 }
 0x16c   : > { %1210 = vmatpush1.bf16.msra.mxu0 %v1147_v0 }
 0x16d   : > { %1079 = vst [vmem:[#allocation2 + $0x50] sm:$0x30] %v1075_v3  ;;  %1080 = vst [vmem:[#allocation2 + $0x58] sm:$0x30] %v1076_v5  ;;  %v1101_v9 = vpack.c.bf16 %v1099_v7, %v1099_v7  ;;  %v1102_v14 = vpack.c.bf16 %v1100_v8, %v1100_v8  ;;  %v1000_v15 = vpop.permute.xlu1 %999  ;;  %v998_v16 = vpop.permute.xlu0 %997 }
 0x16e   : > { %v1002_v17 = vsel %vm1001_vm9, %v998_v16, %v1000_v15  ;;  %v1006_v20 = vsel %vm1001_vm9, %v1000_v15, %v998_v16 }
 0x16f   : > { %v1105_v21 = vrot.slane %v1101_v9, 2  ;;  %v1106_v47 = vrot.slane %v1102_v14, 2  ;;  %v1015_v28 = vmul.f32 %v1010_v1, %v1002_v17  ;;  %v1016_v23 = vmul.f32 %v1014_v2, %v1006_v20 }
 0x171   : > { %1109 = vst [vmem:[#allocation2 + $0x50] sm:$0xc0] %v1105_v21  ;;  %1110 = vst [vmem:[#allocation2 + $0x58] sm:$0xc0] %v1106_v47  ;;  %v1017_v48 = vpack.c.bf16 %v1015_v28, %v1015_v28  ;;  %v1018_v26 = vpack.c.bf16 %v1016_v23, %v1016_v23  ;;  %v1114_v27 = vpop.permute.xlu1 %1113  ;;  %v1112_v29 = vpop.permute.xlu0 %1111 }
 0x172   : > { %v1116_v30 = vsel %vm1115_vm13, %v1112_v29, %v1114_v27  ;;  %v1120_v32 = vsel %vm1115_vm13, %v1114_v27, %v1112_v29 }
 0x173   : > { %1019 = vst [vmem:[#allocation2 + $0x50] sm:$0x3] %v1017_v48  ;;  %1020 = vst [vmem:[#allocation2 + $0x58] sm:$0x3] %v1018_v26  ;;  %v1129_v33 = vmul.f32 %v2959_v24, %v1116_v30  ;;  %v1130_v34 = vmul.f32 %v2960_v25, %v1120_v32 }
 0x175   : > { %v1131_v35 = vpack.c.bf16 %v1129_v33, %v1129_v33  ;;  %v1132_v36 = vpack.c.bf16 %v1130_v34, %v1130_v34 }
 0x177   : > { %1133 = vst [vmem:[#allocation2 + $0x60] sm:$0x3] %v1131_v35  ;;  %1134 = vst [vmem:[#allocation2 + $0x68] sm:$0x3] %v1132_v36 }
 0x17a   : > { %v1150_v37 = vld [vmem:[#allocation2 + $0x58] sm:$0xff]  ;;  %v1149_v38 = vld [vmem:[#allocation2 + $0x50] sm:$0xff] }
 0x17b   : > { %1211 = vmatprep.subr.bf16.mxu0 %v1150_v37 }
 0x17c   : > { %1212 = vmatpush1.bf16.msra.mxu0 %v1149_v38 }
 0x17e   : > { %v1152_v39 = vld [vmem:[#allocation2 + $0x68] sm:$0x3]  ;;  %v1151_v40 = vld [vmem:[#allocation2 + $0x60] sm:$0x3] }
 0x17f   : > { %2963 = vmatprep.subr.msk.bf16.mxu0 %vm1194_vm14, %v1152_v39  ;;  %v1196_v41 = vsel %vm1194_vm14, %v1151_v40, 0  ;;  %v3174_v40 = vld [vmem:[%s4991_s4 + $0x4] ss:$12 sps:$4 sm:$0xff]  }
 0x180   : > { %1214 = vmatpush1.bf16.msra.mxu0 %v1196_v41  ;;  %1938 = vmatprep.mubr.bf16.mxu1 %v3174_v40 }
 0x182   : > { %v1160_v43 = vpop.permute.xlu0 %1159  ;;  %v1165_v45 = vpop.permute.xlu1 %1164 }
 0x183   : > { %2964 = vmatmul.mubr.msk.bf16.vlgmr.msra.gmra.mrb[0].mxu0 %vm1187_vm2, %v3170_v10 }
 0x184   : > { %1243 = vmatprep.mubr.bf16.mxu0 %v3489_v4 }
 0x186   : > { %v1170_v58 = vpop.permute.xlu1 %1169  ;;  %v1175_v62 = vpop.permute.xlu0 %1174 }
 0x18b   : > { %2965 = vmatmul.mubr.msk.bf16.gmra.mrb[4].mxu0 %vm1187_vm2, %v3171_v42 }
 0x256   : > { %v1235_v44 = vpop.f32.mrb[0].mxu0 }
 0x257   : > { %v1236_v46 = vadd.f32 %v1235_v44, %v1160_v43  ;;  %v1237_v12 = vpop.f32.mrb[1].mxu0 }
 0x258   : > { %v1238_v13 = vadd.f32 %v1237_v12, %v1160_v43  ;;  %v1239_v49 = vpop.f32.mrb[2].mxu0 }
 0x259   : > { %v1262_v50 = vmul.f32 1.442695, %v1236_v46  ;;  %v1240_v51 = vadd.f32 %v1239_v49, %v1165_v45  ;;  %v1241_v52 = vpop.f32.mrb[3].mxu0  ;;  %vm1254_vm4 = vcmp.gt.f32.partialorder %v1236_v46, 0.0 }
 0x25a   : > { %v1264_v53 = vmul.f32 1.442695, %v1238_v13  ;;  %v1242_v55 = vadd.f32 %v1241_v52, %v1165_v45  ;;  %vm1255_vm7 = vcmp.gt.f32.partialorder %v1238_v13, 0.0  ;;  %v1849_v52 = vld [vmem:[%s4992_s5 + $0x18] sm:$0xff] }
 0x25b   : > { %3188 = vpow2.f32 %v1262_v50  ;;  %v1266_v56 = vmul.f32 1.442695, %v1240_v51  ;;  %vm1256_vm8 = vcmp.gt.f32.partialorder %v1240_v51, 0.0  ;;  %v1848_v50 = vld [vmem:[%s4992_s5 + $0x10] sm:$0xff] }
 0x25c   : > { %3190 = vpow2.f32 %v1264_v53  ;;  %v1268_v57 = vmul.f32 1.442695, %v1242_v55  ;;  %vm1257_vm9 = vcmp.gt.f32.partialorder %v1242_v55, 0.0  ;;  %v4245_v53 = vld [vmem:[#allocation8] sm:$0xff] }
 0x25d   : > { %3192 = vpow2.f32 %v1266_v56 }
 0x25e   : > { %3194 = vpow2.f32 %v1268_v57  ;;  %v1245_v59 = vpop.f32.mrb[4].mxu0  ;;  %v1353_v57 = vrot.slane %v4245_v53, %v3890_v22 }
 0x25f   : > { %v1246_v60 = vadd.f32 %v1245_v59, %v1170_v58  ;;  %v1247_v61 = vpop.f32.mrb[5].mxu0 }
 0x260   : > { %v1248_v63 = vadd.f32 %v1247_v61, %v1170_v58  ;;  %v1249_v0 = vpop.f32.mrb[6].mxu0 }
 0x261   : > { %v1270_v1 = vmul.f32 1.442695, %v1246_v60  ;;  %v1250_v2 = vadd.f32 %v1249_v0, %v1175_v62  ;;  %v1251_v3 = vpop.f32.mrb[7].mxu0  ;;  %vm1258_vm13 = vcmp.gt.f32.partialorder %v1246_v60, 0.0 }
 0x262   : > { %v1272_v5 = vmul.f32 1.442695, %v1248_v63  ;;  %v1252_v7 = vadd.f32 %v1251_v3, %v1175_v62  ;;  %vm1259_vm14 = vcmp.gt.f32.partialorder %v1248_v63, 0.0 }
 0x263   : > { %3196 = vpow2.f32 %v1270_v1  ;;  %v1274_v8 = vmul.f32 1.442695, %v1250_v2  ;;  %vm1260_vm2 = vcmp.gt.f32.partialorder %v1250_v2, 0.0 }
 0x264   : > { %3198 = vpow2.f32 %v1272_v5  ;;  %v1276_v9 = vmul.f32 1.442695, %v1252_v7 }
 0x265   : > { %v3189_v14 = vpop.eup %3188  ;;  %3200 = vpow2.f32 %v1274_v8 }
 0x266   : > { %v3191_v15 = vpop.eup %3190  ;;  %v2966_v16 = vadd.f32 -1.0, %v3189_v14  ;;  %3202 = vpow2.f32 %v1276_v9 }
 0x267   : > { %v3193_v17 = vpop.eup %3192  ;;  %v2967_v20 = vadd.f32 -1.0, %v3191_v15 }
 0x268   : > { %v3195_v21 = vpop.eup %3194  ;;  %v4058_v47 = vsel %vm1254_vm4, %v1236_v46, %v2966_v16  ;;  %v2968_v28 = vadd.f32 -1.0, %v3193_v17  ;;  %vm1261_vm4 = vcmp.gt.f32.partialorder %v1252_v7, 0.0  ;;  %v1846_v46 = vld [vmem:[%s4992_s5] sm:$0xff] }
 0x269   : > { %1294 = vst [vmem:[%s4060_s11] sm:$0xff] %v4058_v47  ;;  %v4064_v23 = vsel %vm1255_vm7, %v1238_v13, %v2967_v20  ;;  %v2969_v24 = vadd.f32 -1.0, %v3195_v21  ;;  %1326 = vrot.lane.b32.xlu1 %v4058_v47, %s3470_s28  ;;  %v1847_v13 = vld [vmem:[%s4992_s5 + $0x8] sm:$0xff] }
 0x26a   : > { %1295 = vst [vmem:[%s4060_s11 + $0x8] sm:$0xff] %v4064_v23  ;;  %v4070_v25 = vsel %vm1256_vm8, %v1240_v51, %v2968_v28  ;;  %1564 = vrot.lane.b32.xlu0 %v4064_v23, %s5015_s25 }
 0x26b   : > { %1296 = vst [vmem:[%s4060_s11 + $0x10] sm:$0xff] %v4070_v25  ;;  %v4076_v48 = vsel %vm1257_vm9, %v1242_v55, %v2969_v24  ;;  %v4247_v55 = vld [vmem:[#allocation8 + $0x8] sm:$0xff] }
 0x26c   : > { %1297 = vst [vmem:[%s4060_s11 + $0x18] sm:$0xff] %v4076_v48  ;;  %v1357_v58 = vrot.slane %v4247_v55, %v3890_v22 }
 0x26d   : > { %v3197_v26 = vpop.eup %3196  ;;  %1386 = vrot.lane.b32.xlu1 %v4058_v47, %s5013_s10 }
 0x26e   : > { %v3199_v27 = vpop.eup %3198  ;;  %v2970_v29 = vadd.f32 -1.0, %v3197_v26  ;;  %1328 = vrot.lane.b32.xlu0 %v4070_v25, %s3470_s28 }
 0x26f   : > { %v3201_v30 = vpop.eup %3200  ;;  %v2971_v32 = vadd.f32 -1.0, %v3199_v27 }
 0x270   : > { %v3203_v33 = vpop.eup %3202  ;;  %v4084_v34 = vsel %vm1258_vm13, %v1246_v60, %v2970_v29  ;;  %v2972_v35 = vadd.f32 -1.0, %v3201_v30 }
 0x271   : > { %1298 = vst [vmem:[%s4060_s11 + $0x20] sm:$0xff] %v4084_v34  ;;  %v4088_v36 = vsel %vm1259_vm14, %v1248_v63, %v2971_v32  ;;  %v2973_v37 = vadd.f32 -1.0, %v3203_v33  ;;  %1446 = vrot.lane.b32.xlu1 %v4058_v47, %s5011_s30  ;;  %v1417_v33 = vrot.slane %v4247_v55, %v3867_v11 }
 0x272   : > { %1299 = vst [vmem:[%s4060_s11 + $0x28] sm:$0xff] %v4088_v36  ;;  %v4094_v38 = vsel %vm1260_vm2, %v1250_v2, %v2972_v35  ;;  %1388 = vrot.lane.b32.xlu0 %v4070_v25, %s5013_s10  ;;  %v1413_v35 = vrot.slane %v4245_v53, %v3867_v11 }
 0x273   : > { %1300 = vst [vmem:[%s4060_s11 + $0x30] sm:$0xff] %v4094_v38  ;;  %v4100_v39 = vsel %vm1261_vm4, %v1252_v7, %v2973_v37 }
 0x274   : > { %1301 = vst [vmem:[%s4060_s11 + $0x38] sm:$0xff] %v4100_v39 }
 0x275   : > { %1506 = vrot.lane.b32.xlu1 %v4058_v47, %s5009_s18 }
 0x276   : > { %1448 = vrot.lane.b32.xlu0 %v4070_v25, %s5011_s30 }
 0x279   : > { %1562 = vrot.lane.b32.xlu1 %v4058_v47, %s5015_s25 }
 0x27a   : > { %1508 = vrot.lane.b32.xlu0 %v4070_v25, %s5009_s18 }
 0x27d   : > { %1310 = vrot.lane.b32.xlu1 %v4064_v23, %s3470_s28 }
 0x27e   : > { %1312 = vrot.lane.b32.xlu0 %v4076_v48, %s3470_s28 }
 0x281   : > { %1374 = vrot.lane.b32.xlu1 %v4064_v23, %s5013_s10 }
 0x282   : > { %1376 = vrot.lane.b32.xlu0 %v4076_v48, %s5013_s10 }
 0x285   : > { %1434 = vrot.lane.b32.xlu1 %v4064_v23, %s5011_s30 }
 0x286   : > { %1436 = vrot.lane.b32.xlu0 %v4076_v48, %s5011_s30 }
 0x289   : > { %1494 = vrot.lane.b32.xlu1 %v4064_v23, %s5009_s18 }
 0x28a   : > { %1496 = vrot.lane.b32.xlu0 %v4076_v48, %s5009_s18 }
 0x28d   : > { %1330 = vrot.lane.b32.xlu1 %v4084_v34, %s3470_s28 }
 0x28e   : > { %1332 = vrot.lane.b32.xlu0 %v4094_v38, %s3470_s28 }
 0x291   : > { %1390 = vrot.lane.b32.xlu1 %v4084_v34, %s5013_s10 }
 0x292   : > { %1392 = vrot.lane.b32.xlu0 %v4094_v38, %s5013_s10 }
 0x295   : > { %1450 = vrot.lane.b32.xlu1 %v4084_v34, %s5011_s30 }
 0x296   : > { %1452 = vrot.lane.b32.xlu0 %v4094_v38, %s5011_s30 }
 0x299   : > { %1510 = vrot.lane.b32.xlu1 %v4084_v34, %s5009_s18 }
 0x29a   : > { %1512 = vrot.lane.b32.xlu0 %v4094_v38, %s5009_s18 }
 0x29d   : > { %1314 = vrot.lane.b32.xlu1 %v4088_v36, %s3470_s28 }
 0x29e   : > { %1316 = vrot.lane.b32.xlu0 %v4100_v39, %s3470_s28 }
 0x2a1   : > { %1566 = vrot.lane.b32.xlu1 %v4070_v25, %s5015_s25 }
 0x2a2   : > { %1568 = vrot.lane.b32.xlu0 %v4076_v48, %s5015_s25 }
 0x2a5   : > { %1378 = vrot.lane.b32.xlu1 %v4088_v36, %s5013_s10 }
 0x2a6   : > { %1380 = vrot.lane.b32.xlu0 %v4100_v39, %s5013_s10  ;;  %s2819_s10 = scalar_lea.sflag [#allocation5], %s3759_s1 }
 0x2a9   : > { %1438 = vrot.lane.b32.xlu1 %v4088_v36, %s5011_s30 }
 0x2aa   : > { %1572 = vrot.lane.b32.xlu0 %v4088_v36, %s5015_s25 }
 0x2ad   : > { %1498 = vrot.lane.b32.xlu1 %v4088_v36, %s5009_s18 }
 0x2ae   : > { %1440 = vrot.lane.b32.xlu0 %v4100_v39, %s5011_s30  ;;  %s5038_s30 = smov 127  }
 0x2b1   : > { %1570 = vrot.lane.b32.xlu1 %v4084_v34, %s5015_s25 }
 0x2b2   : > { %1624 = vrot.lane.b32.xlu0 %v4064_v23, %s5035_s21 }
 0x2b5   : > { %1574 = vrot.lane.b32.xlu1 %v4094_v38, %s5015_s25 }
 0x2b6   : > { %1500 = vrot.lane.b32.xlu0 %v4100_v39, %s5009_s18  ;;  %s3490_s18 = smov [#allocation12]  }
 0x2b9   : > { %1622 = vrot.lane.b32.xlu1 %v4058_v47, %s5035_s21 }
 0x2ba   : > { %1628 = vrot.lane.b32.xlu0 %v4076_v48, %s5035_s21 }
 0x2bd   : > { %1626 = vrot.lane.b32.xlu1 %v4070_v25, %s5035_s21 }
 0x2be   : > { %1632 = vrot.lane.b32.xlu0 %v4088_v36, %s5035_s21 }
 0x2c1   : > { %1630 = vrot.lane.b32.xlu1 %v4084_v34, %s5035_s21 }
 0x2c2   : > { %1684 = vrot.lane.b32.xlu0 %v4064_v23, %s5036_s20 }
 0x2c5   : > { %1634 = vrot.lane.b32.xlu1 %v4094_v38, %s5035_s21 }
 0x2c6   : > { %1576 = vrot.lane.b32.xlu0 %v4100_v39, %s5015_s25  ;;  %s5039_s25 = smov 16  }
 0x2c9   : > { %1682 = vrot.lane.b32.xlu1 %v4058_v47, %s5036_s20 }
 0x2ca   : > { %1688 = vrot.lane.b32.xlu0 %v4076_v48, %s5036_s20 }
 0x2cd   : > { %1686 = vrot.lane.b32.xlu1 %v4070_v25, %s5036_s20 }
 0x2ce   : > { %1636 = vrot.lane.b32.xlu0 %v4100_v39, %s5035_s21 }
 0x2d1   : > { %1690 = vrot.lane.b32.xlu1 %v4084_v34, %s5036_s20 }
 0x2d2   : > { %1692 = vrot.lane.b32.xlu0 %v4088_v36, %s5036_s20 }
 0x2d5   : > { %1694 = vrot.lane.b32.xlu1 %v4094_v38, %s5036_s20 }
 0x2d6   : > { %1696 = vrot.lane.b32.xlu0 %v4100_v39, %s5036_s20 }
 0x2d9   : > { %1742 = vrot.lane.b32.xlu1 %v4058_v47, %s5037_s8 }
 0x2da   : > { %1744 = vrot.lane.b32.xlu0 %v4064_v23, %s5037_s8 }
 0x2db   : > { %v1327_v41 = vpop.permute.xlu1 %1326 }
 0x2dc   : > { %v4211_v10 = vpop.permute.xlu0 %1564 }
 0x2dd   : > { %1746 = vrot.lane.b32.xlu1 %v4070_v25, %s5037_s8 }
 0x2de   : > { %1748 = vrot.lane.b32.xlu0 %v4076_v48, %s5037_s8 }
 0x2df   : > { %v1387_v42 = vpop.permute.xlu1 %1386 }
 0x2e0   : > { %v1329_v43 = vpop.permute.xlu0 %1328 }
 0x2e1   : > { %1750 = vrot.lane.b32.xlu1 %v4084_v34, %s5037_s8 }
 0x2e2   : > { %1752 = vrot.lane.b32.xlu0 %v4088_v36, %s5037_s8 }
 0x2e3   : > { %v4221_v44 = vpop.permute.xlu1 %1446 }
 0x2e4   : > { %v1389_v45 = vpop.permute.xlu0 %1388 }
 0x2e5   : > { %1754 = vrot.lane.b32.xlu1 %v4094_v38, %s5037_s8 }
 0x2e6   : > { %1756 = vrot.lane.b32.xlu0 %v4100_v39, %s5037_s8 }
 0x2e7   : > { %v4230_v12 = vpop.permute.xlu1 %1506 }
 0x2e8   : > { %v4235_v49 = vpop.permute.xlu0 %1448 }
 0x2e9   : > { %1852 = vperm.xlu1 %3168, %v1846_v46  }
 0x2ea   : > { %1857 = vperm.xlu0 %3167, %v1847_v13  }
 0x2eb   : > { %v4240_v51 = vpop.permute.xlu1 %1562 }
 0x2ec   : > { %v4249_v56 = vpop.permute.xlu0 %1508 }
 0x2ed   : > { %1862 = vperm.xlu1 %3168, %v1848_v50  }
 0x2ee   : > { %1867 = vperm.xlu0 %3167, %v1849_v52  }
 0x2ef   : > { %v1311_v59 = vpop.permute.xlu1 %1310 }
 0x2f0   : > { %v1334_v60 = vsel %vm619_vm5, %v1327_v41, %v1311_v59  ;;  %v1346_v61 = vsel %vm619_vm5, %v1311_v59, %v1327_v41  ;;  %v1313_v62 = vpop.permute.xlu0 %1312 }
 0x2f1   : > { %v1358_v63 = vmul.f32 %v1353_v57, %v1346_v61  ;;  %v1359_v0 = vmul.f32 %v1357_v58, %v1334_v60  ;;  %v1335_v1 = vsel %vm619_vm5, %v1329_v43, %v1313_v62  ;;  %v1347_v2 = vsel %vm619_vm5, %v1313_v62, %v1329_v43 }
 0x2f2   : > { %v1360_v3 = vmul.f32 %v1353_v57, %v1347_v2  ;;  %v1361_v5 = vmul.f32 %v1357_v58, %v1335_v1 }
 0x2f3   : > { %v1375_v7 = vpop.permute.xlu1 %1374 }
 0x2f4   : > { %v1366_v8 = vpack.c.bf16 %v1360_v3, %v1358_v63  ;;  %v1367_v9 = vpack.c.bf16 %v1361_v5, %v1359_v0  ;;  %v1377_v14 = vpop.permute.xlu0 %1376  ;;  %v1394_v37 = vsel %vm649_vm6, %v1387_v42, %v1375_v7  ;;  %v1406_v43 = vsel %vm649_vm6, %v1375_v7, %v1387_v42 }
 0x2f5   : > { %v1395_v40 = vsel %vm649_vm6, %v1389_v45, %v1377_v14  ;;  %v1407_v46 = vsel %vm649_vm6, %v1377_v14, %v1389_v45  ;;  %v1419_v63 = vmul.f32 %v1417_v33, %v1394_v37  ;;  %v1418_v3 = vmul.f32 %v1413_v35, %v1406_v43 }
 0x2f6   : > { %1906 = vmatprep.subr.bf16.mxu1 %v1367_v9  ;;  %v1421_v0 = vmul.f32 %v1417_v33, %v1395_v40  ;;  %v1420_v5 = vmul.f32 %v1413_v35, %v1407_v46  ;;  %v1477_v14 = vrot.slane %v4247_v55, %v3884_v18 }
 0x2f7   : > { %v1435_v15 = vpop.permute.xlu1 %1434  ;;  %1907 = vmatpush1.bf16.msra.mxu1 %v1366_v8 }
 0x2f8   : > { %v1437_v16 = vpop.permute.xlu0 %1436  ;;  %v1427_v9 = vpack.c.bf16 %v1421_v0, %v1419_v63  ;;  %v1466_v40 = vsel %vm679_vm11, %v1435_v15, %v4221_v44 }
 0x2fb   : > { %v4259_v17 = vpop.permute.xlu1 %1494 }
 0x2fc   : > { %v4261_v20 = vpop.permute.xlu0 %1496 }
 0x2ff   : > { %v1331_v21 = vpop.permute.xlu1 %1330 }
 0x300   : > { %v1333_v28 = vpop.permute.xlu0 %1332 }
 0x303   : > { %v1391_v24 = vpop.permute.xlu1 %1390 }
 0x304   : > { %v1393_v26 = vpop.permute.xlu0 %1392 }
 0x307   : > { %v4263_v27 = vpop.permute.xlu1 %1450 }
 0x308   : > { %v4265_v29 = vpop.permute.xlu0 %1452 }
 0x30b   : > { %v4267_v30 = vpop.permute.xlu1 %1510 }
 0x30c   : > { %v4269_v32 = vpop.permute.xlu0 %1512 }
 0x30f   : > { %v1315_v41 = vpop.permute.xlu1 %1314 }
 0x310   : > { %v1336_v13 = vsel %vm619_vm5, %v1331_v21, %v1315_v41  ;;  %v1348_v50 = vsel %vm619_vm5, %v1315_v41, %v1331_v21  ;;  %v1317_v52 = vpop.permute.xlu0 %1316  ;;  %v1426_v21 = vpack.c.bf16 %v1420_v5, %v1418_v3  ;;  %v1467_v41 = vsel %vm679_vm11, %v1437_v16, %v4235_v49 }
 0x311   : > { %v1362_v59 = vmul.f32 %v1353_v57, %v1348_v50  ;;  %v1363_v60 = vmul.f32 %v1357_v58, %v1336_v13  ;;  %v1337_v61 = vsel %vm619_vm5, %v1333_v28, %v1317_v52  ;;  %v1349_v62 = vsel %vm619_vm5, %v1317_v52, %v1333_v28 }
 0x312   : > { %v1364_v1 = vmul.f32 %v1353_v57, %v1349_v62  ;;  %v1365_v2 = vmul.f32 %v1357_v58, %v1337_v61  ;;  %v1473_v28 = vrot.slane %v4245_v53, %v3884_v18  ;;  %v1454_v57 = vsel %vm679_vm11, %v4221_v44, %v1435_v15 }
 0x313   : > { %v4283_v42 = vpop.permute.xlu1 %1566  ;;  %v1455_v58 = vsel %vm679_vm11, %v4235_v49, %v1437_v16  ;;  %v1479_v61 = vmul.f32 %v1477_v14, %v1454_v57  ;;  %v1537_v44 = vrot.slane %v4247_v55, %v3887_v19  ;;  %v1514_v3 = vsel %vm763_vm10, %v4230_v12, %v4259_v17 }
 0x314   : > { %v1368_v45 = vpack.c.bf16 %v1364_v1, %v1362_v59  ;;  %v1369_v7 = vpack.c.bf16 %v1365_v2, %v1363_v60  ;;  %v4285_v8 = vpop.permute.xlu0 %1568  ;;  %v1481_v62 = vmul.f32 %v1477_v14, %v1455_v58  ;;  %v1478_v15 = vmul.f32 %v1473_v28, %v1466_v40 }
 0x315   : > { %v1480_v16 = vmul.f32 %v1473_v28, %v1467_v41  ;;  %v1539_v57 = vmul.f32 %v1537_v44, %v1514_v3 }
 0x316   : > { %1908 = vmatprep.subr.bf16.mxu1 %v1369_v7 }
 0x317   : > { %v1379_v37 = vpop.permute.xlu1 %1378  ;;  %1909 = vmatpush1.bf16.msra.mxu1 %v1368_v45  ;;  %v1486_v7 = vpack.c.bf16 %v1480_v16, %v1478_v15 }
 0x318   : > { %v1396_v43 = vsel %vm649_vm6, %v1391_v24, %v1379_v37  ;;  %v1408_v46 = vsel %vm649_vm6, %v1379_v37, %v1391_v24  ;;  %v1381_v13 = vpop.permute.xlu0 %1380  ;;  %1910 = vmatprep.subr.bf16.mxu1 %v1427_v9  ;;  %v1533_v9 = vrot.slane %v4245_v53, %v3887_v19  ;;  %v1527_v37 = vsel %vm763_vm10, %v4261_v20, %v4249_v56 }
 0x319   : > { %v1422_v50 = vmul.f32 %v1413_v35, %v1408_v46  ;;  %v1423_v52 = vmul.f32 %v1417_v33, %v1396_v43  ;;  %v1397_v59 = vsel %vm649_vm6, %v1393_v26, %v1381_v13  ;;  %v1409_v60 = vsel %vm649_vm6, %v1381_v13, %v1393_v26 }
 0x31a   : > { %v1424_v63 = vmul.f32 %v1413_v35, %v1409_v60  ;;  %v1425_v0 = vmul.f32 %v1417_v33, %v1397_v59  ;;  %v1487_v26 = vpack.c.bf16 %v1481_v62, %v1479_v61  ;;  %v1515_v33 = vsel %vm763_vm10, %v4249_v56, %v4261_v20 }
 0x31b   : > { %v1439_v49 = vpop.permute.xlu1 %1438  ;;  %1911 = vmatpush1.bf16.msra.mxu1 %v1426_v21  ;;  %v1526_v21 = vsel %vm763_vm10, %v4259_v17, %v4230_v12  ;;  %v1541_v40 = vmul.f32 %v1537_v44, %v1515_v33  ;;  %v1540_v61 = vmul.f32 %v1533_v9, %v1527_v37  ;;  %v1555_v33 = vpack.c.bf16 %v4076_v48, %v4064_v23 }
 0x31c   : > { %v1428_v24 = vpack.c.bf16 %v1424_v63, %v1422_v50  ;;  %v1429_v1 = vpack.c.bf16 %v1425_v0, %v1423_v52  ;;  %v4305_v2 = vpop.permute.xlu0 %1572  ;;  %v1456_v35 = vsel %vm679_vm11, %v4263_v27, %v1439_v49  ;;  %v1468_v5 = vsel %vm679_vm11, %v1439_v49, %v4263_v27 }
 0x31d   : > { %v1482_v43 = vmul.f32 %v1473_v28, %v1468_v5  ;;  %v1483_v46 = vmul.f32 %v1477_v14, %v1456_v35  ;;  %v1538_v60 = vmul.f32 %v1533_v9, %v1526_v21  ;;  %v1547_v56 = vpack.c.bf16 %v1541_v40, %v1539_v57 }
 0x31e   : > { %1912 = vmatprep.subr.bf16.mxu1 %v1429_v1  ;;  %v1595_v35 = vsel %vm797_vm12, %v4285_v8, %v4283_v42  ;;  %v1579_v23 = vsel %vm797_vm12, %v4283_v42, %v4285_v8  ;;  %v1557_v48 = vpack.c.bf16 %v4100_v39, %v4088_v36  ;;  %v1578_v57 = vsel %vm797_vm12, %v4240_v51, %v4211_v10 }
 0x31f   : > { %v1499_v45 = vpop.permute.xlu1 %1498  ;;  %1913 = vmatpush1.bf16.msra.mxu1 %v1428_v24  ;;  %v1556_v42 = vpack.c.bf16 %v4094_v38, %v4084_v34  ;;  %v1665_v34 = vrot.slane %v4247_v55, %v3916_v54 }
 0x320   : > { %v1441_v58 = vpop.permute.xlu0 %1440  ;;  %1914 = vmatprep.subr.bf16.mxu1 %v1487_v26  ;;  %v1516_v20 = vsel %vm763_vm10, %v4267_v30, %v1499_v45 }
 0x321   : > { %v1457_v27 = vsel %vm679_vm11, %v4265_v29, %v1441_v58  ;;  %v1469_v41 = vsel %vm679_vm11, %v1441_v58, %v4265_v29  ;;  %v1528_v29 = vsel %vm763_vm10, %v1499_v45, %v4267_v30  ;;  %v1543_v15 = vmul.f32 %v1537_v44, %v1516_v20 }
 0x322   : > { %v1484_v13 = vmul.f32 %v1473_v28, %v1469_v41  ;;  %v1485_v50 = vmul.f32 %v1477_v14, %v1457_v27  ;;  %v1546_v14 = vpack.c.bf16 %v1540_v61, %v1538_v60  ;;  %v1542_v49 = vmul.f32 %v1533_v9, %v1528_v29 }
 0x323   : > { %v1571_v52 = vpop.permute.xlu1 %1570  ;;  %1915 = vmatpush1.bf16.msra.mxu1 %v1486_v7  ;;  %v1594_v7 = vsel %vm797_vm12, %v4211_v10, %v4240_v51 }
 0x324   : > { %v1488_v12 = vpack.c.bf16 %v1484_v13, %v1482_v43  ;;  %v1489_v17 = vpack.c.bf16 %v1485_v50, %v1483_v46  ;;  %v4329_v59 = vpop.permute.xlu0 %1624  ;;  %v1580_v36 = vsel %vm797_vm12, %v1571_v52, %v4305_v2  ;;  %v1596_v40 = vsel %vm797_vm12, %v4305_v2, %v1571_v52 }
 0x325   : > { %v1661_v43 = vrot.slane %v4245_v53, %v3916_v54 }
 0x326   : > { %1916 = vmatprep.subr.bf16.mxu1 %v1489_v17 }
 0x327   : > { %v1575_v62 = vpop.permute.xlu1 %1574  ;;  %1917 = vmatpush1.bf16.msra.mxu1 %v1488_v12 }
 0x328   : > { %v1501_v28 = vpop.permute.xlu0 %1500  ;;  %1918 = vmatprep.subr.bf16.mxu1 %v1547_v56 }
 0x329   : > { %v1517_v63 = vsel %vm763_vm10, %v4269_v32, %v1501_v28  ;;  %v1529_v0 = vsel %vm763_vm10, %v1501_v28, %v4269_v32  ;;  %v1605_v32 = vrot.slane %v4247_v55, %v3901_v31 }
 0x32a   : > { %v1544_v16 = vmul.f32 %v1533_v9, %v1529_v0  ;;  %v1545_v24 = vmul.f32 %v1537_v44, %v1517_v63  ;;  %v1554_v44 = vpack.c.bf16 %v4070_v25, %v4058_v47  ;;  %v1601_v9 = vrot.slane %v4245_v53, %v3901_v31 }
 0x32b   : > { %v1623_v1 = vpop.permute.xlu1 %1622  ;;  %1919 = vmatpush1.bf16.msra.mxu1 %v1546_v14  ;;  %v1609_v21 = vmul.f32 %v1605_v32, %v1595_v35  ;;  %v1607_v25 = vmul.f32 %v1605_v32, %v1594_v7  ;;  %v1611_v52 = vmul.f32 %v1605_v32, %v1596_v40 }
 0x32c   : > { %v1548_v3 = vpack.c.bf16 %v1544_v16, %v1542_v49  ;;  %v1549_v26 = vpack.c.bf16 %v1545_v24, %v1543_v15  ;;  %v1629_v30 = vpop.permute.xlu0 %1628  ;;  %v1608_v58 = vmul.f32 %v1601_v9, %v1579_v23  ;;  %v1606_v39 = vmul.f32 %v1601_v9, %v1578_v57 }
 0x32d   : > { %v1615_v8 = vpack.c.bf16 %v1609_v21, %v1607_v25  ;;  %v1610_v41 = vmul.f32 %v1601_v9, %v1580_v36  ;;  %v1654_v46 = vsel %vm887_vm3, %v4329_v59, %v1623_v1  ;;  %v1638_v61 = vsel %vm887_vm3, %v1623_v1, %v4329_v59 }
 0x32e   : > { %1920 = vmatprep.subr.bf16.mxu1 %v1549_v26  ;;  %v1614_v51 = vpack.c.bf16 %v1608_v58, %v1606_v39  ;;  %v1667_v20 = vmul.f32 %v1665_v34, %v1654_v46  ;;  %v1666_v49 = vmul.f32 %v1661_v43, %v1638_v61  ;;  %v1725_v59 = vrot.slane %v4247_v55, %v3921_v6  ;;  %v3175_v61 = vld [vmem:[%s4991_s4 + $0x1c] ss:$12 sps:$4 sm:$0xff]  }
 0x32f   : > { %v1627_v5 = vpop.permute.xlu1 %1626  ;;  %1921 = vmatpush1.bf16.msra.mxu1 %v1548_v3  ;;  %v1721_v23 = vrot.slane %v4245_v53, %v3921_v6 }
 0x330   : > { %v1633_v45 = vpop.permute.xlu0 %1632  ;;  %1922 = vmatprep.subr.bf16.mxu1 %v1555_v33  ;;  %v1655_v27 = vsel %vm887_vm3, %v1629_v30, %v1627_v5  ;;  %v1639_v13 = vsel %vm887_vm3, %v1627_v5, %v1629_v30 }
 0x331   : > { %v1669_v12 = vmul.f32 %v1665_v34, %v1655_v27  ;;  %v1668_v29 = vmul.f32 %v1661_v43, %v1639_v13 }
 0x333   : > { %v1631_v47 = vpop.permute.xlu1 %1630  ;;  %1923 = vmatpush1.bf16.msra.mxu1 %v1554_v44  ;;  %v1675_v15 = vpack.c.bf16 %v1669_v12, %v1667_v20  ;;  %v1674_v24 = vpack.c.bf16 %v1668_v29, %v1666_v49 }
 0x334   : > { %v1685_v37 = vpop.permute.xlu0 %1684  ;;  %1924 = vmatprep.subr.bf16.mxu1 %v1557_v48  ;;  %v1640_v0 = vsel %vm887_vm3, %v1631_v47, %v1633_v45 }
 0x335   : > { %v1670_v3 = vmul.f32 %v1661_v43, %v1640_v0 }
 0x337   : > { %v1635_v10 = vpop.permute.xlu1 %1634  ;;  %1925 = vmatpush1.bf16.msra.mxu1 %v1556_v42 }
 0x338   : > { %v1577_v38 = vpop.permute.xlu0 %1576  ;;  %1926 = vmatprep.subr.bf16.mxu1 %v1615_v8 }
 0x339   : > { %v1581_v2 = vsel %vm797_vm12, %v1575_v62, %v1577_v38  ;;  %v1597_v50 = vsel %vm797_vm12, %v1577_v38, %v1575_v62  ;;  %v1656_v62 = vsel %vm887_vm3, %v1633_v45, %v1631_v47 }
 0x33a   : > { %v1612_v17 = vmul.f32 %v1601_v9, %v1581_v2  ;;  %v1613_v60 = vmul.f32 %v1605_v32, %v1597_v50  ;;  %v1671_v30 = vmul.f32 %v1665_v34, %v1656_v62  ;;  %v3172_v2 = vld [vmem:[%s4991_s4] ss:$12 sps:$4 sm:$0xff]   ;;  %v2974_v50 = vld [vmem:[#allocation8 + $0x10] ss:$0 sm:$0xff] }
 0x33b   : > { %v1683_v56 = vpop.permute.xlu1 %1682  ;;  %1927 = vmatpush1.bf16.msra.mxu1 %v1614_v51 }
 0x33c   : > { %v1616_v28 = vpack.c.bf16 %v1612_v17, %v1610_v41  ;;  %v1617_v14 = vpack.c.bf16 %v1613_v60, %v1611_v52  ;;  %v1689_v63 = vpop.permute.xlu0 %1688  ;;  %v1714_v33 = vsel %vm911_vm15, %v1685_v37, %v1683_v56  ;;  %v1698_v48 = vsel %vm911_vm15, %v1683_v56, %v1685_v37  ;;  %v2975_v52 = vld [vmem:[#allocation8 + $0x18] ss:$0 sm:$0xff] }
 0x33d   : > { %v1727_v9 = vmul.f32 %v1725_v59, %v1714_v33  ;;  %v1726_v42 = vmul.f32 %v1721_v23, %v1698_v48 }
 0x33e   : > { %1928 = vmatprep.subr.bf16.mxu1 %v1617_v14 }
 0x33f   : > { %v1687_v16 = vpop.permute.xlu1 %1686  ;;  %1929 = vmatpush1.bf16.msra.mxu1 %v1616_v28 }
 0x340   : > { %v1715_v1 = vsel %vm911_vm15, %v1689_v63, %v1687_v16  ;;  %v1637_v26 = vpop.permute.xlu0 %1636  ;;  %1930 = vmatprep.subr.bf16.mxu1 %v1675_v15  ;;  %v1699_v32 = vsel %vm911_vm15, %v1687_v16, %v1689_v63 }
 0x341   : > { %v1641_v35 = vsel %vm887_vm3, %v1635_v10, %v1637_v26  ;;  %v1657_v5 = vsel %vm887_vm3, %v1637_v26, %v1635_v10  ;;  %v1729_v45 = vmul.f32 %v1725_v59, %v1715_v1  ;;  %v1728_v25 = vmul.f32 %v1721_v23, %v1699_v32 }
 0x342   : > { %v1672_v44 = vmul.f32 %v1661_v43, %v1641_v35  ;;  %v1673_v7 = vmul.f32 %v1665_v34, %v1657_v5 }
 0x343   : > { %v1691_v55 = vpop.permute.xlu1 %1690  ;;  %1931 = vmatpush1.bf16.msra.mxu1 %v1674_v24  ;;  %v1735_v58 = vpack.c.bf16 %v1729_v45, %v1727_v9  ;;  %v1734_v53 = vpack.c.bf16 %v1728_v25, %v1726_v42  ;;  %v3177_v24 = vld [vmem:[%s4991_s4 + $0x18] ss:$12 sps:$4 sm:$0xff]  }
 0x344   : > { %v1676_v21 = vpack.c.bf16 %v1672_v44, %v1670_v3  ;;  %v1677_v57 = vpack.c.bf16 %v1673_v7, %v1671_v30  ;;  %v1693_v47 = vpop.permute.xlu0 %1692 }
 0x345   : > { %v1700_v36 = vsel %vm911_vm15, %v1691_v55, %v1693_v47  ;;  %v1716_v39 = vsel %vm911_vm15, %v1693_v47, %v1691_v55  ;;  %v3179_v55 = vld [vmem:[%s4991_s4 + $0x20] ss:$12 sps:$4 sm:$0xff]  }
 0x346   : > { %1932 = vmatprep.subr.bf16.mxu1 %v1677_v57  ;;  %v1730_v10 = vmul.f32 %v1721_v23, %v1700_v36  ;;  %v1731_v51 = vmul.f32 %v1725_v59, %v1716_v39 }
 0x347   : > { %v1695_v8 = vpop.permute.xlu1 %1694  ;;  %1933 = vmatpush1.bf16.msra.mxu1 %v1676_v21 }
 0x348   : > { %v1697_v40 = vpop.permute.xlu0 %1696  ;;  %1934 = vmatprep.subr.bf16.mxu1 %v1735_v58 }
 0x349   : > { %v1701_v27 = vsel %vm911_vm15, %v1695_v8, %v1697_v40  ;;  %v1717_v37 = vsel %vm911_vm15, %v1697_v40, %v1695_v8 }
 0x34a   : > { %v1732_v41 = vmul.f32 %v1721_v23, %v1701_v27  ;;  %v1733_v43 = vmul.f32 %v1725_v59, %v1717_v37  ;;  %v3178_v23 = vld [vmem:[%s4991_s4 + $0x8] ss:$12 sps:$4 sm:$0xff]  }
 0x34b   : > { %v1743_v34 = vpop.permute.xlu1 %1742  ;;  %1935 = vmatpush1.bf16.msra.mxu1 %v1734_v53 }
 0x34c   : > { %v1736_v38 = vpack.c.bf16 %v1732_v41, %v1730_v10  ;;  %v1737_v46 = vpack.c.bf16 %v1733_v43, %v1731_v51  ;;  %v1745_v13 = vpop.permute.xlu0 %1744 }
 0x34d   : > { %v1758_v12 = vsel %vm941_vm0, %v1743_v34, %v1745_v13  ;;  %v1774_v17 = vsel %vm941_vm0, %v1745_v13, %v1743_v34 }
 0x34e   : > { %1936 = vmatprep.subr.bf16.mxu1 %v1737_v46  ;;  %v1786_v28 = vmul.f32 %v2974_v50, %v1758_v12  ;;  %v1787_v14 = vmul.f32 %v2975_v52, %v1774_v17 }
 0x34f   : > { %v1747_v60 = vpop.permute.xlu1 %1746  ;;  %1937 = vmatpush1.bf16.msra.mxu1 %v1736_v38 }
 0x350   : > { %v1749_v56 = vpop.permute.xlu0 %1748 }
 0x351   : > { %v1759_v20 = vsel %vm941_vm0, %v1747_v60, %v1749_v56  ;;  %v1775_v29 = vsel %vm941_vm0, %v1749_v56, %v1747_v60 }
 0x352   : > { %v1788_v63 = vmul.f32 %v2974_v50, %v1759_v20  ;;  %v1789_v0 = vmul.f32 %v2975_v52, %v1775_v29  ;;  %1939 = vmatmul.mubr.bf16.vlgmr.msra.gmra.mrb[0].mxu1 %v3172_v2 }
 0x353   : > { %v1751_v49 = vpop.permute.xlu1 %1750  ;;  %1948 = vmatprep.mubr.bf16.mxu1 %v3175_v61 }
 0x354   : > { %v1794_v15 = vpack.c.bf16 %v1788_v63, %v1786_v28  ;;  %v1795_v62 = vpack.c.bf16 %v1789_v0, %v1787_v14  ;;  %v1753_v16 = vpop.permute.xlu0 %1752 }
 0x355   : > { %v1760_v3 = vsel %vm941_vm0, %v1751_v49, %v1753_v16  ;;  %v1776_v59 = vsel %vm941_vm0, %v1753_v16, %v1751_v49 }
 0x356   : > { %1959 = vmatprep.subr.bf16.mxu1 %v1795_v62  ;;  %v1790_v35 = vmul.f32 %v2974_v50, %v1760_v3  ;;  %v1791_v5 = vmul.f32 %v2975_v52, %v1776_v59 }
 0x357   : > { %v1755_v1 = vpop.permute.xlu1 %1754  ;;  %1960 = vmatpush1.bf16.msra.mxu1 %v1794_v15 }
 0x358   : > { %v1757_v26 = vpop.permute.xlu0 %1756 }
 0x359   : > { %v1761_v30 = vsel %vm941_vm0, %v1755_v1, %v1757_v26  ;;  %v1777_v33 = vsel %vm941_vm0, %v1757_v26, %v1755_v1 }
 0x35a   : > { %v1792_v32 = vmul.f32 %v2974_v50, %v1761_v30  ;;  %v1793_v45 = vmul.f32 %v2975_v52, %v1777_v33  ;;  %1949 = vmatmul.mubr.bf16.gmra.mrb[4].mxu1 %v3177_v24 }
 0x35b   : > { %1991 = vmatprep.mubr.bf16.mxu1 %v3489_v4 }
 0x35c   : > { %v1796_v44 = vpack.c.bf16 %v1792_v32, %v1790_v35  ;;  %v1797_v7 = vpack.c.bf16 %v1793_v45, %v1791_v5 }
 0x35e   : > { %1961 = vmatprep.subr.bf16.mxu1 %v1797_v7 }
 0x35f   : > { %1962 = vmatpush1.bf16.msra.mxu1 %v1796_v44 }
 0x362   : > { %2982 = vmatmul.mubr.msk.bf16.vlgmr.msra.gmra.mrb[0].mxu1 %vm505_vm1, %v3178_v23 }
 0x363   : > { %2001 = vmatprep.mubr.bf16.mxu1 %v3489_v4 }
 0x368   : > { %v1853_v48 = vpop.permute.xlu1 %1852 }
 0x369   : > { %v1858_v47 = vpop.permute.xlu0 %1857 }
 0x36a   : > { %2983 = vmatmul.mubr.msk.bf16.gmra.mrb[4].mxu1 %vm505_vm1, %v3179_v55 }
 0x36b   : > { %2749 = vmatprep.mubr.bf16.mxu1 %v3489_v4 }
 0x36c   : > { %v1863_v37 = vpop.permute.xlu1 %1862 }
 0x36d   : > { %v1868_v43 = vpop.permute.xlu0 %1867 }
 0x435   : > { %v1993_v9 = vpop.f32.mrb[0].mxu1 }
 0x436   : > { %v3014_v21 = vadd.f32 %v1993_v9, %v1853_v48  ;;  %v1995_v57 = vpop.f32.mrb[1].mxu1 }
 0x437   : > { %v3015_v25 = vadd.f32 %v1995_v57, %v1853_v48  ;;  %v1997_v58 = vpop.f32.mrb[2].mxu1 }
 0x438   : > { %v2020_v42 = vmul.f32 1.442695, %v3014_v21  ;;  %v3016_v36 = vadd.f32 %v1997_v58, %v1858_v47  ;;  %v1999_v39 = vpop.f32.mrb[3].mxu1  ;;  %vm2012_vm7 = vcmp.gt.f32.partialorder %v3014_v21, 0.0 }
 0x439   : > { %v2022_v8 = vmul.f32 1.442695, %v3015_v25  ;;  %v3017_v40 = vadd.f32 %v1999_v39, %v1858_v47  ;;  %vm2013_vm8 = vcmp.gt.f32.partialorder %v3015_v25, 0.0  ;;  %v2605_v39 = vld [vmem:[%s5042_s22 + $0x8] sm:$0xff] }
 0x43a   : > { %3204 = vpow2.f32 %v2020_v42  ;;  %v2024_v53 = vmul.f32 1.442695, %v3016_v36  ;;  %vm2014_vm9 = vcmp.gt.f32.partialorder %v3016_v36, 0.0  ;;  %v2604_v42 = vld [vmem:[%s5042_s22] sm:$0xff] }
 0x43b   : > { %3206 = vpow2.f32 %v2022_v8  ;;  %v2026_v27 = vmul.f32 1.442695, %v3017_v40  ;;  %vm2015_vm13 = vcmp.gt.f32.partialorder %v3017_v40, 0.0 }
 0x43c   : > { %3208 = vpow2.f32 %v2024_v53 }
 0x43d   : > { %3210 = vpow2.f32 %v2026_v27  ;;  %v2003_v10 = vpop.f32.mrb[4].mxu1  ;;  %v2607_v27 = vld [vmem:[%s5042_s22 + $0x18] sm:$0xff] }
 0x43e   : > { %v3018_v51 = vadd.f32 %v2003_v10, %v1863_v37  ;;  %v2005_v41 = vpop.f32.mrb[5].mxu1 }
 0x43f   : > { %v3019_v34 = vadd.f32 %v2005_v41, %v1863_v37  ;;  %v2007_v38 = vpop.f32.mrb[6].mxu1  ;;  %v4615_v41 = vld [vmem:[#allocation11 + $0x8] sm:$0xff] }
 0x440   : > { %v2028_v46 = vmul.f32 1.442695, %v3018_v51  ;;  %v3020_v13 = vadd.f32 %v2007_v38, %v1868_v43  ;;  %v2009_v2 = vpop.f32.mrb[7].mxu1  ;;  %vm2016_vm14 = vcmp.gt.f32.partialorder %v3018_v51, 0.0  ;;  %v4623_v38 = vrot.slane %v4615_v41, %v3890_v22 }
 0x441   : > { %v2030_v50 = vmul.f32 1.442695, %v3019_v34  ;;  %v3021_v52 = vadd.f32 %v2009_v2, %v1868_v43  ;;  %vm2017_vm2 = vcmp.gt.f32.partialorder %v3019_v34, 0.0 }
 0x442   : > { %3212 = vpow2.f32 %v2028_v46  ;;  %v2032_v12 = vmul.f32 1.442695, %v3020_v13  ;;  %vm2018_vm4 = vcmp.gt.f32.partialorder %v3020_v13, 0.0 }
 0x443   : > { %3214 = vpow2.f32 %v2030_v50  ;;  %v2034_v17 = vmul.f32 1.442695, %v3021_v52 }
 0x444   : > { %v3205_v60 = vpop.eup %3204  ;;  %3216 = vpow2.f32 %v2032_v12  ;;  %v4633_v12 = vrot.slane %v4615_v41, %v3867_v11 }
 0x445   : > { %v3207_v61 = vpop.eup %3206  ;;  %v2984_v56 = vadd.f32 -1.0, %v3205_v60  ;;  %3218 = vpow2.f32 %v2034_v17 }
 0x446   : > { %v3209_v20 = vpop.eup %3208  ;;  %v2985_v29 = vadd.f32 -1.0, %v3207_v61 }
 0x447   : > { %v3211_v28 = vpop.eup %3210  ;;  %v4423_v14 = vsel %vm2012_vm7, %v3014_v21, %v2984_v56  ;;  %v2986_v63 = vadd.f32 -1.0, %v3209_v20  ;;  %vm2019_vm7 = vcmp.gt.f32.partialorder %v3021_v52, 0.0  ;;  %v3182_v21 = vld [vmem:[#allocation9 + $0x4] ss:$12 sps:$4 sm:$0xff]  }
 0x448   : > { %2052 = vst [vmem:[%s4060_s11 + $0x40] sm:$0xff] %v4423_v14  ;;  %v4427_v0 = vsel %vm2013_vm8, %v3015_v25, %v2985_v29  ;;  %v2987_v49 = vadd.f32 -1.0, %v3211_v28  ;;  %2084 = vrot.lane.b32.xlu1 %v4423_v14, %s3470_s28  ;;  %2696 = vmatprep.mubr.bf16.mxu0 %v3182_v21 }
 0x449   : > { %2053 = vst [vmem:[%s4060_s11 + $0x48] sm:$0xff] %v4427_v0  ;;  %v4433_v15 = vsel %vm2014_vm9, %v3016_v36, %v2986_v63  ;;  %2322 = vrot.lane.b32.xlu0 %v4427_v0, %s5038_s30 }
 0x44a   : > { %2054 = vst [vmem:[%s4060_s11 + $0x50] sm:$0xff] %v4433_v15  ;;  %v2312_v62 = vpack.c.bf16 %v4433_v15, %v4423_v14  ;;  %v4441_v16 = vsel %vm2015_vm13, %v3017_v40, %v2987_v49  ;;  %v2606_v40 = vld [vmem:[%s5042_s22 + $0x10] sm:$0xff] }
 0x44b   : > { %2055 = vst [vmem:[%s4060_s11 + $0x58] sm:$0xff] %v4441_v16  ;;  %v2313_v24 = vpack.c.bf16 %v4441_v16, %v4427_v0 }
 0x44c   : > { %v3213_v3 = vpop.eup %3212  ;;  %2144 = vrot.lane.b32.xlu1 %v4423_v14, %s5039_s25 }
 0x44d   : > { %v3215_v59 = vpop.eup %3214  ;;  %v2988_v1 = vadd.f32 -1.0, %v3213_v3  ;;  %2382 = vrot.lane.b32.xlu0 %v4427_v0, %s5035_s21 }
 0x44e   : > { %v3217_v26 = vpop.eup %3216  ;;  %v2989_v30 = vadd.f32 -1.0, %v3215_v59 }
 0x44f   : > { %v3219_v33 = vpop.eup %3218  ;;  %v4451_v35 = vsel %vm2016_vm14, %v3018_v51, %v2988_v1  ;;  %v2990_v5 = vadd.f32 -1.0, %v3217_v26  ;;  %v4613_v51 = vld [vmem:[#allocation11] sm:$0xff] }
 0x450   : > { %2056 = vst [vmem:[%s4060_s11 + $0x60] sm:$0xff] %v4451_v35  ;;  %v4455_v32 = vsel %vm2017_vm2, %v3019_v34, %v2989_v30  ;;  %v2991_v45 = vadd.f32 -1.0, %v3219_v33  ;;  %2204 = vrot.lane.b32.xlu1 %v4423_v14, %s5040_s26  ;;  %v4619_v34 = vrot.slane %v4613_v51, %v3890_v22  ;;  %v4643_v28 = vrot.slane %v4613_v51, %v3884_v18 }
 0x451   : > { %2057 = vst [vmem:[%s4060_s11 + $0x68] sm:$0xff] %v4455_v32  ;;  %v4461_v44 = vsel %vm2018_vm4, %v3020_v13, %v2990_v5  ;;  %2086 = vrot.lane.b32.xlu0 %v4433_v15, %s3470_s28  ;;  %v4659_v21 = vrot.slane %v4613_v51, %v3887_v19 }
 0x452   : > { %2058 = vst [vmem:[%s4060_s11 + $0x70] sm:$0xff] %v4461_v44  ;;  %v2314_v7 = vpack.c.bf16 %v4461_v44, %v4451_v35  ;;  %v4469_v23 = vsel %vm2019_vm7, %v3021_v52, %v2991_v45  ;;  %v4629_v52 = vrot.slane %v4613_v51, %v3867_v11  ;;  %v4647_v11 = vrot.slane %v4615_v41, %v3884_v18 }
 0x453   : > { %2059 = vst [vmem:[%s4060_s11 + $0x78] sm:$0xff] %v4469_v23  ;;  %v2315_v55 = vpack.c.bf16 %v4469_v23, %v4455_v32 }
 0x454   : > { %2264 = vrot.lane.b32.xlu1 %v4423_v14, %s5041_s17 }
 0x455   : > { %2146 = vrot.lane.b32.xlu0 %v4433_v15, %s5039_s25 }
 0x458   : > { %2320 = vrot.lane.b32.xlu1 %v4423_v14, %s5038_s30 }
 0x459   : > { %2206 = vrot.lane.b32.xlu0 %v4433_v15, %s5040_s26 }
 0x45c   : > { %2380 = vrot.lane.b32.xlu1 %v4423_v14, %s5035_s21 }
 0x45d   : > { %2266 = vrot.lane.b32.xlu0 %v4433_v15, %s5041_s17 }
 0x460   : > { %2068 = vrot.lane.b32.xlu1 %v4427_v0, %s3470_s28 }
 0x461   : > { %2070 = vrot.lane.b32.xlu0 %v4441_v16, %s3470_s28 }
 0x464   : > { %2132 = vrot.lane.b32.xlu1 %v4427_v0, %s5039_s25 }
 0x465   : > { %2134 = vrot.lane.b32.xlu0 %v4441_v16, %s5039_s25 }
 0x468   : > { %2192 = vrot.lane.b32.xlu1 %v4427_v0, %s5040_s26 }
 0x469   : > { %2194 = vrot.lane.b32.xlu0 %v4441_v16, %s5040_s26 }
 0x46c   : > { %2252 = vrot.lane.b32.xlu1 %v4427_v0, %s5041_s17 }
 0x46d   : > { %2254 = vrot.lane.b32.xlu0 %v4441_v16, %s5041_s17 }
 0x470   : > { %2324 = vrot.lane.b32.xlu1 %v4433_v15, %s5038_s30 }
 0x471   : > { %2326 = vrot.lane.b32.xlu0 %v4441_v16, %s5038_s30 }
 0x474   : > { %2088 = vrot.lane.b32.xlu1 %v4451_v35, %s3470_s28 }
 0x475   : > { %2330 = vrot.lane.b32.xlu0 %v4455_v32, %s5038_s30 }
 0x478   : > { %2148 = vrot.lane.b32.xlu1 %v4451_v35, %s5039_s25 }
 0x479   : > { %2090 = vrot.lane.b32.xlu0 %v4461_v44, %s3470_s28 }
 0x47c   : > { %2208 = vrot.lane.b32.xlu1 %v4451_v35, %s5040_s26 }
 0x47d   : > { %2150 = vrot.lane.b32.xlu0 %v4461_v44, %s5039_s25 }
 0x480   : > { %2268 = vrot.lane.b32.xlu1 %v4451_v35, %s5041_s17 }
 0x481   : > { %2210 = vrot.lane.b32.xlu0 %v4461_v44, %s5040_s26 }
 0x484   : > { %2328 = vrot.lane.b32.xlu1 %v4451_v35, %s5038_s30 }
 0x485   : > { %2270 = vrot.lane.b32.xlu0 %v4461_v44, %s5041_s17 }
 0x488   : > { %2072 = vrot.lane.b32.xlu1 %v4455_v32, %s3470_s28 }
 0x489   : > { %2074 = vrot.lane.b32.xlu0 %v4469_v23, %s3470_s28 }
 0x48c   : > { %2384 = vrot.lane.b32.xlu1 %v4433_v15, %s5035_s21 }
 0x48d   : > { %2386 = vrot.lane.b32.xlu0 %v4441_v16, %s5035_s21 }
 0x490   : > { %2136 = vrot.lane.b32.xlu1 %v4455_v32, %s5039_s25 }
 0x491   : > { %2138 = vrot.lane.b32.xlu0 %v4469_v23, %s5039_s25 }
 0x494   : > { %2196 = vrot.lane.b32.xlu1 %v4455_v32, %s5040_s26 }
 0x495   : > { %2390 = vrot.lane.b32.xlu0 %v4455_v32, %s5035_s21 }
 0x498   : > { %2256 = vrot.lane.b32.xlu1 %v4455_v32, %s5041_s17 }
 0x499   : > { %2198 = vrot.lane.b32.xlu0 %v4469_v23, %s5040_s26  ;;  %s3047_s26 = smul.u32 3072, %s3568_s19 }
 0x49c   : > { %2332 = vrot.lane.b32.xlu1 %v4461_v44, %s5038_s30 }
 0x49d   : > { %2442 = vrot.lane.b32.xlu0 %v4427_v0, %s5036_s20 }
 0x4a0   : > { %2388 = vrot.lane.b32.xlu1 %v4451_v35, %s5035_s21 }
 0x4a1   : > { %2258 = vrot.lane.b32.xlu0 %v4469_v23, %s5041_s17  ;;  %s2832_s17 = sshll.u32 %s4060_s11, 4  ;;  %s4940_s17 = int_to_ptr.vmem [resolvable:$true] %s2832_s17 }
 0x4a4   : > { %2392 = vrot.lane.b32.xlu1 %v4461_v44, %s5035_s21 }
 0x4a5   : > { %2446 = vrot.lane.b32.xlu0 %v4441_v16, %s5036_s20 }
 0x4a8   : > { %2440 = vrot.lane.b32.xlu1 %v4423_v14, %s5036_s20 }
 0x4a9   : > { %2502 = vrot.lane.b32.xlu0 %v4427_v0, %s5037_s8 }
 0x4ac   : > { %2444 = vrot.lane.b32.xlu1 %v4433_v15, %s5036_s20 }
 0x4ad   : > { %2506 = vrot.lane.b32.xlu0 %v4441_v16, %s5037_s8 }
 0x4b0   : > { %2500 = vrot.lane.b32.xlu1 %v4423_v14, %s5037_s8 }
 0x4b1   : > { %2334 = vrot.lane.b32.xlu0 %v4469_v23, %s5038_s30 }
 0x4b4   : > { %2504 = vrot.lane.b32.xlu1 %v4433_v15, %s5037_s8 }
 0x4b5   : > { %2450 = vrot.lane.b32.xlu0 %v4455_v32, %s5036_s20 }
 0x4b8   : > { %2448 = vrot.lane.b32.xlu1 %v4451_v35, %s5036_s20 }
 0x4b9   : > { %2394 = vrot.lane.b32.xlu0 %v4469_v23, %s5035_s21  ;;  %s5043_s21 = sld [smem:[#allocation19_spill]] }
 0x4ba   : > { %v2085_v48 = vpop.permute.xlu1 %2084 }
 0x4bb   : > { %v4579_v9 = vpop.permute.xlu0 %2322 }
 0x4bc   : > { %2452 = vrot.lane.b32.xlu1 %v4461_v44, %s5036_s20 }
 0x4bd   : > { %2510 = vrot.lane.b32.xlu0 %v4455_v32, %s5037_s8 }
 0x4be   : > { %v2145_v57 = vpop.permute.xlu1 %2144 }
 0x4bf   : > { %v4585_v47 = vpop.permute.xlu0 %2382  ;;  %s4937_s24 = scalar_lea.hbm %s5043_s21, %s3047_s26 }
 0x4c0   : > { %2508 = vrot.lane.b32.xlu1 %v4451_v35, %s5037_s8 }
 0x4c1   : > { %2454 = vrot.lane.b32.xlu0 %v4469_v23, %s5036_s20  ;;  %s3378_s20 = scalar_lea.vmem %s4940_s17, 3072 }
 0x4c2   : > { %v2205_v25 = vpop.permute.xlu1 %2204  ;;  %p3379_p6 = scmp.ne.s32.totalorder %s4940_s17, %s3378_s20 }
 0x4c3   : > { %v2087_v58 = vpop.permute.xlu0 %2086 }
 0x4c4   : > { %2512 = vrot.lane.b32.xlu1 %v4461_v44, %s5037_s8  ;;  %p3380_p2 = pnand %p3379_p6, %p5044_p0 }
 0x4c5   : > { %2514 = vrot.lane.b32.xlu0 %v4469_v23, %s5037_s8  ;;  %s3382_s8 = sshll.u32 %s3490_s18, 4  ;;  %s3383_s8 = int_to_ptr.vmem [resolvable:$false] %s3382_s8 }
 0x4c6   : > { %v4598_v36 = vpop.permute.xlu1 %2264  ;;  %p3381_p5 = pneg %p3380_p2  ;;  %s3384_s30 = scalar_lea.vmem %s3383_s8, 6144 }
 0x4c7   : > { %v2147_v8 = vpop.permute.xlu0 %2146  ;;  %p3385_p10 = scmp.lt.s32.totalorder %s4940_s17, %s3383_s8  ;;  %p3386_p1 = scmp.lt.s32.totalorder %s3384_s30, %s3378_s20 }
 0x4c8   : > { %2610 = vperm.xlu1 %3168, %v2604_v42  }
 0x4c9   : > { %2615 = vperm.xlu0 %3167, %v2605_v39   ;;  %p3387_p11 = por %p3386_p1, %p3385_p10 }
 0x4ca   : > { %v4606_v53 = vpop.permute.xlu1 %2320 }
 0x4cb   : > { %v2207_v37 = vpop.permute.xlu0 %2206  ;;  %p3388_p12 = pnand %p3387_p11, %p3381_p5 }
 0x4cc   : > { %2620 = vperm.xlu1 %3168, %v2606_v40  }
 0x4cd   : > { %2625 = vperm.xlu0 %3167, %v2607_v27  }
 0x4ce   : > { %v4611_v10 = vpop.permute.xlu1 %2380 }
 0x4cf   : > { %v2267_v43 = vpop.permute.xlu0 %2266 }
 0x4d2   : > { %v2069_v46 = vpop.permute.xlu1 %2068 }
 0x4d3   : > { %v2092_v13 = vsel %vm619_vm5, %v2085_v48, %v2069_v46  ;;  %v2104_v2 = vsel %vm619_vm5, %v2069_v46, %v2085_v48  ;;  %v2071_v50 = vpop.permute.xlu0 %2070 }
 0x4d4   : > { %v2116_v17 = vmul.f32 %v4619_v34, %v2104_v2  ;;  %v2117_v60 = vmul.f32 %v4623_v38, %v2092_v13  ;;  %v2093_v22 = vsel %vm619_vm5, %v2087_v58, %v2071_v50  ;;  %v2105_v61 = vsel %vm619_vm5, %v2071_v50, %v2087_v58 }
 0x4d5   : > { %v2118_v56 = vmul.f32 %v4619_v34, %v2105_v61  ;;  %v2119_v20 = vmul.f32 %v4623_v38, %v2093_v22 }
 0x4d6   : > { %v2133_v29 = vpop.permute.xlu1 %2132 }
 0x4d7   : > { %v2124_v63 = vpack.c.bf16 %v2118_v56, %v2116_v17  ;;  %v2125_v49 = vpack.c.bf16 %v2119_v20, %v2117_v60  ;;  %v2152_v3 = vsel %vm649_vm6, %v2145_v57, %v2133_v29  ;;  %v2164_v59 = vsel %vm649_vm6, %v2133_v29, %v2145_v57  ;;  %v2135_v1 = vpop.permute.xlu0 %2134 }
 0x4d8   : > { %v2176_v26 = vmul.f32 %v4629_v52, %v2164_v59  ;;  %v2177_v30 = vmul.f32 %v4633_v12, %v2152_v3  ;;  %v2153_v33 = vsel %vm649_vm6, %v2147_v8, %v2135_v1  ;;  %v2165_v5 = vsel %vm649_vm6, %v2135_v1, %v2147_v8 }
 0x4d9   : > { %2128 = vst [vmem:[#allocation2] sm:$0xff] %v2124_v63  ;;  %2129 = vst [vmem:[#allocation2 + $0x8] sm:$0xff] %v2125_v49  ;;  %v2178_v18 = vmul.f32 %v4629_v52, %v2165_v5  ;;  %v2179_v45 = vmul.f32 %v4633_v12, %v2153_v33  ;;  %2664 = vmatprep.subr.bf16.mxu0 %v2125_v49  ;;  %v4663_v57 = vrot.slane %v4615_v41, %v3887_v19 }
 0x4da   : > { %v2193_v48 = vpop.permute.xlu1 %2192  ;;  %2665 = vmatpush1.bf16.msra.mxu0 %v2124_v63  ;;  %v4693_v49 = vrot.slane %v4613_v51, %v3901_v31  ;;  %v4697_v3 = vrot.slane %v4615_v41, %v3901_v31  ;;  %v2352_v1 = vsel %vm797_vm12, %v4579_v9, %v4606_v53 }
 0x4db   : > { %v4665_v58 = vpack.c.bf16 %v2178_v18, %v2176_v26  ;;  %v4667_v42 = vpack.c.bf16 %v2179_v45, %v2177_v30  ;;  %v2212_v39 = vsel %vm679_vm11, %v2205_v25, %v2193_v48  ;;  %v2224_v8 = vsel %vm679_vm11, %v2193_v48, %v2205_v25  ;;  %v2195_v40 = vpop.permute.xlu0 %2194 }
 0x4dc   : > { %v2236_v27 = vmul.f32 %v4643_v28, %v2224_v8  ;;  %v2237_v46 = vmul.f32 %v4647_v11, %v2212_v39  ;;  %v2213_v13 = vsel %vm679_vm11, %v2207_v37, %v2195_v40  ;;  %v2225_v2 = vsel %vm679_vm11, %v2195_v40, %v2207_v37 }
 0x4dd   : > { %2188 = vst [vmem:[#allocation2 + $0x20] sm:$0xff] %v4665_v58  ;;  %2189 = vst [vmem:[#allocation2 + $0x28] sm:$0xff] %v4667_v42  ;;  %v2238_v19 = vmul.f32 %v4643_v28, %v2225_v2  ;;  %v2239_v50 = vmul.f32 %v4647_v11, %v2213_v13  ;;  %v4719_v48 = vmul.f32 %v4697_v3, %v2352_v1 }
 0x4de   : > { %v2253_v17 = vpop.permute.xlu1 %2252  ;;  %v4749_v1 = vrot.slane %v4613_v51, %v3916_v54 }
 0x4df   : > { %v4679_v60 = vpack.c.bf16 %v2238_v19, %v2236_v27  ;;  %v4681_v25 = vpack.c.bf16 %v2239_v50, %v2237_v46  ;;  %v2272_v22 = vsel %vm763_vm10, %v4598_v36, %v2253_v17  ;;  %v2284_v61 = vsel %vm763_vm10, %v2253_v17, %v4598_v36  ;;  %v2255_v37 = vpop.permute.xlu0 %2254 }
 0x4e0   : > { %v2296_v56 = vmul.f32 %v4659_v21, %v2284_v61  ;;  %v2297_v20 = vmul.f32 %v4663_v57, %v2272_v22  ;;  %v2273_v29 = vsel %vm763_vm10, %v2267_v43, %v2255_v37  ;;  %v2285_v63 = vsel %vm763_vm10, %v2255_v37, %v2267_v43 }
 0x4e1   : > { %2248 = vst [vmem:[#allocation2 + $0x40] sm:$0xff] %v4679_v60  ;;  %2249 = vst [vmem:[#allocation2 + $0x48] sm:$0xff] %v4681_v25  ;;  %v2298_v36 = vmul.f32 %v4659_v21, %v2285_v63  ;;  %v2299_v59 = vmul.f32 %v4663_v57, %v2273_v29  ;;  %v2336_v43 = vsel %vm797_vm12, %v4606_v53, %v4579_v9 }
 0x4e2   : > { %v2325_v26 = vpop.permute.xlu1 %2324  ;;  %v4716_v45 = vmul.f32 %v4693_v49, %v2336_v43 }
 0x4e3   : > { %v4709_v30 = vpack.c.bf16 %v2298_v36, %v2296_v56  ;;  %v4711_v31 = vpack.c.bf16 %v2299_v59, %v2297_v20  ;;  %v2327_v33 = vpop.permute.xlu0 %2326 }
 0x4e4   : > { %v2337_v5 = vsel %vm797_vm12, %v2325_v26, %v2327_v33  ;;  %v2353_v18 = vsel %vm797_vm12, %v2327_v33, %v2325_v26  ;;  %v4753_v26 = vrot.slane %v4615_v41, %v3916_v54 }
 0x4e5   : > { %2308 = vst [vmem:[#allocation2 + $0x60] sm:$0xff] %v4709_v30  ;;  %2309 = vst [vmem:[#allocation2 + $0x68] sm:$0xff] %v4711_v31  ;;  %v4724_v9 = vmul.f32 %v4693_v49, %v2337_v5  ;;  %v4727_v53 = vmul.f32 %v4697_v3, %v2353_v18  ;;  %v2396_v18 = vsel %vm887_vm3, %v4611_v10, %v4585_v47 }
 0x4e6   : > { %v2089_v39 = vpop.permute.xlu1 %2088 }
 0x4e7   : > { %v2372_v8 = vpack.c.bf16 %v4724_v9, %v4716_v45  ;;  %v2373_v40 = vpack.c.bf16 %v4727_v53, %v4719_v48  ;;  %v4733_v27 = vpop.permute.xlu0 %2330 }
 0x4ea   : > { %v2149_v46 = vpop.permute.xlu1 %2148 }
 0x4eb   : > { %v2091_v13 = vpop.permute.xlu0 %2090 }
 0x4ee   : > { %v2209_v2 = vpop.permute.xlu1 %2208 }
 0x4ef   : > { %v2151_v19 = vpop.permute.xlu0 %2150 }
 0x4f2   : > { %v4735_v50 = vpop.permute.xlu1 %2268 }
 0x4f3   : > { %v2211_v17 = vpop.permute.xlu0 %2210 }
 0x4f6   : > { %v4737_v22 = vpop.permute.xlu1 %2328 }
 0x4f7   : > { %v4739_v61 = vpop.permute.xlu0 %2270  ;;  %v2338_v15 = vsel %vm797_vm12, %v4737_v22, %v4733_v27 }
 0x4fa   : > { %v2073_v37 = vpop.permute.xlu1 %2072 }
 0x4fb   : > { %v2094_v56 = vsel %vm619_vm5, %v2089_v39, %v2073_v37  ;;  %v2106_v20 = vsel %vm619_vm5, %v2073_v37, %v2089_v39  ;;  %v2075_v29 = vpop.permute.xlu0 %2074  ;;  %v2412_v39 = vsel %vm887_vm3, %v4585_v47, %v4611_v10 }
 0x4fc   : > { %v2120_v63 = vmul.f32 %v4619_v34, %v2106_v20  ;;  %v2121_v36 = vmul.f32 %v4623_v38, %v2094_v56  ;;  %v2095_v59 = vsel %vm619_vm5, %v2091_v13, %v2075_v29  ;;  %v2107_v43 = vsel %vm619_vm5, %v2075_v29, %v2091_v13 }
 0x4fd   : > { %v2122_v33 = vmul.f32 %v4619_v34, %v2107_v43  ;;  %v2123_v5 = vmul.f32 %v4623_v38, %v2095_v59  ;;  %v4766_v34 = vmul.f32 %v4749_v1, %v2396_v18  ;;  %v4769_v38 = vmul.f32 %v4753_v26, %v2412_v39 }
 0x4fe   : > { %v2385_v13 = vpop.permute.xlu1 %2384 }
 0x4ff   : > { %v2126_v37 = vpack.c.bf16 %v2122_v33, %v2120_v63  ;;  %v2127_v56 = vpack.c.bf16 %v2123_v5, %v2121_v36  ;;  %v2387_v20 = vpop.permute.xlu0 %2386 }
 0x500   : > { %v2397_v29 = vsel %vm887_vm3, %v2385_v13, %v2387_v20  ;;  %v2413_v54 = vsel %vm887_vm3, %v2387_v20, %v2385_v13 }
 0x501   : > { %2130 = vst [vmem:[#allocation2 + $0x10] sm:$0xff] %v2126_v37  ;;  %2131 = vst [vmem:[#allocation2 + $0x18] sm:$0xff] %v2127_v56  ;;  %v4772_v59 = vmul.f32 %v4749_v1, %v2397_v29  ;;  %v4775_v47 = vmul.f32 %v4753_v26, %v2413_v54  ;;  %2666 = vmatprep.subr.bf16.mxu0 %v2127_v56 }
 0x502   : > { %v2137_v10 = vpop.permute.xlu1 %2136  ;;  %2667 = vmatpush1.bf16.msra.mxu0 %v2126_v37 }
 0x503   : > { %v2432_v63 = vpack.c.bf16 %v4772_v59, %v4766_v34  ;;  %v2433_v36 = vpack.c.bf16 %v4775_v47, %v4769_v38  ;;  %v2154_v43 = vsel %vm649_vm6, %v2149_v46, %v2137_v10  ;;  %v2166_v33 = vsel %vm649_vm6, %v2137_v10, %v2149_v46  ;;  %v2139_v5 = vpop.permute.xlu0 %2138  ;;  %2668 = vmatprep.subr.bf16.mxu0 %v4667_v42 }
 0x504   : > { %v2180_v18 = vmul.f32 %v4629_v52, %v2166_v33  ;;  %v2181_v39 = vmul.f32 %v4633_v12, %v2154_v43  ;;  %v2155_v13 = vsel %vm649_vm6, %v2151_v19, %v2139_v5  ;;  %v2167_v37 = vsel %vm649_vm6, %v2139_v5, %v2151_v19 }
 0x505   : > { %v2182_v56 = vmul.f32 %v4629_v52, %v2167_v37  ;;  %v2183_v20 = vmul.f32 %v4633_v12, %v2155_v13 }
 0x506   : > { %v2197_v29 = vpop.permute.xlu1 %2196  ;;  %2669 = vmatpush1.bf16.msra.mxu0 %v4665_v58 }
 0x507   : > { %v2186_v54 = vpack.c.bf16 %v2182_v56, %v2180_v18  ;;  %v2187_v46 = vpack.c.bf16 %v2183_v20, %v2181_v39  ;;  %v4791_v10 = vpop.permute.xlu0 %2390  ;;  %v2214_v42 = vsel %vm679_vm11, %v2209_v2, %v2197_v29  ;;  %v2226_v43 = vsel %vm679_vm11, %v2197_v29, %v2209_v2 }
 0x508   : > { %v2240_v58 = vmul.f32 %v4643_v28, %v2226_v43  ;;  %v2241_v5 = vmul.f32 %v4647_v11, %v2214_v42 }
 0x509   : > { %2190 = vst [vmem:[#allocation2 + $0x30] sm:$0xff] %v2186_v54  ;;  %2191 = vst [vmem:[#allocation2 + $0x38] sm:$0xff] %v2187_v46  ;;  %2670 = vmatprep.subr.bf16.mxu0 %v2187_v46 }
 0x50a   : > { %v2257_v33 = vpop.permute.xlu1 %2256  ;;  %2671 = vmatpush1.bf16.msra.mxu0 %v2186_v54 }
 0x50b   : > { %v2199_v19 = vpop.permute.xlu0 %2198  ;;  %2672 = vmatprep.subr.bf16.mxu0 %v4681_v25  ;;  %v2274_v25 = vsel %vm763_vm10, %v4735_v50, %v2257_v33 }
 0x50c   : > { %v2215_v52 = vsel %vm679_vm11, %v2211_v17, %v2199_v19  ;;  %v2227_v12 = vsel %vm679_vm11, %v2199_v19, %v2211_v17  ;;  %v2286_v17 = vsel %vm763_vm10, %v2257_v33, %v4735_v50  ;;  %v2301_v54 = vmul.f32 %v4663_v57, %v2274_v25 }
 0x50d   : > { %v2242_v18 = vmul.f32 %v4643_v28, %v2227_v12  ;;  %v2243_v39 = vmul.f32 %v4647_v11, %v2215_v52  ;;  %v2300_v29 = vmul.f32 %v4659_v21, %v2286_v17 }
 0x50e   : > { %v2333_v13 = vpop.permute.xlu1 %2332  ;;  %2673 = vmatpush1.bf16.msra.mxu0 %v4679_v60 }
 0x50f   : > { %v2246_v2 = vpack.c.bf16 %v2242_v18, %v2240_v58  ;;  %v2247_v37 = vpack.c.bf16 %v2243_v39, %v2241_v5  ;;  %v2443_v56 = vpop.permute.xlu0 %2442  ;;  %v2368_v5 = vmul.f32 %v4693_v49, %v2338_v15  ;;  %v4868_v39 = vld [vmem:[#allocation11 + $0x10] ss:$0 sm:$0xff] }
 0x511   : > { %2250 = vst [vmem:[#allocation2 + $0x50] sm:$0xff] %v2246_v2  ;;  %2251 = vst [vmem:[#allocation2 + $0x58] sm:$0xff] %v2247_v37  ;;  %2674 = vmatprep.subr.bf16.mxu0 %v2247_v37 }
 0x512   : > { %v4807_v20 = vpop.permute.xlu1 %2388  ;;  %2675 = vmatpush1.bf16.msra.mxu0 %v2246_v2  ;;  %v4870_v2 = vld [vmem:[#allocation11 + $0x18] ss:$0 sm:$0xff] }
 0x513   : > { %v2259_v28 = vpop.permute.xlu0 %2258  ;;  %2676 = vmatprep.subr.bf16.mxu0 %v4711_v31  ;;  %v2398_v45 = vsel %vm887_vm3, %v4807_v20, %v4791_v10  ;;  %v2414_v9 = vsel %vm887_vm3, %v4791_v10, %v4807_v20 }
 0x514   : > { %v2275_v11 = vsel %vm763_vm10, %v4739_v61, %v2259_v28  ;;  %v2287_v60 = vsel %vm763_vm10, %v2259_v28, %v4739_v61  ;;  %v2429_v10 = vmul.f32 %v4753_v26, %v2414_v9 }
 0x515   : > { %v2302_v46 = vmul.f32 %v4659_v21, %v2287_v60  ;;  %v2303_v50 = vmul.f32 %v4663_v57, %v2275_v11  ;;  %v4826_v21 = vrot.slane %v4613_v51, %v3921_v6  ;;  %v4830_v57 = vrot.slane %v4615_v41, %v3921_v6 }
 0x516   : > { %v4818_v42 = vpop.permute.xlu1 %2392  ;;  %2677 = vmatpush1.bf16.msra.mxu0 %v4709_v30 }
 0x517   : > { %v2306_v43 = vpack.c.bf16 %v2302_v46, %v2300_v29  ;;  %v2307_v31 = vpack.c.bf16 %v2303_v50, %v2301_v54  ;;  %v2447_v33 = vpop.permute.xlu0 %2446  ;;  %v2428_v50 = vmul.f32 %v4749_v1, %v2398_v45 }
 0x519   : > { %2678 = vmatprep.subr.bf16.mxu0 %v2307_v31 }
 0x51a   : > { %v2441_v19 = vpop.permute.xlu1 %2440  ;;  %2679 = vmatpush1.bf16.msra.mxu0 %v2306_v43 }
 0x51b   : > { %v2503_v52 = vpop.permute.xlu0 %2502  ;;  %2680 = vmatprep.subr.bf16.mxu0 %v2313_v24  ;;  %v2456_v30 = vsel %vm911_vm15, %v2441_v19, %v2443_v56  ;;  %v2472_v61 = vsel %vm911_vm15, %v2443_v56, %v2441_v19 }
 0x51c   : > { %v4843_v6 = vmul.f32 %v4826_v21, %v2456_v30  ;;  %v2485_v51 = vmul.f32 %v4830_v57, %v2472_v61 }
 0x51e   : > { %v2445_v12 = vpop.permute.xlu1 %2444  ;;  %2681 = vmatpush1.bf16.msra.mxu0 %v2312_v62  ;;  %v2354_v62 = vsel %vm797_vm12, %v4733_v27, %v4737_v22 }
 0x51f   : > { %v2457_v0 = vsel %vm911_vm15, %v2445_v12, %v2447_v33  ;;  %v2473_v16 = vsel %vm911_vm15, %v2447_v33, %v2445_v12  ;;  %v2507_v24 = vpop.permute.xlu0 %2506  ;;  %2682 = vmatprep.subr.bf16.mxu0 %v2315_v55  ;;  %v2369_v18 = vmul.f32 %v4697_v3, %v2354_v62 }
 0x520   : > { %v4847_v41 = vmul.f32 %v4826_v21, %v2457_v0  ;;  %v2487_v14 = vmul.f32 %v4830_v57, %v2473_v16 }
 0x522   : > { %v2492_v32 = vpack.c.bf16 %v4847_v41, %v4843_v6  ;;  %v2493_v23 = vpack.c.bf16 %v2487_v14, %v2485_v51  ;;  %v2501_v55 = vpop.permute.xlu1 %2500  ;;  %2683 = vmatpush1.bf16.msra.mxu0 %v2314_v7  ;;  %v3184_v6 = vld [vmem:[#allocation9 + $0x1c] ss:$12 sps:$4 sm:$0xff]  }
 0x523   : > { %v2335_v58 = vpop.permute.xlu0 %2334  ;;  %2684 = vmatprep.subr.bf16.mxu0 %v2373_v40  ;;  %v2516_v35 = vsel %vm941_vm0, %v2501_v55, %v2503_v52  ;;  %v2532_v44 = vsel %vm941_vm0, %v2503_v52, %v2501_v55  ;;  %v3180_v55 = vld [vmem:[#allocation9] ss:$12 sps:$4 sm:$0xff]  }
 0x524   : > { %v2339_v27 = vsel %vm797_vm12, %v2333_v13, %v2335_v58  ;;  %v2355_v22 = vsel %vm797_vm12, %v2335_v58, %v2333_v13  ;;  %v2544_v17 = vmul.f32 %v4868_v39, %v2516_v35  ;;  %v2545_v28 = vmul.f32 %v4870_v2, %v2532_v44  ;;  %v3183_v58 = vld [vmem:[#allocation9 + $0x8] ss:$12 sps:$4 sm:$0xff]  }
 0x525   : > { %v2370_v7 = vmul.f32 %v4693_v49, %v2339_v27  ;;  %v2371_v48 = vmul.f32 %v4697_v3, %v2355_v22 }
 0x526   : > { %v2505_v53 = vpop.permute.xlu1 %2504  ;;  %2685 = vmatpush1.bf16.msra.mxu0 %v2372_v8 }
 0x527   : > { %v2374_v40 = vpack.c.bf16 %v2370_v7, %v2368_v5  ;;  %v2375_v37 = vpack.c.bf16 %v2371_v48, %v2369_v18  ;;  %v2517_v13 = vsel %vm941_vm0, %v2505_v53, %v2507_v24  ;;  %v2533_v56 = vsel %vm941_vm0, %v2507_v24, %v2505_v53  ;;  %v2451_v25 = vpop.permute.xlu0 %2450  ;;  %v3186_v5 = vld [vmem:[#allocation9 + $0x18] ss:$12 sps:$4 sm:$0xff]   ;;  %v3187_v18 = vld [vmem:[#allocation9 + $0x20] ss:$12 sps:$4 sm:$0xff]  }
 0x528   : > { %v2546_v49 = vmul.f32 %v4868_v39, %v2517_v13  ;;  %v2547_v3 = vmul.f32 %v4870_v2, %v2533_v56 }
 0x529   : > { %2686 = vmatprep.subr.bf16.mxu0 %v2375_v37 }
 0x52a   : > { %v2552_v8 = vpack.c.bf16 %v2546_v49, %v2544_v17  ;;  %v2553_v11 = vpack.c.bf16 %v2547_v3, %v2545_v28  ;;  %v2449_v60 = vpop.permute.xlu1 %2448  ;;  %2687 = vmatpush1.bf16.msra.mxu0 %v2374_v40 }
 0x52b   : > { %v2395_v29 = vpop.permute.xlu0 %2394  ;;  %2688 = vmatprep.subr.bf16.mxu0 %v2433_v36  ;;  %v2474_v33 = vsel %vm911_vm15, %v2451_v25, %v2449_v60 }
 0x52c   : > { %v2399_v54 = vsel %vm887_vm3, %v4818_v42, %v2395_v29  ;;  %v2415_v46 = vsel %vm887_vm3, %v2395_v29, %v4818_v42  ;;  %2717 = vmatprep.subr.bf16.mxu1 %v2553_v11  ;;  %v2458_v42 = vsel %vm911_vm15, %v2449_v60, %v2451_v25  ;;  %v2489_v34 = vmul.f32 %v4830_v57, %v2474_v33 }
 0x52d   : > { %v2430_v20 = vmul.f32 %v4749_v1, %v2399_v54  ;;  %v2431_v43 = vmul.f32 %v4753_v26, %v2415_v46  ;;  %2718 = vmatpush1.bf16.msra.mxu1 %v2552_v8  ;;  %v2488_v30 = vmul.f32 %v4826_v21, %v2458_v42 }
 0x52e   : > { %v2453_v31 = vpop.permute.xlu1 %2452  ;;  %2689 = vmatpush1.bf16.msra.mxu0 %v2432_v63 }
 0x52f   : > { %v2434_v38 = vpack.c.bf16 %v2430_v20, %v2428_v50  ;;  %v2435_v47 = vpack.c.bf16 %v2431_v43, %v2429_v10  ;;  %v2511_v36 = vpop.permute.xlu0 %2510 }
 0x531   : > { %2690 = vmatprep.subr.bf16.mxu0 %v2435_v47 }
 0x532   : > { %v2509_v19 = vpop.permute.xlu1 %2508  ;;  %2691 = vmatpush1.bf16.msra.mxu0 %v2434_v38 }
 0x533   : > { %v2455_v52 = vpop.permute.xlu0 %2454  ;;  %2692 = vmatprep.subr.bf16.mxu0 %v2493_v23  ;;  %v2518_v61 = vsel %vm941_vm0, %v2509_v19, %v2511_v36  ;;  %v2534_v12 = vsel %vm941_vm0, %v2511_v36, %v2509_v19 }
 0x534   : > { %v2459_v1 = vsel %vm911_vm15, %v2453_v31, %v2455_v52  ;;  %v2475_v26 = vsel %vm911_vm15, %v2455_v52, %v2453_v31 }
 0x535   : > { %v2490_v59 = vmul.f32 %v4826_v21, %v2459_v1  ;;  %v2491_v63 = vmul.f32 %v4830_v57, %v2475_v26  ;;  %v2548_v21 = vmul.f32 %v4868_v39, %v2518_v61  ;;  %v2549_v57 = vmul.f32 %v4870_v2, %v2534_v12 }
 0x536   : > { %v2513_v0 = vpop.permute.xlu1 %2512  ;;  %2693 = vmatpush1.bf16.msra.mxu0 %v2492_v32 }
 0x537   : > { %v2494_v16 = vpack.c.bf16 %v2490_v59, %v2488_v30  ;;  %v2495_v24 = vpack.c.bf16 %v2491_v63, %v2489_v34  ;;  %v2515_v51 = vpop.permute.xlu0 %2514 }
 0x538   : > { %v2519_v14 = vsel %vm941_vm0, %v2513_v0, %v2515_v51  ;;  %v2535_v15 = vsel %vm941_vm0, %v2515_v51, %v2513_v0 }
 0x539   : > { %v2550_v62 = vmul.f32 %v4868_v39, %v2519_v14  ;;  %v2551_v23 = vmul.f32 %v4870_v2, %v2535_v15  ;;  %2694 = vmatprep.subr.bf16.mxu0 %v2495_v24 }
 0x53a   : > { %2695 = vmatpush1.bf16.msra.mxu0 %v2494_v16 }
 0x53b   : > { %v2554_v41 = vpack.c.bf16 %v2550_v62, %v2548_v21  ;;  %v2555_v32 = vpack.c.bf16 %v2551_v23, %v2549_v57 }
 0x53d   : > { %2697 = vmatmul.mubr.bf16.vlgmr.msra.gmra.mrb[8].mxu0 %v3180_v55  ;;  %2719 = vmatprep.subr.bf16.mxu1 %v2555_v32 }
 0x53e   : > { %2720 = vmatpush1.bf16.msra.mxu1 %v2554_v41  ;;  %2706 = vmatprep.mubr.bf16.mxu0 %v3184_v6 }
 0x541   : > { %3000 = vmatmul.mubr.msk.bf16.vlgmr.msra.gmra.mrb[8].mxu1 %vm505_vm1, %v3183_v58 }
 0x542   : > { %2759 = vmatprep.mubr.bf16.mxu1 %v3489_v4 }
 0x545   : > { %2707 = vmatmul.mubr.bf16.gmra.mrb[12].mxu0 %v3186_v5 }
 0x547   : > { %v2611_v39 = vpop.permute.xlu1 %2610 }
 0x548   : > { %v2616_v7 = vpop.permute.xlu0 %2615 }
 0x549   : > { %3001 = vmatmul.mubr.msk.bf16.gmra.mrb[12].mxu1 %vm505_vm1, %v3187_v18 }
 0x54b   : > { %v2621_v60 = vpop.permute.xlu1 %2620 }
 0x54c   : > { %v2626_v10 = vpop.permute.xlu0 %2625 }
 0x610   : > { %v2698_v27 = vpop.f32.mrb[8].mxu0 }
 0x611   : > { %v2700_v22 = vpop.f32.mrb[9].mxu0  ;;  %v2699_v35 = vadd.f32 %v2698_v27, %v2611_v39 }
 0x612   : > { %v2702_v2 = vpop.f32.mrb[10].mxu0  ;;  %v2701_v48 = vadd.f32 %v2700_v22, %v2611_v39 }
 0x613   : > { %v2704_v44 = vpop.f32.mrb[11].mxu0  ;;  %v2703_v40 = vadd.f32 %v2702_v2, %v2616_v7 }
 0x614   : > { %v2751_v53 = vpop.f32.mrb[8].mxu1  ;;  %v2705_v56 = vadd.f32 %v2704_v44, %v2616_v7 }
 0x615   : > { %v2752_v37 = vadd.f32 %v2751_v53, %v2699_v35  ;;  %v2753_v13 = vpop.f32.mrb[9].mxu1 }
 0x616   : > { %v2754_v25 = vadd.f32 %v2753_v13, %v2701_v48  ;;  %v2755_v17 = vpop.f32.mrb[10].mxu1 }
 0x617   : > { %v2778_v4 = vmul.f32 1.442695, %v2752_v37  ;;  %v2756_v28 = vadd.f32 %v2755_v17, %v2703_v40  ;;  %v2757_v49 = vpop.f32.mrb[11].mxu1  ;;  %vm2770_vm1 = vcmp.gt.f32.partialorder %v2752_v37, 0.0 }
 0x618   : > { %v2780_v3 = vmul.f32 1.442695, %v2754_v25  ;;  %v2758_v45 = vadd.f32 %v2757_v49, %v2705_v56  ;;  %v2708_v9 = vpop.f32.mrb[12].mxu0  ;;  %vm2771_vm5 = vcmp.gt.f32.partialorder %v2754_v25, 0.0 }
 0x619   : > { %3220 = vpow2.f32 %v2778_v4  ;;  %v2782_v8 = vmul.f32 1.442695, %v2756_v28  ;;  %v2710_v11 = vpop.f32.mrb[13].mxu0  ;;  %v2709_v46 = vadd.f32 %v2708_v9, %v2621_v60  ;;  %vm2772_vm6 = vcmp.gt.f32.partialorder %v2756_v28, 0.0 }
 0x61a   : > { %3222 = vpow2.f32 %v2780_v3  ;;  %v2784_v29 = vmul.f32 1.442695, %v2758_v45  ;;  %v2712_v54 = vpop.f32.mrb[14].mxu0  ;;  %v2711_v20 = vadd.f32 %v2710_v11, %v2621_v60  ;;  %vm2773_vm10 = vcmp.gt.f32.partialorder %v2758_v45, 0.0 }
 0x61b   : > { %3224 = vpow2.f32 %v2782_v8  ;;  %v2714_v50 = vpop.f32.mrb[15].mxu0  ;;  %v2713_v31 = vadd.f32 %v2712_v54, %v2626_v10 }
 0x61c   : > { %3226 = vpow2.f32 %v2784_v29  ;;  %v2761_v43 = vpop.f32.mrb[12].mxu1  ;;  %v2715_v36 = vadd.f32 %v2714_v50, %v2626_v10 }
 0x61d   : > { %v2762_v38 = vadd.f32 %v2761_v43, %v2709_v46  ;;  %v2763_v47 = vpop.f32.mrb[13].mxu1 }
 0x61e   : > { %v2764_v42 = vadd.f32 %v2763_v47, %v2711_v20  ;;  %v2765_v33 = vpop.f32.mrb[14].mxu1 }
 0x61f   : > { %v2786_v19 = vmul.f32 1.442695, %v2762_v38  ;;  %v2766_v52 = vadd.f32 %v2765_v33, %v2713_v31  ;;  %v2767_v1 = vpop.f32.mrb[15].mxu1  ;;  %vm2774_vm11 = vcmp.gt.f32.partialorder %v2762_v38, 0.0 }
 0x620   : > { %v2788_v26 = vmul.f32 1.442695, %v2764_v42  ;;  %v2768_v30 = vadd.f32 %v2767_v1, %v2715_v36  ;;  %vm2775_vm12 = vcmp.gt.f32.partialorder %v2764_v42, 0.0 }
 0x621   : > { %3228 = vpow2.f32 %v2786_v19  ;;  %v2790_v34 = vmul.f32 1.442695, %v2766_v52  ;;  %vm2776_vm15 = vcmp.gt.f32.partialorder %v2766_v52, 0.0 }
 0x622   : > { %3230 = vpow2.f32 %v2788_v26  ;;  %v2792_v59 = vmul.f32 1.442695, %v2768_v30  ;;  %vm2777_vm0 = vcmp.gt.f32.partialorder %v2768_v30, 0.0 }
 0x623   : > { %v3221_v63 = vpop.eup %3220  ;;  %3232 = vpow2.f32 %v2790_v34 }
 0x624   : > { %v3223_v61 = vpop.eup %3222  ;;  %v3002_v12 = vadd.f32 -1.0, %v3221_v63  ;;  %3234 = vpow2.f32 %v2792_v59 }
 0x625   : > { %v3225_v0 = vpop.eup %3224  ;;  %v3003_v16 = vadd.f32 -1.0, %v3223_v61 }
 0x626   : > { %v3227_v24 = vpop.eup %3226  ;;  %v2802_v51 = vsel %vm2770_vm1, %v2752_v37, %v3002_v12  ;;  %v3004_v14 = vadd.f32 -1.0, %v3225_v0 }
 0x627   : > { %2810 = vst [vmem:[%s4060_s11 + $0x80] sm:$0xff] %v2802_v51  ;;  %v2803_v15 = vsel %vm2771_vm5, %v2754_v25, %v3003_v16  ;;  %v3005_v21 = vadd.f32 -1.0, %v3227_v24 }
 0x628   : > { %2811 = vst [vmem:[%s4060_s11 + $0x88] sm:$0xff] %v2803_v15  ;;  %v2804_v57 = vsel %vm2772_vm6, %v2756_v28, %v3004_v14 }
 0x629   : > { %2812 = vst [vmem:[%s4060_s11 + $0x90] sm:$0xff] %v2804_v57  ;;  %v2805_v62 = vsel %vm2773_vm10, %v2758_v45, %v3005_v21 }
 0x62a   : > { %2813 = vst [vmem:[%s4060_s11 + $0x98] sm:$0xff] %v2805_v62 }
 0x62b   : > { %v3229_v23 = vpop.eup %3228 }
 0x62c   : > { %v3231_v55 = vpop.eup %3230  ;;  %v3006_v6 = vadd.f32 -1.0, %v3229_v23 }
 0x62d   : > { %v3233_v41 = vpop.eup %3232  ;;  %v3007_v32 = vadd.f32 -1.0, %v3231_v55 }
 0x62e   : > { %v3235_v58 = vpop.eup %3234  ;;  %v2806_v5 = vsel %vm2774_vm11, %v2762_v38, %v3006_v6  ;;  %v3008_v18 = vadd.f32 -1.0, %v3233_v41 }
 0x62f   : > { %2814 = vst [vmem:[%s4060_s11 + $0xa0] sm:$0xff] %v2806_v5  ;;  %v2807_v27 = vsel %vm2775_vm12, %v2764_v42, %v3007_v32  ;;  %v3009_v22 = vadd.f32 -1.0, %v3235_v58 }
 0x630   : > { %2815 = vst [vmem:[%s4060_s11 + $0xa8] sm:$0xff] %v2807_v27  ;;  %v2808_v39 = vsel %vm2776_vm15, %v2766_v52, %v3008_v18 }
 0x631   : > { %2816 = vst [vmem:[%s4060_s11 + $0xb0] sm:$0xff] %v2808_v39  ;;  %v2809_v2 = vsel %vm2777_vm0, %v2768_v30, %v3009_v22 }
 0x632   : > { %2817 = vst [vmem:[%s4060_s11 + $0xb8] sm:$0xff] %v2809_v2 }
 0x633   : > { %3391 = shalt.err (!%p3388_p12)
}
 0x634   : > { %s3392_s11 = scalar_lea.hbm %s4937_s24, 3072  ;;  %s3396_s28 = scalar_lea.hbm %s5043_s21, 6144 }
 0x635   : > { %p3393_p13 = scmp.ne.s32.totalorder %s4937_s24, %s3392_s11  ;;  %p3397_p9 = scmp.lt.u32.totalorder %s4937_s24, %s5043_s21 }
 0x636   : > { %p3398_p4 = scmp.lt.u32.totalorder %s3396_s28, %s3392_s11  ;;  %p3400_p6 = scmp.lt.u32.totalorder %s3392_s11, %s4937_s24 }
 0x637   : > { %p3394_p3 = pnand %p3393_p13, %p5044_p0 }
 0x638   : > { %p3399_p8 = por %p3398_p4, %p3397_p9 }
 0x639   : > { %p3395_p7 = pneg %p3394_p3 }
 0x63a   : > { %p3401_p2 = por %p3400_p6, %p3399_p8 }
 0x63c   : > { %p3402_p5 = pnand %p3401_p2, %p3395_p7 }
 0x63e   : > { %3405 = shalt.err (!%p3402_p5)
}
 0x63f   : > { %s3491_s20 = smov 256  }
 0x640   : > { %3066 = dma.vmem_to_hbm [thread:$0]  (%p5044_p0), %s4940_s17, 3072, %s4937_s24, %s2819_s10, %s3491_s20, %s3491_s20, %s5039_s25  }
 0x641 PF: > { %s2847_s30 = sand.u32 1, %s3440_s13   ;;  %p5045_p10 = scmp.ne.s32.totalorder %s5028_s12, 0 }
 0x642   : > { %p5046_p1 = scmp.ge.s32.totalorder %s3452_s16, 2  ;;  %s2848_s11 = scalar_lea.sflag [#allocation5], %s2847_s30 }
 0x644   : > { %p3086_p11 = pnand %p5046_p1, %p5045_p10 }
 0x646   : > { %3435 = dma.done.wait (!%p3086_p11), %s2848_s11, 3072  }
 0x647   : > { %3437 = vsyncadd (!%p3086_p11), %s2848_s11, 4294964224  ;;  %p25_p12 = scmp.ge.s32.totalorder %s3683_s23, 4   ;;  %s5047_s13 = smov %s3444_s14 }
 0x648   : > { %s5048_s14 = smov %s3448_s15  ;;  %s5049_s15 = smov %s3694_s29 }
 0x649   : > { %s5050_s16 = smov %s3683_s23  ;;  %27 = sbr.rel (!%p25_p12) target bundleno = 11 (0xb), region = 121 }
 0x650   :  { %2853 = vsyncpa [#allocation4], 1 }
 0x651   :  { %2855 = vsyncpa [#allocation4 + $0x1], 1 }
 0x652   :  { %2856 = vsyncpa [#allocation7], 1 }
 0x653   :  { %2857 = vsyncpa [#allocation10], 1 }
 0x654   :  { %2858 = vsyncpa [#allocation5], 1 }
 0x655   :  { %2860 = vsyncpa [#allocation5 + $0x1], 1 }

</bundles_post_ra>
